<compile_context>
chip_gen: v6e
topology: v6e:2x2x1
jax: 0.10.0
libtpu: 0.0.40
codegen_flags: <defaults>
</compile_context>

<pallas_src>
import math

import jax
import jax.numpy as jnp
from jax import lax
from jax.experimental import pallas as pl
from jax.experimental.pallas import tpu as pltpu

_SQRT_HALF = 1.0 / math.sqrt(2.0)


def mlp_block_kernel(x_ref, scale_ref, shift_ref, b1_ref, b2_ref,
                     w1_ref, w2_ref, o_ref):
    """One batch tile: folded-BN affine -> dense_1 -> GELU -> dense_2 -> +x."""
    x = x_ref[...].astype(jnp.float32)                     # [TB, H]

    # BatchNorm folded to a single affine (stats precomputed over full batch).
    xn = x * scale_ref[...] + shift_ref[...]               # [TB, H], f32

    # dense_1 on the MXU: bf16 operands, f32 accumulation.
    h = jnp.dot(xn.astype(jnp.bfloat16), w1_ref[...],
                preferred_element_type=jnp.float32)        # [TB, M]
    h = h + b1_ref[...]

    # Exact erf GELU (matches PyTorch nn.GELU() default).
    h = 0.5 * h * (1.0 + lax.erf(h * _SQRT_HALF))

    # dense_2 on the MXU: bf16 operands, f32 accumulation.
    y = jnp.dot(h.astype(jnp.bfloat16), w2_ref[...],
                preferred_element_type=jnp.float32)        # [TB, H]

    # Bias + residual in one elementwise pass.
    o_ref[...] = (y + b2_ref[...] + x).astype(o_ref.dtype)


def mlp_block(x, gamma, beta, w1, b1, w2, b2, *, block_b=256):
    """x: [B, H]; w1: [H, M]; w2: [M, H] (already transposed from PyTorch)."""
    B, H = x.shape
    M = w1.shape[1]

    # ---- BatchNorm1d training-mode statistics over the FULL batch (wrapper
    # pre-pass; tiny and mem-bound), folded into scale/shift so the kernel can
    # tile the batch axis freely.
    xf = x.astype(jnp.float32)
    mean = jnp.mean(xf, axis=0, keepdims=True)
    var = jnp.mean(jnp.square(xf - mean), axis=0, keepdims=True)   # biased var
    inv_std = lax.rsqrt(var + 1e-5)
    scale = gamma.astype(jnp.float32) * inv_std                    # [1, H]
    shift = beta.astype(jnp.float32) - mean * scale                # [1, H]

    # bf16 weights: half the weight DMA bytes, MXU runs at its bf16 rate.
    w1b = w1.astype(jnp.bfloat16)
    w2b = w2.astype(jnp.bfloat16)
    b1f = b1.astype(jnp.float32).reshape(1, M)
    b2f = b2.astype(jnp.float32).reshape(1, H)

    # Batch tile: >=256 rows fills the v6e/v7x MXU; clamp to B for small inputs
    # and keep a multiple of 8 for the (8,128) tiling constraint.
    tb = min(block_b, B)
    if tb != B:
        tb = max(8, (tb // 8) * 8)
    grid = (pl.cdiv(B, tb),)

    resident = lambda shape: pl.BlockSpec(shape, lambda i: (0, 0))

    flops = 4 * B * H * M                      # two [B,H/M] x [H/M, M/H] matmuls
    bytes_accessed = (B * H * x.dtype.itemsize * 2      # x in, out
                      + (H * M + M * H) * 2             # bf16 weights
                      + 4 * (4 * H + 2 * M))            # scale/shift/biases
    cost = pl.CostEstimate(flops=flops, transcendentals=B * M,
                           bytes_accessed=bytes_accessed)

    # VMEM plan sized for v7x's 64 MiB: double-buffered x/out tiles + resident
    # bf16 weights + the [tb, M] f32 intermediate, clamped into [32, 56] MiB.
    vmem_est = (2 * tb * H * 2 * 4             # x + out tiles, double-buffered
                + 2 * 2 * H * M * 2            # w1 + w2 bf16 (2x buffering)
                + 2 * tb * M * 4               # GELU intermediate + slack
                + 4 * (4 * H + 2 * M))
    vmem_limit = int(min(max(2 * vmem_est, 32 * 1024 * 1024),
                         56 * 1024 * 1024))

    return pl.pallas_call(
        mlp_block_kernel,
        out_shape=jax.ShapeDtypeStruct((B, H), x.dtype),
        grid=grid,
        in_specs=[
            pl.BlockSpec((tb, H), lambda i: (i, 0)),   # x  (pipelined per tile)
            resident((1, H)),                          # scale (BN folded)
            resident((1, H)),                          # shift (BN folded)
            resident((1, M)),                          # b1
            resident((1, H)),                          # b2
            resident((H, M)),                          # w1 (VMEM-resident)
            resident((M, H)),                          # w2 (VMEM-resident)
        ],
        out_specs=pl.BlockSpec((tb, H), lambda i: (i, 0)),
        compiler_params=pltpu.CompilerParams(
            dimension_semantics=("parallel",),         # v7x: 2 TCs share tiles
            vmem_limit_bytes=vmem_limit),
        cost_estimate=cost,
    )(x, scale, shift, b1f, b2f, w1b, w2b)


def reference(x, gamma, beta, w1, b1, w2, b2):
    """Pure-JAX f32 reference of the PyTorch forward (training-mode BN)."""
    xf = x.astype(jnp.float32)
    mean = jnp.mean(xf, axis=0, keepdims=True)
    var = jnp.mean((xf - mean) ** 2, axis=0, keepdims=True)
    xn = (xf - mean) / jnp.sqrt(var + 1e-5) * gamma + beta
    h = xn @ w1 + b1
    h = 0.5 * h * (1.0 + lax.erf(h * _SQRT_HALF))
    y = h @ w2 + b2
    return (y + xf).astype(x.dtype)


if __name__ == "__main__":
    # Small shapes consistent with the module's 2-D forward ([batch, hidden]),
    # chosen so the batch-tile grid has more than one step (512 / 256 = 2).
    batch, hidden_dim, mlp_dim = 512, 256, 512

    key = jax.random.PRNGKey(0)
    kx, kg, kb, kw1, kb1, kw2, kb2 = jax.random.split(key, 7)

    x = jax.random.normal(kx, (batch, hidden_dim), dtype=jnp.float32)

    # BatchNorm1d params (perturb gamma so the affine term is exercised).
    gamma = 1.0 + 0.1 * jax.random.normal(kg, (1, hidden_dim), jnp.float32)
    beta = 0.1 * jax.random.normal(kb, (1, hidden_dim), jnp.float32)

    # Linear params, PyTorch-style init, stored transposed ([in, out]).
    lim1 = 1.0 / math.sqrt(hidden_dim)
    w1 = jax.random.uniform(kw1, (hidden_dim, mlp_dim), jnp.float32, -lim1, lim1)
    b1 = jax.random.uniform(kb1, (1, mlp_dim), jnp.float32, -lim1, lim1)
    lim2 = 1.0 / math.sqrt(mlp_dim)
    w2 = jax.random.uniform(kw2, (mlp_dim, hidden_dim), jnp.float32, -lim2, lim2)
    b2 = jax.random.uniform(kb2, (1, hidden_dim), jnp.float32, -lim2, lim2)

    fn = jax.jit(mlp_block)
    out = jax.block_until_ready(fn(x, gamma, beta, w1, b1, w2, b2))

    ref = reference(x, gamma, beta, w1, b1, w2, b2)
    assert out.shape == (batch, hidden_dim)
    # Tolerance accounts for bf16 MXU operands (f32 accumulation).
    assert jnp.allclose(out, ref, atol=3e-2, rtol=3e-2), (
        f"mismatch vs reference, max abs err={jnp.max(jnp.abs(out - ref))}")

    print("KERNEL_OK")
</pallas_src>

<mosaic_0001>
module attributes {stable_mosaic.version = 11 : i64} {
  func.func @mlp_block_kernel(%arg0: i32, %arg1: memref<256x256xf32, #tpu.memory_space<vmem>>, %arg2: memref<1x256xf32, #tpu.memory_space<vmem>>, %arg3: memref<1x256xf32, #tpu.memory_space<vmem>>, %arg4: memref<1x512xf32, #tpu.memory_space<vmem>>, %arg5: memref<1x256xf32, #tpu.memory_space<vmem>>, %arg6: memref<256x512xbf16, #tpu.memory_space<vmem>>, %arg7: memref<512x256xbf16, #tpu.memory_space<vmem>>, %arg8: memref<256x256xf32, #tpu.memory_space<vmem>>) attributes {dimension_semantics = [#tpu.dimension_semantics<parallel>], iteration_bounds = array<i64: 2>, scalar_prefetch = 0 : i64, scratch_operands = 0 : i64, tpu.core_type = #tpu.core_type<tc>, window_params = [{transform_indices = @transform_0, window_bounds = array<i64: 256, 256>}, {pipeline_mode = #tpu.pipeline_mode<synchronous>, transform_indices = @transform_1, window_bounds = array<i64: 1, 256>}, {pipeline_mode = #tpu.pipeline_mode<synchronous>, transform_indices = @transform_2, window_bounds = array<i64: 1, 256>}, {pipeline_mode = #tpu.pipeline_mode<synchronous>, transform_indices = @transform_3, window_bounds = array<i64: 1, 512>}, {pipeline_mode = #tpu.pipeline_mode<synchronous>, transform_indices = @transform_4, window_bounds = array<i64: 1, 256>}, {pipeline_mode = #tpu.pipeline_mode<synchronous>, transform_indices = @transform_5, window_bounds = array<i64: 256, 512>}, {pipeline_mode = #tpu.pipeline_mode<synchronous>, transform_indices = @transform_6, window_bounds = array<i64: 512, 256>}, {transform_indices = @transform_7, window_bounds = array<i64: 256, 256>}]} {
    %c0 = arith.constant 0 : index
    %c0_0 = arith.constant 0 : index
    %0 = vector.load %arg1[%c0, %c0_0] : memref<256x256xf32, #tpu.memory_space<vmem>>, vector<256x256xf32>
    %c0_1 = arith.constant 0 : index
    %c0_2 = arith.constant 0 : index
    %1 = vector.load %arg2[%c0_1, %c0_2] : memref<1x256xf32, #tpu.memory_space<vmem>>, vector<1x256xf32>
    %2 = vector.broadcast %1 : vector<1x256xf32> to vector<256x256xf32>
    %3 = arith.mulf %0, %2 : vector<256x256xf32>
    %c0_3 = arith.constant 0 : index
    %c0_4 = arith.constant 0 : index
    %4 = vector.load %arg3[%c0_3, %c0_4] : memref<1x256xf32, #tpu.memory_space<vmem>>, vector<1x256xf32>
    %5 = vector.broadcast %4 : vector<1x256xf32> to vector<256x256xf32>
    %6 = arith.addf %3, %5 : vector<256x256xf32>
    %7 = arith.truncf %6 : vector<256x256xf32> to vector<256x256xbf16>
    %c0_5 = arith.constant 0 : index
    %c0_6 = arith.constant 0 : index
    %8 = vector.load %arg6[%c0_5, %c0_6] : memref<256x512xbf16, #tpu.memory_space<vmem>>, vector<256x512xbf16>
    %cst = arith.constant dense<0.000000e+00> : vector<256x512xf32>
    %9 = tpu.matmul %7, %8, %cst {dimension_numbers = #tpu.dot_dimension_numbers<[1], [0], [0], [1], [0, 0, 1, 1], [], []>} : vector<256x256xbf16>, vector<256x512xbf16>, vector<256x512xf32> -> vector<256x512xf32>
    %c0_7 = arith.constant 0 : index
    %c0_8 = arith.constant 0 : index
    %10 = vector.load %arg4[%c0_7, %c0_8] : memref<1x512xf32, #tpu.memory_space<vmem>>, vector<1x512xf32>
    %11 = vector.broadcast %10 : vector<1x512xf32> to vector<256x512xf32>
    %12 = arith.addf %9, %11 : vector<256x512xf32>
    %cst_9 = arith.constant 5.000000e-01 : f32
    %13 = vector.broadcast %cst_9 : f32 to vector<256x512xf32>
    %14 = arith.mulf %13, %12 : vector<256x512xf32>
    %cst_10 = arith.constant 0.707106769 : f32
    %15 = vector.broadcast %cst_10 : f32 to vector<256x512xf32>
    %16 = arith.mulf %12, %15 : vector<256x512xf32>
    %17 = math.erf %16 : vector<256x512xf32>
    %cst_11 = arith.constant 1.000000e+00 : f32
    %18 = vector.broadcast %cst_11 : f32 to vector<256x512xf32>
    %19 = arith.addf %18, %17 : vector<256x512xf32>
    %20 = arith.mulf %14, %19 : vector<256x512xf32>
    %21 = arith.truncf %20 : vector<256x512xf32> to vector<256x512xbf16>
    %c0_12 = arith.constant 0 : index
    %c0_13 = arith.constant 0 : index
    %22 = vector.load %arg7[%c0_12, %c0_13] : memref<512x256xbf16, #tpu.memory_space<vmem>>, vector<512x256xbf16>
    %cst_14 = arith.constant dense<0.000000e+00> : vector<256x256xf32>
    %23 = tpu.matmul %21, %22, %cst_14 {dimension_numbers = #tpu.dot_dimension_numbers<[1], [0], [0], [1], [0, 0, 1, 1], [], []>} : vector<256x512xbf16>, vector<512x256xbf16>, vector<256x256xf32> -> vector<256x256xf32>
    %c0_15 = arith.constant 0 : index
    %c0_16 = arith.constant 0 : index
    %24 = vector.load %arg5[%c0_15, %c0_16] : memref<1x256xf32, #tpu.memory_space<vmem>>, vector<1x256xf32>
    %25 = vector.broadcast %24 : vector<1x256xf32> to vector<256x256xf32>
    %26 = arith.addf %23, %25 : vector<256x256xf32>
    %27 = arith.addf %26, %0 : vector<256x256xf32>
    %c0_17 = arith.constant 0 : index
    %c0_18 = arith.constant 0 : index
    %28 = vector.load %arg8[%c0_17, %c0_18] : memref<256x256xf32, #tpu.memory_space<vmem>>, vector<256x256xf32>
    tpu.vector_store %arg8[%c0_17, %c0_18], %27 {strides = array<i32>} : memref<256x256xf32, #tpu.memory_space<vmem>>, vector<256x256xf32>,
    return
  }
  func.func @transform_0(%arg0: i32) -> (i32, i32) {
    %c0_i32 = arith.constant 0 : i32
    %c0_i32_0 = arith.constant 0 : i32
    return %arg0, %c0_i32 : i32, i32
  }
  func.func @transform_1(%arg0: i32) -> (i32, i32) {
    %c0_i32 = arith.constant 0 : i32
    %c0_i32_0 = arith.constant 0 : i32
    %c0_i32_1 = arith.constant 0 : i32
    return %c0_i32, %c0_i32_0 : i32, i32
  }
  func.func @transform_2(%arg0: i32) -> (i32, i32) {
    %c0_i32 = arith.constant 0 : i32
    %c0_i32_0 = arith.constant 0 : i32
    %c0_i32_1 = arith.constant 0 : i32
    return %c0_i32, %c0_i32_0 : i32, i32
  }
  func.func @transform_3(%arg0: i32) -> (i32, i32) {
    %c0_i32 = arith.constant 0 : i32
    %c0_i32_0 = arith.constant 0 : i32
    %c0_i32_1 = arith.constant 0 : i32
    return %c0_i32, %c0_i32_0 : i32, i32
  }
  func.func @transform_4(%arg0: i32) -> (i32, i32) {
    %c0_i32 = arith.constant 0 : i32
    %c0_i32_0 = arith.constant 0 : i32
    %c0_i32_1 = arith.constant 0 : i32
    return %c0_i32, %c0_i32_0 : i32, i32
  }
  func.func @transform_5(%arg0: i32) -> (i32, i32) {
    %c0_i32 = arith.constant 0 : i32
    %c0_i32_0 = arith.constant 0 : i32
    %c0_i32_1 = arith.constant 0 : i32
    return %c0_i32, %c0_i32_0 : i32, i32
  }
  func.func @transform_6(%arg0: i32) -> (i32, i32) {
    %c0_i32 = arith.constant 0 : i32
    %c0_i32_0 = arith.constant 0 : i32
    %c0_i32_1 = arith.constant 0 : i32
    return %c0_i32, %c0_i32_0 : i32, i32
  }
  func.func @transform_7(%arg0: i32) -> (i32, i32) {
    %c0_i32 = arith.constant 0 : i32
    %c0_i32_0 = arith.constant 0 : i32
    return %arg0, %c0_i32 : i32, i32
  }
}

</mosaic_0001>

<bundles_post_ra>
// kernel: mlp_block.1
= control target key start
LH: loop header
LB: loop body
LE: loop exit
PB: predicated region body
PF: predicated region fallthrough
CT: control target
= control target key end

     0   :  { %12 = vsyncpa [#allocation3], 0  ;;  %s5994_s0 = inlined_call_operand.vmem [shape: f32[512,256], index: 0, kind: input, shape index: {}]   ;;  %s5995_s1 = inlined_call_operand.vmem [shape: f32[1,256], index: 1, kind: input, shape index: {}]   ;;  %s5996_s2 = inlined_call_operand.vmem [shape: f32[1,256], index: 2, kind: input, shape index: {}]   ;;  %s5997_s3 = inlined_call_operand.vmem [shape: f32[1,512], index: 3, kind: input, shape index: {}]   ;;  %s5998_s4 = inlined_call_operand.vmem [shape: f32[1,256], index: 4, kind: input, shape index: {}]   ;;  %s5999_s5 = inlined_call_operand.vmem [shape: bf16[256,512], index: 5, kind: input, shape index: {}]   ;;  %s6000_s6 = inlined_call_operand.vmem [shape: bf16[512,256], index: 6, kind: input, shape index: {}]   ;;  %s6001_s7 = inlined_call_operand.hbm [shape: f32[512,256], index: 7, kind: output, shape index: {}]  }
   0x1   :  { %14 = vsyncpa [#allocation3 + $0x1], 0  ;;  %s3817_s24 = smov 0   ;;  %s3819_s25 = smov 0  }
   0x2   :  { %s3821_s26 = smov 0   ;;  %s3823_s27 = smov 0  }
   0x3 LB: > { %s3838_s28 = sadd.s32 4294967295, %s3772_s27   ;;  %s3014_s29 = sadd.s32 4294967294, %s3772_s27   ;;  %s3772_s27 = sphi %s3823_s27, %s6035_s27   ;;  %s3768_s26 = sphi %s3821_s26, %s6034_s26   ;;  %s3764_s25 = sphi %s3819_s25, %s6033_s25   ;;  %s3760_s24 = sphi %s3817_s24, %s6032_s24  }
   0x4   : > { %s3842_s30 = sadd.s32 1, %s3772_s27   ;;  %s179_s8 = sadd.s32 1, %s3768_s26 }
   0x5   : > { %s176_s9 = ssub.s32 %s3772_s27, %s3842_s30  ;;  %p189_p0 = scmp.ne.s32.totalorder %s3768_s26, %s3764_s25 }
   0x6   : > { %p177_p1 = scmp.eq.s32.totalorder %s176_s9, 0  ;;  %p190_p2 = scmp.eq.s32.totalorder %s3838_s28, 1 }
   0x7   : > { %p195_p3 = scmp.ne.s32.totalorder %s3764_s25, %s3760_s24  ;;  %p196_p4 = scmp.eq.s32.totalorder %s3014_s29, 1 }
   0x8   : > { %s3853_s10 = scalar_select %p177_p1, %s3768_s26, %s179_s8  }
   0x9   : > { %p3855_p5 = por %p190_p2, %p189_p0  ;;  %p3859_p6 = por %p196_p4, %p195_p3 }
   0xa   : > { %p3017_p7 = scmp.ge.s32.totalorder %s3772_s27, 1  ;;  %p242_p8 = scmp.lt.s32.totalorder %s3772_s27, 3 }
   0xc   : > { %p243_p9 = pnand %p3017_p7, %p242_p8 }
   0xe   : > { %246 = sbr.rel (%p243_p9) target bundleno = 718 (0x2ce), region = 48 }
  0x13   : > { %v3200_v0 = vld [vmem:[%s5999_s5 + $0xe4] ss:$16 sps:$4 sm:$0xff]   ;;  %v3202_v1 = vld [vmem:[%s5999_s5 + $0xec] ss:$16 sps:$4 sm:$0xff]   ;;  %v3204_v2 = vld [vmem:[%s5999_s5 + $0xe0] ss:$16 sps:$4 sm:$0xff]   ;;  %v349_v36 = vlaneseq }
  0x14   : > { %937 = vmatprep.subr.bf16.mxu0 %v3200_v0  ;;  %v3205_v3 = vld [vmem:[%s5999_s5 + $0xe8] ss:$16 sps:$4 sm:$0xff]   ;;  %1130 = vmatprep.subr.bf16.mxu1 %v3202_v1  ;;  %v3206_v4 = vld [vmem:[%s5999_s5 + $0xc4] ss:$16 sps:$4 sm:$0xff]   ;;  %v3208_v5 = vld [vmem:[%s5999_s5 + $0xcc] ss:$16 sps:$4 sm:$0xff]  }
  0x15   : > { %938 = vmatpush1.bf16.msra.mxu0 %v3204_v2  ;;  %1131 = vmatpush1.bf16.msra.mxu1 %v3205_v3  ;;  %v3210_v6 = vld [vmem:[%s5999_s5 + $0xc0] ss:$16 sps:$4 sm:$0xff]   ;;  %v3211_v7 = vld [vmem:[%s5999_s5 + $0xc8] ss:$16 sps:$4 sm:$0xff]   ;;  %v3212_v8 = vld [vmem:[%s5999_s5 + $0xa4] ss:$16 sps:$4 sm:$0xff]  }
  0x16   : > { %939 = vmatprep.subr.bf16.mxu0 %v3206_v4  ;;  %1132 = vmatprep.subr.bf16.mxu1 %v3208_v5  ;;  %v3214_v9 = vld [vmem:[%s5999_s5 + $0xac] ss:$16 sps:$4 sm:$0xff]   ;;  %v3216_v10 = vld [vmem:[%s5999_s5 + $0xa0] ss:$16 sps:$4 sm:$0xff]   ;;  %v3217_v11 = vld [vmem:[%s5999_s5 + $0xa8] ss:$16 sps:$4 sm:$0xff]  }
  0x17   : > { %v3218_v12 = vld [vmem:[%s5999_s5 + $0x84] ss:$16 sps:$4 sm:$0xff]   ;;  %v3220_v13 = vld [vmem:[%s5999_s5 + $0x8c] ss:$16 sps:$4 sm:$0xff]   ;;  %v3222_v14 = vld [vmem:[%s5999_s5 + $0x80] ss:$16 sps:$4 sm:$0xff]  }
  0x18   : > { %v3223_v15 = vld [vmem:[%s5999_s5 + $0x88] ss:$16 sps:$4 sm:$0xff]   ;;  %v3224_v16 = vld [vmem:[%s5999_s5 + $0x64] ss:$16 sps:$4 sm:$0xff]   ;;  %v3226_v17 = vld [vmem:[%s5999_s5 + $0x6c] ss:$16 sps:$4 sm:$0xff]  }
  0x19   : > { %940 = vmatpush1.bf16.msra.mxu0 %v3210_v6  ;;  %1133 = vmatpush1.bf16.msra.mxu1 %v3211_v7  ;;  %v3228_v18 = vld [vmem:[%s5999_s5 + $0x60] ss:$16 sps:$4 sm:$0xff]   ;;  %v3229_v19 = vld [vmem:[%s5999_s5 + $0x68] ss:$16 sps:$4 sm:$0xff]   ;;  %v3230_v20 = vld [vmem:[%s5999_s5 + $0x44] ss:$16 sps:$4 sm:$0xff]  }
  0x1a   : > { %941 = vmatprep.subr.bf16.mxu0 %v3212_v8  ;;  %1134 = vmatprep.subr.bf16.mxu1 %v3214_v9  ;;  %v3232_v21 = vld [vmem:[%s5999_s5 + $0x4c] ss:$16 sps:$4 sm:$0xff]   ;;  %v3234_v22 = vld [vmem:[%s5999_s5 + $0x40] ss:$16 sps:$4 sm:$0xff]   ;;  %v3235_v23 = vld [vmem:[%s5999_s5 + $0x48] ss:$16 sps:$4 sm:$0xff]  }
  0x1b   : > { %v3236_v24 = vld [vmem:[%s5999_s5 + $0x24] ss:$16 sps:$4 sm:$0xff]   ;;  %v3238_v25 = vld [vmem:[%s5999_s5 + $0x2c] ss:$16 sps:$4 sm:$0xff]   ;;  %v3240_v26 = vld [vmem:[%s5999_s5 + $0x20] ss:$16 sps:$4 sm:$0xff]  }
  0x1c   : > { %v3241_v27 = vld [vmem:[%s5999_s5 + $0x28] ss:$16 sps:$4 sm:$0xff]   ;;  %v3242_v28 = vld [vmem:[%s5999_s5 + $0x4] ss:$16 sps:$4 sm:$0xff]   ;;  %v3244_v29 = vld [vmem:[%s5999_s5 + $0xc] ss:$16 sps:$4 sm:$0xff]  }
  0x1d   : > { %942 = vmatpush1.bf16.msra.mxu0 %v3216_v10  ;;  %1135 = vmatpush1.bf16.msra.mxu1 %v3217_v11  ;;  %s3019_s17 = sshll.u32 %s3838_s28, 5  ;;  %v3246_v30 = vld [vmem:[%s5999_s5] ss:$16 sps:$4 sm:$0xff]   ;;  %v3247_v31 = vld [vmem:[%s5999_s5 + $0x8] ss:$16 sps:$4 sm:$0xff]   ;;  %v3983_v40 = vshrl.u32 %v349_v36, 7 }
  0x1e   : > { %943 = vmatprep.subr.bf16.mxu0 %v3218_v12  ;;  %1136 = vmatprep.subr.bf16.mxu1 %v3220_v13  ;;  %v3248_v32 = vld [vmem:[%s5999_s5 + $0x1e4] ss:$16 sps:$4 sm:$0xff]   ;;  %p276_p10 = scmp.lt.s32.totalorder %s3019_s17, 63  ;;  %v3250_v33 = vld [vmem:[%s5999_s5 + $0x1ec] ss:$16 sps:$4 sm:$0xff]   ;;  %s272_s16 = sand.u32 1, %s3764_s25  }
  0x1f   : > { %v3252_v34 = vld [vmem:[%s5999_s5 + $0x1e0] ss:$16 sps:$4 sm:$0xff]   ;;  %v3253_v35 = vld [vmem:[%s5999_s5 + $0x1e8] ss:$16 sps:$4 sm:$0xff]   ;;  %v3254_v37 = vld [vmem:[%s5999_s5 + $0x1c4] ss:$16 sps:$4 sm:$0xff]  }
  0x20   : > { %s6037_s17 = smov (!%p276_p10, %s3019_s17), 63  ;;  %v3256_v38 = vld [vmem:[%s5999_s5 + $0x1cc] ss:$16 sps:$4 sm:$0xff]   ;;  %v3258_v39 = vld [vmem:[%s5999_s5 + $0x1c0] ss:$16 sps:$4 sm:$0xff]   ;;  %v4009_v47 = vsub.s32 1, %v3983_v40 }
  0x21   : > { %944 = vmatpush1.bf16.msra.mxu0 %v3222_v14  ;;  %1137 = vmatpush1.bf16.msra.mxu1 %v3223_v15  ;;  %v3259_v41 = vld [vmem:[%s5999_s5 + $0x1c8] ss:$16 sps:$4 sm:$0xff]   ;;  %v3260_v42 = vld [vmem:[%s5999_s5 + $0x1a4] ss:$16 sps:$4 sm:$0xff]   ;;  %s3156_s13 = sshll.u32 %s6037_s17, 4  ;;  %v4041_v59 = vsub.s32 0, %v3983_v40 }
  0x22   : > { %945 = vmatprep.subr.bf16.mxu0 %v3224_v16  ;;  %1138 = vmatprep.subr.bf16.mxu1 %v3226_v17  ;;  %v3262_v43 = vld [vmem:[%s5999_s5 + $0x1ac] ss:$16 sps:$4 sm:$0xff]   ;;  %v3264_v44 = vld [vmem:[%s5999_s5 + $0x1a0] ss:$16 sps:$4 sm:$0xff]   ;;  %v3265_v45 = vld [vmem:[%s5999_s5 + $0x1a8] ss:$16 sps:$4 sm:$0xff]   ;;  %s4003_s23 = scalar_lea.vmem %s5994_s0, %s3156_s13 }
  0x23   : > { %v3266_v46 = vld [vmem:[%s5999_s5 + $0x184] ss:$16 sps:$4 sm:$0xff]   ;;  %6006 = vst [vmem:[#allocation5_spill] sm:$0xff] %v4009_v47  ;;  %v3268_v48 = vld [vmem:[%s5999_s5 + $0x18c] ss:$16 sps:$4 sm:$0xff]   ;;  %6007 = vst [vmem:[#allocation6_spill] sm:$0xff] %v4041_v59 }
  0x24   : > { %v284_v49 = vld [vmem:[%s4003_s23 + $0x8] sm:$0xff]  ;;  %v286_v50 = vld [vmem:[%s4003_s23 + $0x18] sm:$0xff]  ;;  %v347_v51 = vld [vmem:[%s5995_s1] sm:$0x3]  ;;  %s3018_s18 = sshll.u32 %s272_s16, 9  ;;  %s3158_s20 = sshll.u32 %s3838_s28, 13 }
  0x25   : > { %946 = vmatpush1.bf16.msra.mxu0 %v3228_v18  ;;  %1139 = vmatpush1.bf16.msra.mxu1 %v3229_v19  ;;  %v423_v52 = vld [vmem:[%s5996_s2] sm:$0x3]  ;;  %v3271_v54 = vld [vmem:[%s5999_s5 + $0x188] ss:$16 sps:$4 sm:$0xff]   ;;  %v4029_v55 = vrot.slane %v347_v51, %v4009_v47  ;;  %v3272_v56 = vld [vmem:[%s5999_s5 + $0x164] ss:$16 sps:$4 sm:$0xff]   ;;  %v4066_v6 = vrot.slane %v347_v51, %v4041_v59  ;;  %s5945_s29 = scalar_lea.hbm %s6001_s7, %s3158_s20 }
  0x26   : > { %947 = vmatprep.subr.bf16.mxu0 %v3230_v20  ;;  %1140 = vmatprep.subr.bf16.mxu1 %v3232_v21  ;;  %v3270_v53 = vld [vmem:[%s5999_s5 + $0x180] ss:$16 sps:$4 sm:$0xff]   ;;  %v3274_v57 = vld [vmem:[%s5999_s5 + $0x16c] ss:$16 sps:$4 sm:$0xff]   ;;  %v4038_v58 = vrot.slane %v423_v52, %v4009_v47  ;;  %v3277_v63 = vld [vmem:[%s5999_s5 + $0x168] ss:$16 sps:$4 sm:$0xff]   ;;  %v4082_v17 = vrot.slane %v423_v52, %v4041_v59 }
  0x27   : > { %v360_v60 = vmul.f32 %v4029_v55, %v284_v49  ;;  %v362_v61 = vmul.f32 %v4029_v55, %v286_v50  ;;  %v3276_v62 = vld [vmem:[%s5999_s5 + $0x160] ss:$16 sps:$4 sm:$0xff]   ;;  %v3278_v2 = vld [vmem:[%s5999_s5 + $0x144] ss:$16 sps:$4 sm:$0xff]   ;;  %v3280_v3 = vld [vmem:[%s5999_s5 + $0x14c] ss:$16 sps:$4 sm:$0xff]  }
  0x28   : > { %v3282_v4 = vld [vmem:[%s5999_s5 + $0x140] ss:$16 sps:$4 sm:$0xff]   ;;  %v3283_v5 = vld [vmem:[%s5999_s5 + $0x148] ss:$16 sps:$4 sm:$0xff]   ;;  %v3284_v14 = vld [vmem:[%s5999_s5 + $0x124] ss:$16 sps:$4 sm:$0xff]  }
  0x29   : > { %948 = vmatpush1.bf16.msra.mxu0 %v3234_v22  ;;  %1141 = vmatpush1.bf16.msra.mxu1 %v3235_v23  ;;  %v436_v0 = vadd.f32 %v4038_v58, %v360_v60  ;;  %v438_v1 = vadd.f32 %v4038_v58, %v362_v61  ;;  %v283_v8 = vld [vmem:[%s4003_s23] sm:$0xff]  ;;  %v285_v9 = vld [vmem:[%s4003_s23 + $0x10] sm:$0xff]  ;;  %v288_v10 = vld [vmem:[%s4003_s23 + $0x28] sm:$0xff]  ;;  %s5753_s19 = scalar_lea.vmem [#allocation2], %s3018_s18  ;;  %s5954_s28 = scalar_lea.sflag [#allocation3], %s272_s16 }
  0x2a   : > { %949 = vmatprep.subr.bf16.mxu0 %v3236_v24  ;;  %1142 = vmatprep.subr.bf16.mxu1 %v3238_v25  ;;  %v290_v11 = vld [vmem:[%s4003_s23 + $0x38] sm:$0xff]  ;;  %v287_v12 = vld [vmem:[%s4003_s23 + $0x20] sm:$0xff]  ;;  %v289_v13 = vld [vmem:[%s4003_s23 + $0x30] sm:$0xff]  ;;  %v359_v18 = vmul.f32 %v4066_v6, %v283_v8  ;;  %v361_v19 = vmul.f32 %v4066_v6, %v285_v9  ;;  %v364_v23 = vmul.f32 %v4029_v55, %v288_v10  ;;  %s2952_s21 = sshll.u32 %s5753_s19, 4  ;;  %s3774_s9 = smov [#allocation2]   ;;  %s5947_s21 = int_to_ptr.vmem [resolvable:$true] %s2952_s21 }
  0x2b   : > { %v500_v7 = vpack.c.bf16 %v438_v1, %v436_v0  ;;  %v3286_v15 = vld [vmem:[%s5999_s5 + $0x12c] ss:$16 sps:$4 sm:$0xff]   ;;  %v291_v21 = vld [vmem:[%s4003_s23 + $0x40] sm:$0xff]  ;;  %v293_v22 = vld [vmem:[%s4003_s23 + $0x50] sm:$0xff]  ;;  %v366_v24 = vmul.f32 %v4029_v55, %v290_v11  ;;  %v363_v25 = vmul.f32 %v4066_v6, %v287_v12  ;;  %s3712_s8 = scalar_lea.vmem %s5947_s21, 8192  ;;  %s3716_s13 = sshll.u32 %s3774_s9, 4  ;;  %s3717_s13 = int_to_ptr.vmem [resolvable:$false] %s3716_s13 }
  0x2c   : > { %v292_v16 = vld [vmem:[%s4003_s23 + $0x48] sm:$0xff]  ;;  %v294_v20 = vld [vmem:[%s4003_s23 + $0x58] sm:$0xff]  ;;  %v369_v36 = vmul.f32 %v4066_v6, %v293_v22  ;;  %p3713_p11 = scmp.ne.s32.totalorder %s5947_s21, %s3712_s8  ;;  %s3718_s14 = scalar_lea.vmem %s3717_s13, 16384 }
  0x2d   : > { %950 = vmatpush1.bf16.msra.mxu0 %v3240_v26  ;;  %1143 = vmatpush1.bf16.msra.mxu1 %v3241_v27  ;;  %v365_v26 = vmul.f32 %v4066_v6, %v289_v13  ;;  %v296_v27 = vld [vmem:[%s4003_s23 + $0x68] sm:$0xff]  ;;  %v302_v51 = vld [vmem:[%s4003_s23 + $0x98] sm:$0xff]  ;;  %p3719_p0 = scmp.lt.s32.totalorder %s5947_s21, %s3717_s13  ;;  %p3720_p1 = scmp.lt.s32.totalorder %s3718_s14, %s3712_s8 }
  0x2e   : > { %951 = vmatprep.subr.bf16.mxu0 %v3242_v28  ;;  %1144 = vmatprep.subr.bf16.mxu1 %v3244_v29  ;;  %v298_v28 = vld [vmem:[%s4003_s23 + $0x78] sm:$0xff]  ;;  %v3288_v29 = vld [vmem:[%s5999_s5 + $0x120] ss:$16 sps:$4 sm:$0xff]   ;;  %v300_v50 = vld [vmem:[%s4003_s23 + $0x88] sm:$0xff]  ;;  %v445_v61 = vadd.f32 %v4082_v17, %v369_v36  ;;  %p3714_p12 = pnand %p3713_p11, %p3855_p5 }
  0x2f   : > { %969 = vmatprep.mubr.bf16.mxu0 %v500_v7  ;;  %1162 = vmatprep.mubr.bf16.mxu1 %v500_v7  ;;  %v441_v49 = vadd.f32 %v4082_v17, %v365_v26  ;;  %v3295_v52 = vld [vmem:[%s5999_s5 + $0x108] ss:$16 sps:$4 sm:$0xff]   ;;  %v376_v1 = vmul.f32 %v4029_v55, %v300_v50  ;;  %v3301_v10 = vld [vmem:[%s6000_s6 + $0x174] ss:$8 sps:$4 sm:$0xff]   ;;  %p3721_p2 = por %p3720_p1, %p3719_p0 }
  0x30   : > { %v304_v7 = vld [vmem:[%s4003_s23 + $0xa8] sm:$0xff]  ;;  %v318_v9 = vld [vmem:[%s4003_s23 + $0x118] sm:$0xff]  ;;  %p3715_p13 = pneg %p3714_p12 }
  0x31   : > { %952 = vmatpush1.bf16.msra.mxu0 %v3246_v30  ;;  %1145 = vmatpush1.bf16.msra.mxu1 %v3247_v31  ;;  %v3289_v30 = vld [vmem:[%s5999_s5 + $0x128] ss:$16 sps:$4 sm:$0xff]   ;;  %v3290_v31 = vld [vmem:[%s5999_s5 + $0x104] ss:$16 sps:$4 sm:$0xff]   ;;  %v4189_v36 = vmul.f32 %v4029_v55, %v304_v7 }
  0x32   : > { %953 = vmatprep.subr.bf16.mxu0 %v3248_v32  ;;  %1146 = vmatprep.subr.bf16.mxu1 %v3250_v33  ;;  %v368_v32 = vmul.f32 %v4029_v55, %v292_v16  ;;  %v3292_v33 = vld [vmem:[%s5999_s5 + $0x10c] ss:$16 sps:$4 sm:$0xff]   ;;  %v317_v16 = vld [vmem:[%s4003_s23 + $0x110] sm:$0xff]  ;;  %p3722_p3 = pnand %p3721_p2, %p3715_p13 }
  0x33   : > { %v316_v8 = vld [vmem:[%s4003_s23 + $0x108] sm:$0xff]  ;;  %v3296_v22 = vld [vmem:[%s6000_s6 + $0x70] ss:$8 sps:$4 sm:$0xff]  }
  0x35   : > { %954 = vmatpush2.bf16.msra.mxu0 %v3252_v34  ;;  %1147 = vmatpush2.bf16.msra.mxu1 %v3253_v35  ;;  %v370_v34 = vmul.f32 %v4029_v55, %v294_v20  ;;  %v367_v35 = vmul.f32 %v4066_v6, %v291_v21  ;;  %v320_v20 = vld [vmem:[%s4003_s23 + $0x128] sm:$0xff]  ;;  %v322_v21 = vld [vmem:[%s4003_s23 + $0x138] sm:$0xff] }
  0x36   : > { %955 = vmatprep.subr.bf16.mxu0 %v3254_v37  ;;  %1148 = vmatprep.subr.bf16.mxu1 %v3256_v38  ;;  %v295_v37 = vld [vmem:[%s4003_s23 + $0x60] sm:$0xff]  ;;  %v297_v38 = vld [vmem:[%s4003_s23 + $0x70] sm:$0xff]  ;;  %v396_v50 = vmul.f32 %v4029_v55, %v320_v20 }
  0x37   : > { %v443_v60 = vadd.f32 %v4082_v17, %v367_v35  ;;  %v331_v20 = vld [vmem:[%s4003_s23 + $0x180] sm:$0xff] }
  0x39   : > { %956 = vmatpush2.bf16.msra.mxu0 %v3258_v39  ;;  %1149 = vmatpush2.bf16.msra.mxu1 %v3259_v41  ;;  %v435_v39 = vadd.f32 %v4082_v17, %v359_v18  ;;  %v437_v41 = vadd.f32 %v4082_v17, %v361_v19 }
  0x3a   : > { %957 = vmatprep.subr.bf16.mxu0 %v3260_v42  ;;  %1150 = vmatprep.subr.bf16.mxu1 %v3262_v43  ;;  %v372_v42 = vmul.f32 %v4029_v55, %v296_v27  ;;  %v374_v43 = vmul.f32 %v4029_v55, %v298_v28  ;;  %v319_v27 = vld [vmem:[%s4003_s23 + $0x120] sm:$0xff]  ;;  %v3299_v28 = vld [vmem:[%s6000_s6 + $0x170] ss:$8 sps:$4 sm:$0xff]  }
  0x3c   : > { %v450_v0 = vadd.f32 %v4038_v58, %v374_v43  ;;  %v393_v43 = vmul.f32 %v4066_v6, %v317_v16 }
  0x3d   : > { %958 = vmatpush2.bf16.msra.mxu0 %v3264_v44  ;;  %1151 = vmatpush2.bf16.msra.mxu1 %v3265_v45  ;;  %v3294_v44 = vld [vmem:[%s5999_s5 + $0x100] ss:$16 sps:$4 sm:$0xff]   ;;  %v440_v45 = vadd.f32 %v4038_v58, %v364_v23  ;;  %v4164_v23 = vpack.c.bf16 %v445_v61, %v443_v60  ;;  %v328_v61 = vld [vmem:[%s4003_s23 + $0x168] sm:$0xff] }
  0x3e   : > { %959 = vmatprep.subr.bf16.mxu0 %v3266_v46  ;;  %1152 = vmatprep.subr.bf16.mxu1 %v3268_v48  ;;  %v442_v46 = vadd.f32 %v4038_v58, %v366_v24  ;;  %v439_v48 = vadd.f32 %v4082_v17, %v363_v25  ;;  %v452_v25 = vadd.f32 %v4038_v58, %v376_v1  ;;  %v325_v60 = vld [vmem:[%s4003_s23 + $0x150] sm:$0xff] }
  0x3f   : > { %v401_v16 = vmul.f32 %v4066_v6, %v325_v60 }
  0x40   : > { %v502_v11 = vpack.c.bf16 %v442_v46, %v440_v45  ;;  %v4155_v18 = vpack.c.bf16 %v441_v49, %v439_v48  ;;  %v323_v45 = vld [vmem:[%s4003_s23 + $0x140] sm:$0xff] }
  0x41   : > { %960 = vmatpush2.bf16.msra.mxu0 %v3270_v53  ;;  %1153 = vmatpush2.bf16.msra.mxu1 %v3271_v54  ;;  %v444_v53 = vadd.f32 %v4038_v58, %v368_v32  ;;  %v371_v54 = vmul.f32 %v4066_v6, %v295_v37  ;;  %v321_v32 = vld [vmem:[%s4003_s23 + $0x130] sm:$0xff]  ;;  %v394_v37 = vmul.f32 %v4029_v55, %v318_v9  ;;  %v3302_v46 = vld [vmem:[%s6000_s6 + $0x60] ss:$8 sps:$4 sm:$0xff]  }
  0x42   : > { %961 = vmatprep.subr.bf16.mxu0 %v3272_v56  ;;  %1154 = vmatprep.subr.bf16.mxu1 %v3274_v57  ;;  %v373_v56 = vmul.f32 %v4066_v6, %v297_v38  ;;  %v446_v57 = vadd.f32 %v4038_v58, %v370_v34  ;;  %v3304_v34 = vld [vmem:[%s6000_s6 + $0x64] ss:$8 sps:$4 sm:$0xff]  }
  0x43   : > { %v447_v12 = vadd.f32 %v4082_v17, %v371_v54  ;;  %v3307_v38 = vld [vmem:[%s6000_s6 + $0x164] ss:$8 sps:$4 sm:$0xff]   ;;  %v470_v49 = vadd.f32 %v4038_v58, %v394_v37  ;;  %v469_v54 = vadd.f32 %v4082_v17, %v393_v43  ;;  %v3311_v37 = vld [vmem:[%s6000_s6 + $0x150] ss:$8 sps:$4 sm:$0xff]  }
  0x44   : > { %v449_v13 = vadd.f32 %v4082_v17, %v373_v56  ;;  %v4157_v19 = vpack.c.bf16 %v446_v57, %v444_v53  ;;  %v395_v56 = vmul.f32 %v4066_v6, %v319_v27  ;;  %v397_v57 = vmul.f32 %v4066_v6, %v321_v32  ;;  %v335_v43 = vld [vmem:[%s4003_s23 + $0x1a0] sm:$0xff] }
  0x45   : > { %962 = vmatpush2.bf16.msra.mxu0 %v3276_v62  ;;  %1155 = vmatpush2.bf16.msra.mxu1 %v3277_v63  ;;  %v3298_v62 = vld [vmem:[%s6000_s6 + $0x74] ss:$8 sps:$4 sm:$0xff]   ;;  %v448_v63 = vadd.f32 %v4038_v58, %v372_v42  ;;  %v404_v27 = vmul.f32 %v4029_v55, %v328_v61 }
  0x46   : > { %963 = vmatprep.subr.bf16.mxu0 %v3278_v2  ;;  %1156 = vmatprep.subr.bf16.mxu1 %v3280_v3  ;;  %v378_v2 = vmul.f32 %v4029_v55, %v302_v51  ;;  %v299_v3 = vld [vmem:[%s4003_s23 + $0x80] sm:$0xff]  ;;  %v4186_v35 = vpack.c.bf16 %v449_v13, %v447_v12  ;;  %v398_v51 = vmul.f32 %v4029_v55, %v322_v21  ;;  %v3310_v12 = vld [vmem:[%s6000_s6 + $0x54] ss:$8 sps:$4 sm:$0xff]  }
  0x47   : > { %v4166_v24 = vpack.c.bf16 %v450_v0, %v448_v63  ;;  %v472_v0 = vadd.f32 %v4038_v58, %v396_v50  ;;  %v471_v7 = vadd.f32 %v4082_v17, %v395_v56  ;;  %v333_v21 = vld [vmem:[%s4003_s23 + $0x190] sm:$0xff]  ;;  %v342_v61 = vld [vmem:[%s4003_s23 + $0x1d8] sm:$0xff] }
  0x48   : > { %v454_v26 = vadd.f32 %v4038_v58, %v378_v2  ;;  %v474_v1 = vadd.f32 %v4038_v58, %v398_v51  ;;  %v409_v60 = vmul.f32 %v4066_v6, %v333_v21 }
  0x49   : > { %964 = vmatpush2.bf16.msra.mxu0 %v3282_v4  ;;  %1157 = vmatpush2.bf16.msra.mxu1 %v3283_v5  ;;  %v301_v4 = vld [vmem:[%s4003_s23 + $0x90] sm:$0xff]  ;;  %v499_v5 = vpack.c.bf16 %v437_v41, %v435_v39 }
  0x4a   : > { %965 = vmatprep.subr.bf16.mxu0 %v3284_v14  ;;  %1158 = vmatprep.subr.bf16.mxu1 %v3286_v15  ;;  %v306_v14 = vld [vmem:[%s4003_s23 + $0xb8] sm:$0xff]  ;;  %v315_v15 = vld [vmem:[%s4003_s23 + $0x100] sm:$0xff]  ;;  %v4206_v48 = vpack.c.bf16 %v454_v26, %v452_v25  ;;  %v4238_v13 = vpack.c.bf16 %v474_v1, %v472_v0 }
  0x4b   : > { %v4196_v39 = vmul.f32 %v4029_v55, %v306_v14  ;;  %v391_v42 = vmul.f32 %v4066_v6, %v315_v15  ;;  %v399_v15 = vmul.f32 %v4066_v6, %v323_v45  ;;  %v3316_v45 = vld [vmem:[%s6000_s6 + $0x44] ss:$8 sps:$4 sm:$0xff]  }
  0x4d   : > { %966 = vmatpush2.bf16.msra.mxu0 %v3288_v29  ;;  %1159 = vmatpush2.bf16.msra.mxu1 %v3289_v30  ;;  %v4175_v29 = vmul.f32 %v4066_v6, %v299_v3  ;;  %v4178_v30 = vmul.f32 %v4066_v6, %v301_v4  ;;  %v467_v53 = vadd.f32 %v4082_v17, %v391_v42  ;;  %v327_v3 = vld [vmem:[%s4003_s23 + $0x160] sm:$0xff]  ;;  %v329_v4 = vld [vmem:[%s4003_s23 + $0x170] sm:$0xff] }
  0x4e   : > { %967 = vmatprep.subr.bf16.mxu0 %v3290_v31  ;;  %1160 = vmatprep.subr.bf16.mxu1 %v3292_v33  ;;  %v392_v31 = vmul.f32 %v4029_v55, %v316_v8  ;;  %v324_v33 = vld [vmem:[%s4003_s23 + $0x148] sm:$0xff]  ;;  %v473_v8 = vadd.f32 %v4082_v17, %v397_v57  ;;  %v475_v32 = vadd.f32 %v4082_v17, %v399_v15 }
  0x4f   : > { %v400_v2 = vmul.f32 %v4029_v55, %v324_v33  ;;  %v403_v42 = vmul.f32 %v4066_v6, %v327_v3  ;;  %v407_v57 = vmul.f32 %v4066_v6, %v331_v20  ;;  %v339_v3 = vld [vmem:[%s4003_s23 + $0x1c0] sm:$0xff]  ;;  %v411_v20 = vmul.f32 %v4066_v6, %v335_v43 }
  0x50   : > { %v468_v41 = vadd.f32 %v4038_v58, %v392_v31  ;;  %v4250_v25 = vpack.c.bf16 %v473_v8, %v471_v7  ;;  %v3313_v31 = vld [vmem:[%s6000_s6 + $0x154] ss:$8 sps:$4 sm:$0xff]  }
  0x51   : > { %968 = vmatpush2.bf16.msra.mxu0 %v3294_v44  ;;  %1161 = vmatpush2.bf16.msra.mxu1 %v3295_v52  ;;  %v326_v44 = vld [vmem:[%s4003_s23 + $0x158] sm:$0xff]  ;;  %v3305_v52 = vld [vmem:[%s6000_s6 + $0x160] ss:$8 sps:$4 sm:$0xff]   ;;  %v476_v14 = vadd.f32 %v4038_v58, %v400_v2  ;;  %v483_v8 = vadd.f32 %v4082_v17, %v407_v57 }
  0x52   : > { %2423 = vmatprep.subr.bf16.mxu0 %v3298_v62  ;;  %2616 = vmatprep.subr.bf16.mxu1 %v3301_v10  ;;  %v330_v62 = vld [vmem:[%s4003_s23 + $0x178] sm:$0xff]  ;;  %v4221_v63 = vpack.c.bf16 %v470_v49, %v468_v41  ;;  %v402_v9 = vmul.f32 %v4029_v55, %v326_v44  ;;  %v332_v10 = vld [vmem:[%s4003_s23 + $0x188] sm:$0xff]  ;;  %v480_v41 = vadd.f32 %v4038_v58, %v404_v27  ;;  %v337_v44 = vld [vmem:[%s4003_s23 + $0x1b0] sm:$0xff] }
  0x53   : > { %v406_v33 = vmul.f32 %v4029_v55, %v330_v62  ;;  %v408_v50 = vmul.f32 %v4029_v55, %v332_v10  ;;  %v413_v21 = vmul.f32 %v4066_v6, %v337_v44  ;;  %v3317_v27 = vld [vmem:[%s6000_s6 + $0x140] ss:$8 sps:$4 sm:$0xff]   ;;  %v3328_v44 = vld [vmem:[%s6000_s6 + $0x24] ss:$8 sps:$4 sm:$0xff]  }
  0x54   : > { %970 = vmatmul.mubr.bf16.vlgmr.msra.gmra.mxu0 %v499_v5  ;;  %1163 = vmatmul.mubr.bf16.vlgmr.msra.gmra.mxu1 %v499_v5  ;;  %v4228_v5 = vpack.c.bf16 %v469_v54, %v467_v53  ;;  %v478_v26 = vadd.f32 %v4038_v58, %v402_v9  ;;  %v3314_v53 = vld [vmem:[%s6000_s6 + $0x40] ss:$8 sps:$4 sm:$0xff]   ;;  %v479_v54 = vadd.f32 %v4082_v17, %v403_v42 }
  0x55   : > { %979 = vmatprep.mubr.bf16.mxu0 %v502_v11  ;;  %1172 = vmatprep.mubr.bf16.mxu1 %v502_v11  ;;  %v334_v11 = vld [vmem:[%s4003_s23 + $0x198] sm:$0xff]  ;;  %v482_v49 = vadd.f32 %v4038_v58, %v406_v33  ;;  %v484_v0 = vadd.f32 %v4038_v58, %v408_v50  ;;  %v485_v9 = vadd.f32 %v4082_v17, %v409_v60 }
  0x56   : > { %2424 = vmatpush1.bf16.msra.mxu0 %v3296_v22  ;;  %2617 = vmatpush1.bf16.msra.mxu1 %v3299_v28  ;;  %v3308_v22 = vld [vmem:[%s6000_s6 + $0x50] ss:$8 sps:$4 sm:$0xff]   ;;  %v336_v28 = vld [vmem:[%s4003_s23 + $0x1a8] sm:$0xff]  ;;  %v410_v51 = vmul.f32 %v4029_v55, %v334_v11  ;;  %v487_v33 = vadd.f32 %v4082_v17, %v411_v20  ;;  %v453_v20 = vadd.f32 %v4082_v17, %v4178_v30 }
  0x57   : > { %2425 = vmatprep.subr.bf16.mxu0 %v3304_v34  ;;  %2618 = vmatprep.subr.bf16.mxu1 %v3307_v38  ;;  %v338_v34 = vld [vmem:[%s4003_s23 + $0x1b8] sm:$0xff]  ;;  %v4267_v38 = vpack.c.bf16 %v478_v26, %v476_v14  ;;  %v4291_v62 = vpack.c.bf16 %v482_v49, %v480_v41  ;;  %v412_v2 = vmul.f32 %v4029_v55, %v336_v28  ;;  %v344_v11 = vld [vmem:[%s4003_s23 + $0x1e8] sm:$0xff]  ;;  %v345_v26 = vld [vmem:[%s4003_s23 + $0x1f0] sm:$0xff] }
  0x58   : > { %v486_v1 = vadd.f32 %v4038_v58, %v410_v51  ;;  %v414_v10 = vmul.f32 %v4029_v55, %v338_v34  ;;  %v3319_v14 = vld [vmem:[%s6000_s6 + $0x144] ss:$8 sps:$4 sm:$0xff]   ;;  %v4320_v28 = vpack.c.bf16 %v485_v9, %v483_v8  ;;  %v489_v34 = vadd.f32 %v4082_v17, %v413_v21  ;;  %v3325_v41 = vld [vmem:[%s6000_s6 + $0x134] ss:$8 sps:$4 sm:$0xff]   ;;  %v3329_v8 = vld [vmem:[%s6000_s6 + $0x120] ss:$8 sps:$4 sm:$0xff]  }
  0x59   : > { %v420_v50 = vmul.f32 %v4029_v55, %v344_v11  ;;  %v421_v57 = vmul.f32 %v4066_v6, %v345_v26  ;;  %v3331_v9 = vld [vmem:[%s6000_s6 + $0x124] ss:$8 sps:$4 sm:$0xff]   ;;  %v305_v11 = vld [vmem:[%s4003_s23 + $0xb0] sm:$0xff]  ;;  %v456_v26 = vadd.f32 %v4038_v58, %v4189_v36 }
  0x5a   : > { %2426 = vmatpush1.bf16.msra.mxu0 %v3302_v46  ;;  %2619 = vmatpush1.bf16.msra.mxu1 %v3305_v52  ;;  %v340_v52 = vld [vmem:[%s4003_s23 + $0x1c8] sm:$0xff]  ;;  %v4308_v15 = vpack.c.bf16 %v486_v1, %v484_v0  ;;  %v3332_v30 = vld [vmem:[%s6000_s6 + $0x10] ss:$8 sps:$4 sm:$0xff]  }
  0x5b   : > { %2427 = vmatprep.subr.bf16.mxu0 %v3310_v12  ;;  %2620 = vmatprep.subr.bf16.mxu1 %v3313_v31  ;;  %v346_v12 = vld [vmem:[%s4003_s23 + $0x1f8] sm:$0xff]  ;;  %v490_v31 = vadd.f32 %v4038_v58, %v414_v10  ;;  %v3326_v1 = vld [vmem:[%s6000_s6 + $0x20] ss:$8 sps:$4 sm:$0xff]   ;;  %v3340_v36 = vld [vmem:[%s6000_s6 + $0x4] ss:$8 sps:$4 sm:$0xff]  }
  0x5c   : > { %980 = vmatmul.mubr.bf16.gmra.mxu0 %v4155_v18  ;;  %1173 = vmatmul.mubr.bf16.gmra.mxu1 %v4155_v18  ;;  %v477_v18 = vadd.f32 %v4082_v17, %v401_v16  ;;  %v488_v16 = vadd.f32 %v4038_v58, %v412_v2  ;;  %v422_v51 = vmul.f32 %v4029_v55, %v346_v12  ;;  %v303_v10 = vld [vmem:[%s4003_s23 + $0xa0] sm:$0xff] }
  0x5d   : > { %989 = vmatprep.mubr.bf16.mxu0 %v4157_v19  ;;  %1182 = vmatprep.mubr.bf16.mxu1 %v4157_v19  ;;  %v405_v19 = vmul.f32 %v4066_v6, %v329_v4  ;;  %v341_v4 = vld [vmem:[%s4003_s23 + $0x1d0] sm:$0xff] }
  0x5e   : > { %v4277_v46 = vpack.c.bf16 %v477_v18, %v475_v32  ;;  %2428 = vmatpush1.bf16.msra.mxu0 %v3308_v22  ;;  %2621 = vmatpush1.bf16.msra.mxu1 %v3311_v37  ;;  %v343_v22 = vld [vmem:[%s4003_s23 + $0x1e0] sm:$0xff]  ;;  %v416_v32 = vmul.f32 %v4029_v55, %v340_v52  ;;  %v3322_v18 = vld [vmem:[%s6000_s6 + $0x34] ss:$8 sps:$4 sm:$0xff]   ;;  %v3320_v37 = vld [vmem:[%s6000_s6 + $0x30] ss:$8 sps:$4 sm:$0xff]   ;;  %v4338_v42 = vpack.c.bf16 %v490_v31, %v488_v16 }
  0x5f   : > { %v481_v56 = vadd.f32 %v4082_v17, %v405_v19  ;;  %2429 = vmatprep.subr.bf16.mxu0 %v3316_v45  ;;  %v417_v43 = vmul.f32 %v4066_v6, %v341_v4  ;;  %2622 = vmatprep.subr.bf16.mxu1 %v3319_v14  ;;  %v4346_v45 = vpack.c.bf16 %v489_v34, %v487_v33  ;;  %v3323_v52 = vld [vmem:[%s6000_s6 + $0x130] ss:$8 sps:$4 sm:$0xff]   ;;  %v3334_v14 = vld [vmem:[%s6000_s6 + $0x14] ss:$8 sps:$4 sm:$0xff]  }
  0x60   : > { %v492_v19 = vadd.f32 %v4038_v58, %v416_v32  ;;  %v498_v0 = vadd.f32 %v4038_v58, %v422_v51  ;;  %v497_v4 = vadd.f32 %v4082_v17, %v421_v57  ;;  %v451_v16 = vadd.f32 %v4082_v17, %v4175_v29  ;;  %v308_v29 = vld [vmem:[%s4003_s23 + $0xc8] sm:$0xff]  ;;  %v3335_v31 = vld [vmem:[%s6000_s6 + $0x110] ss:$8 sps:$4 sm:$0xff]  }
  0x61   : > { %v4298_v7 = vpack.c.bf16 %v481_v56, %v479_v54  ;;  %v493_v54 = vadd.f32 %v4082_v17, %v417_v43  ;;  %v419_v56 = vmul.f32 %v4066_v6, %v343_v22  ;;  %v3337_v22 = vld [vmem:[%s6000_s6 + $0x114] ss:$8 sps:$4 sm:$0xff]   ;;  %v381_v32 = vmul.f32 %v4066_v6, %v305_v11  ;;  %v312_v51 = vld [vmem:[%s4003_s23 + $0xe8] sm:$0xff]  ;;  %v3347_v57 = vld [vmem:[%s6000_s6 + $0x1f0] ss:$8 sps:$4 sm:$0xff]  }
  0x62   : > { %2430 = vmatpush1.bf16.msra.mxu0 %v3314_v53  ;;  %2623 = vmatpush1.bf16.msra.mxu1 %v3317_v27  ;;  %v310_v27 = vld [vmem:[%s4003_s23 + $0xd8] sm:$0xff]  ;;  %v384_v33 = vmul.f32 %v4029_v55, %v308_v29  ;;  %v309_v43 = vld [vmem:[%s4003_s23 + $0xd0] sm:$0xff]  ;;  %v3355_v11 = vld [vmem:[%s6000_s6 + $0x1e4] ss:$8 sps:$4 sm:$0xff]  }
  0x63   : > { %2431 = vmatprep.subr.bf16.mxu0 %v3322_v18  ;;  %2624 = vmatprep.subr.bf16.mxu1 %v3325_v41  ;;  %v386_v34 = vmul.f32 %v4029_v55, %v310_v27  ;;  %v3343_v41 = vld [vmem:[%s6000_s6 + $0x104] ss:$8 sps:$4 sm:$0xff]   ;;  %v313_v27 = vld [vmem:[%s4003_s23 + $0xf0] sm:$0xff] }
  0x64   : > { %990 = vmatmul.mubr.bf16.gmra.mxu0 %v4164_v23  ;;  %1183 = vmatmul.mubr.bf16.gmra.mxu1 %v4164_v23  ;;  %v418_v23 = vmul.f32 %v4029_v55, %v342_v61  ;;  %v496_v61 = vadd.f32 %v4038_v58, %v420_v50  ;;  %v457_v50 = vadd.f32 %v4082_v17, %v381_v32  ;;  %v311_v29 = vld [vmem:[%s4003_s23 + $0xe0] sm:$0xff] }
  0x65   : > { %999 = vmatprep.mubr.bf16.mxu0 %v4166_v24  ;;  %1192 = vmatprep.mubr.bf16.mxu1 %v4166_v24  ;;  %v415_v24 = vmul.f32 %v4066_v6, %v339_v3  ;;  %v495_v3 = vadd.f32 %v4082_v17, %v419_v56  ;;  %v462_v56 = vadd.f32 %v4038_v58, %v386_v34  ;;  %v3365_v34 = vld [vmem:[%s6000_s6 + $0x1c0] ss:$8 sps:$4 sm:$0xff]  }
  0x66   : > { %v494_v49 = vadd.f32 %v4038_v58, %v418_v23  ;;  %2432 = vmatpush1.bf16.msra.mxu0 %v3320_v37  ;;  %v4377_v12 = vpack.c.bf16 %v498_v0, %v496_v61  ;;  %2625 = vmatpush1.bf16.msra.mxu1 %v3323_v52  ;;  %v3338_v23 = vld [vmem:[%s6000_s6] ss:$8 sps:$4 sm:$0xff]   ;;  %v314_v52 = vld [vmem:[%s4003_s23 + $0xf8] sm:$0xff]  ;;  %v3352_v61 = vld [vmem:[%s6000_s6 + $0xe4] ss:$8 sps:$4 sm:$0xff]  }
  0x67   : > { %v491_v53 = vadd.f32 %v4082_v17, %v415_v24  ;;  %2433 = vmatprep.subr.bf16.mxu0 %v3328_v44  ;;  %v4388_v21 = vpack.c.bf16 %v497_v4, %v495_v3  ;;  %2626 = vmatprep.subr.bf16.mxu1 %v3331_v9  ;;  %v3341_v37 = vld [vmem:[%s6000_s6 + $0x100] ss:$8 sps:$4 sm:$0xff]   ;;  %v3349_v44 = vld [vmem:[%s6000_s6 + $0x1f4] ss:$8 sps:$4 sm:$0xff]   ;;  %v385_v3 = vmul.f32 %v4066_v6, %v309_v43 }
  0x68   : > { %v4358_v60 = vpack.c.bf16 %v494_v49, %v492_v19  ;;  %v3346_v19 = vld [vmem:[%s6000_s6 + $0xf4] ss:$8 sps:$4 sm:$0xff]   ;;  %v307_v24 = vld [vmem:[%s4003_s23 + $0xc0] sm:$0xff]  ;;  %v390_v9 = vmul.f32 %v4029_v55, %v314_v52 }
  0x69   : > { %v4365_v2 = vpack.c.bf16 %v493_v54, %v491_v53  ;;  %v3344_v53 = vld [vmem:[%s6000_s6 + $0xf0] ss:$8 sps:$4 sm:$0xff]   ;;  %v460_v54 = vadd.f32 %v4038_v58, %v384_v33  ;;  %v3367_v33 = vld [vmem:[%s6000_s6 + $0x1c4] ss:$8 sps:$4 sm:$0xff]   ;;  %v3386_v43 = vld [vmem:[%s6000_s6 + $0x80] ss:$8 sps:$4 sm:$0xff]  }
  0x6a   : > { %2434 = vmatpush1.bf16.msra.mxu0 %v3326_v1  ;;  %2627 = vmatpush1.bf16.msra.mxu1 %v3329_v8  ;;  %v383_v1 = vmul.f32 %v4066_v6, %v307_v24  ;;  %v388_v8 = vmul.f32 %v4029_v55, %v312_v51  ;;  %v3358_v55 = vld [vmem:[%s6000_s6 + $0xd4] ss:$8 sps:$4 sm:$0xff]   ;;  %v3380_v24 = vld [vmem:[%s6000_s6 + $0x90] ss:$8 sps:$4 sm:$0xff]  }
  0x6b   : > { %2435 = vmatprep.subr.bf16.mxu0 %v3334_v14  ;;  %2628 = vmatprep.subr.bf16.mxu1 %v3337_v22  ;;  %v512_v4 = vpack.c.bf16 %v462_v56, %v460_v54  ;;  %v3353_v14 = vld [vmem:[%s6000_s6 + $0x1e0] ss:$8 sps:$4 sm:$0xff]   ;;  %v3361_v22 = vld [vmem:[%s6000_s6 + $0x1d4] ss:$8 sps:$4 sm:$0xff]  }
  0x6c   : > { %1000 = vmatmul.mubr.bf16.gmra.mxu0 %v4186_v35  ;;  %1193 = vmatmul.mubr.bf16.gmra.mxu1 %v4186_v35  ;;  %v458_v35 = vadd.f32 %v4038_v58, %v4196_v39  ;;  %v507_v39 = vpack.c.bf16 %v453_v20, %v451_v16  ;;  %v459_v16 = vadd.f32 %v4082_v17, %v383_v1 }
  0x6d   : > { %1009 = vmatprep.mubr.bf16.mxu0 %v4206_v48  ;;  %1202 = vmatprep.mubr.bf16.mxu1 %v4206_v48  ;;  %v379_v48 = vmul.f32 %v4066_v6, %v303_v10  ;;  %v3350_v10 = vld [vmem:[%s6000_s6 + $0xe0] ss:$8 sps:$4 sm:$0xff]   ;;  %v461_v20 = vadd.f32 %v4082_v17, %v385_v3 }
  0x6e   : > { %v510_v18 = vpack.c.bf16 %v458_v35, %v456_v26  ;;  %2436 = vmatpush1.bf16.msra.mxu0 %v3332_v30  ;;  %2629 = vmatpush1.bf16.msra.mxu1 %v3335_v31  ;;  %v464_v26 = vadd.f32 %v4038_v58, %v388_v8  ;;  %v466_v35 = vadd.f32 %v4038_v58, %v390_v9  ;;  %v3356_v30 = vld [vmem:[%s6000_s6 + $0xd0] ss:$8 sps:$4 sm:$0xff]  }
  0x6f   : > { %2437 = vmatprep.subr.bf16.mxu0 %v3340_v36  ;;  %v455_v49 = vadd.f32 %v4082_v17, %v379_v48  ;;  %2630 = vmatprep.subr.bf16.mxu1 %v3343_v41  ;;  %v3359_v31 = vld [vmem:[%s6000_s6 + $0x1d0] ss:$8 sps:$4 sm:$0xff]   ;;  %v3364_v36 = vld [vmem:[%s6000_s6 + $0xc4] ss:$8 sps:$4 sm:$0xff]   ;;  %v387_v58 = vmul.f32 %v4066_v6, %v311_v29  ;;  %v389_v48 = vmul.f32 %v4066_v6, %v313_v27  ;;  %v3370_v6 = vld [vmem:[%s6000_s6 + $0xb4] ss:$8 sps:$4 sm:$0xff]  }
  0x70   : > { %v514_v32 = vpack.c.bf16 %v466_v35, %v464_v26  ;;  %v3368_v41 = vld [vmem:[%s6000_s6 + $0xb0] ss:$8 sps:$4 sm:$0xff]  }
  0x71   : > { %v509_v0 = vpack.c.bf16 %v457_v50, %v455_v49 }
  0x72   : > { %2438 = vmatpush1.bf16.msra.mxu0 %v3338_v23  ;;  %2631 = vmatpush1.bf16.msra.mxu1 %v3341_v37  ;;  %v463_v23 = vadd.f32 %v4082_v17, %v387_v58  ;;  %v465_v37 = vadd.f32 %v4082_v17, %v389_v48  ;;  %v3373_v17 = vld [vmem:[%s6000_s6 + $0x1b4] ss:$8 sps:$4 sm:$0xff]  }
  0x73   : > { %2439 = vmatprep.subr.bf16.mxu0 %v3346_v19  ;;  %2632 = vmatprep.subr.bf16.mxu1 %v3349_v44  ;;  %v3391_v44 = vld [vmem:[%s6000_s6 + $0x184] ss:$8 sps:$4 sm:$0xff]  }
  0x74   : > { %1010 = vmatmul.mubr.bf16.gmra.mxu0 %v507_v39  ;;  %1203 = vmatmul.mubr.bf16.gmra.mxu1 %v507_v39  ;;  %v511_v39 = vpack.c.bf16 %v461_v20, %v459_v16  ;;  %v513_v19 = vpack.c.bf16 %v465_v37, %v463_v23 }
  0x75   : > { %1019 = vmatprep.mubr.bf16.mxu0 %v510_v18  ;;  %1212 = vmatprep.mubr.bf16.mxu1 %v510_v18  ;;  %v3362_v18 = vld [vmem:[%s6000_s6 + $0xc0] ss:$8 sps:$4 sm:$0xff]  }
  0x76   : > { %2440 = vmatpush2.bf16.msra.mxu0 %v3344_v53  ;;  %2633 = vmatpush2.bf16.msra.mxu1 %v3347_v57 }
  0x77   : > { %2441 = vmatprep.subr.bf16.mxu0 %v3352_v61  ;;  %2634 = vmatprep.subr.bf16.mxu1 %v3355_v11 }
  0x7a   : > { %2442 = vmatpush2.bf16.msra.mxu0 %v3350_v10  ;;  %2635 = vmatpush2.bf16.msra.mxu1 %v3353_v14 }
  0x7b   : > { %2443 = vmatprep.subr.bf16.mxu0 %v3358_v55  ;;  %2636 = vmatprep.subr.bf16.mxu1 %v3361_v22 }
  0x7c   : > { %1020 = vmatmul.mubr.bf16.gmra.mxu0 %v509_v0  ;;  %1213 = vmatmul.mubr.bf16.gmra.mxu1 %v509_v0 }
  0x7d   : > { %1029 = vmatprep.mubr.bf16.mxu0 %v512_v4  ;;  %1222 = vmatprep.mubr.bf16.mxu1 %v512_v4 }
  0x7e   : > { %2444 = vmatpush2.bf16.msra.mxu0 %v3356_v30  ;;  %2637 = vmatpush2.bf16.msra.mxu1 %v3359_v31 }
  0x7f   : > { %2445 = vmatprep.subr.bf16.mxu0 %v3364_v36  ;;  %2638 = vmatprep.subr.bf16.mxu1 %v3367_v33 }
  0x82   : > { %2446 = vmatpush2.bf16.msra.mxu0 %v3362_v18  ;;  %2639 = vmatpush2.bf16.msra.mxu1 %v3365_v34 }
  0x83   : > { %2447 = vmatprep.subr.bf16.mxu0 %v3370_v6  ;;  %2640 = vmatprep.subr.bf16.mxu1 %v3373_v17 }
  0x84   : > { %1030 = vmatmul.mubr.bf16.gmra.mxu0 %v511_v39  ;;  %1223 = vmatmul.mubr.bf16.gmra.mxu1 %v511_v39 }
  0x85   : > { %1039 = vmatprep.mubr.bf16.mxu0 %v514_v32  ;;  %1232 = vmatprep.mubr.bf16.mxu1 %v514_v32 }
  0x86   : > { %2448 = vmatpush2.bf16.msra.mxu0 %v3368_v41 }
  0x8c   : > { %1040 = vmatmul.mubr.bf16.gmra.mxu0 %v513_v19  ;;  %1233 = vmatmul.mubr.bf16.gmra.mxu1 %v513_v19 }
  0x8d   : > { %1049 = vmatprep.mubr.bf16.mxu0 %v4221_v63  ;;  %1242 = vmatprep.mubr.bf16.mxu1 %v4221_v63  ;;  %v3371_v63 = vld [vmem:[%s6000_s6 + $0x1b0] ss:$8 sps:$4 sm:$0xff]  }
  0x8e   : > { %2641 = vmatpush2.bf16.msra.mxu1 %v3371_v63 }
  0x94   : > { %1050 = vmatmul.mubr.bf16.gmra.mxu0 %v4228_v5  ;;  %1243 = vmatmul.mubr.bf16.gmra.mxu1 %v4228_v5  ;;  %v3376_v5 = vld [vmem:[%s6000_s6 + $0xa4] ss:$8 sps:$4 sm:$0xff]  }
  0x95   : > { %1059 = vmatprep.mubr.bf16.mxu0 %v4238_v13  ;;  %1252 = vmatprep.mubr.bf16.mxu1 %v4238_v13  ;;  %v3379_v13 = vld [vmem:[%s6000_s6 + $0x1a4] ss:$8 sps:$4 sm:$0xff]  }
  0x96   : > { %2449 = vmatprep.subr.bf16.mxu0 %v3376_v5  ;;  %2642 = vmatprep.subr.bf16.mxu1 %v3379_v13 }
  0x9c   : > { %1060 = vmatmul.mubr.bf16.gmra.mxu0 %v4250_v25  ;;  %1253 = vmatmul.mubr.bf16.gmra.mxu1 %v4250_v25  ;;  %v3374_v25 = vld [vmem:[%s6000_s6 + $0xa0] ss:$8 sps:$4 sm:$0xff]  }
  0x9d   : > { %1069 = vmatprep.mubr.bf16.mxu0 %v4267_v38  ;;  %1262 = vmatprep.mubr.bf16.mxu1 %v4267_v38  ;;  %v3377_v38 = vld [vmem:[%s6000_s6 + $0x1a0] ss:$8 sps:$4 sm:$0xff]  }
  0x9e   : > { %2450 = vmatpush2.bf16.msra.mxu0 %v3374_v25  ;;  %2643 = vmatpush2.bf16.msra.mxu1 %v3377_v38 }
  0xa4   : > { %1070 = vmatmul.mubr.bf16.gmra.mxu0 %v4277_v46  ;;  %1263 = vmatmul.mubr.bf16.gmra.mxu1 %v4277_v46  ;;  %v3382_v46 = vld [vmem:[%s6000_s6 + $0x94] ss:$8 sps:$4 sm:$0xff]  }
  0xa5   : > { %1079 = vmatprep.mubr.bf16.mxu0 %v4291_v62  ;;  %1272 = vmatprep.mubr.bf16.mxu1 %v4291_v62  ;;  %v3385_v62 = vld [vmem:[%s6000_s6 + $0x194] ss:$8 sps:$4 sm:$0xff]  }
  0xa6   : > { %2451 = vmatprep.subr.bf16.mxu0 %v3382_v46  ;;  %2644 = vmatprep.subr.bf16.mxu1 %v3385_v62 }
  0xa7   : > { %2452 = vmatpush2.bf16.msra.mxu0 %v3380_v24 }
  0xac   : > { %1080 = vmatmul.mubr.bf16.gmra.mxu0 %v4298_v7  ;;  %1273 = vmatmul.mubr.bf16.gmra.mxu1 %v4298_v7  ;;  %v3383_v7 = vld [vmem:[%s6000_s6 + $0x190] ss:$8 sps:$4 sm:$0xff]  }
  0xad   : > { %1089 = vmatprep.mubr.bf16.mxu0 %v4308_v15  ;;  %1282 = vmatprep.mubr.bf16.mxu1 %v4308_v15  ;;  %v3388_v15 = vld [vmem:[%s6000_s6 + $0x84] ss:$8 sps:$4 sm:$0xff]  }
  0xae   : > { %2645 = vmatpush2.bf16.msra.mxu1 %v3383_v7  ;;  %2453 = vmatprep.subr.bf16.mxu0 %v3388_v15 }
  0xaf   : > { %2454 = vmatpush2.bf16.msra.mxu0 %v3386_v43  ;;  %2646 = vmatprep.subr.bf16.mxu1 %v3391_v44 }
  0xb4   : > { %1090 = vmatmul.mubr.bf16.gmra.mxu0 %v4320_v28  ;;  %1283 = vmatmul.mubr.bf16.gmra.mxu1 %v4320_v28  ;;  %v3389_v28 = vld [vmem:[%s6000_s6 + $0x180] ss:$8 sps:$4 sm:$0xff]  }
  0xb5   : > { %1099 = vmatprep.mubr.bf16.mxu0 %v4338_v42  ;;  %1292 = vmatprep.mubr.bf16.mxu1 %v4338_v42  ;;  %v595_v42 = vld [vmem:[%s5997_s3] sm:$0xf] }
  0xb6   : > { %2647 = vmatpush2.bf16.msra.mxu1 %v3389_v28  ;;  %v4579_v49 = vrot.slane %v595_v42, %v4041_v59 }
  0xbc   : > { %1100 = vmatmul.mubr.bf16.gmra.mxu0 %v4346_v45  ;;  %1293 = vmatmul.mubr.bf16.gmra.mxu1 %v4346_v45  ;;  %v607_v45 = vsub.s32 2, %v3983_v40 }
  0xbd   : > { %1109 = vmatprep.mubr.bf16.mxu0 %v4358_v60  ;;  %1302 = vmatprep.mubr.bf16.mxu1 %v4358_v60  ;;  %v611_v60 = vsub.s32 3, %v3983_v40 }
  0xbe   : > { %v4581_v51 = vrot.slane %v595_v42, %v607_v45 }
  0xbf   : > { %v4586_v53 = vrot.slane %v595_v42, %v611_v60 }
  0xc4   : > { %1110 = vmatmul.mubr.bf16.gmra.mxu0 %v4365_v2  ;;  %1303 = vmatmul.mubr.bf16.gmra.mxu1 %v4365_v2 }
  0xc5   : > { %1119 = vmatprep.mubr.bf16.mxu0 %v4377_v12  ;;  %1312 = vmatprep.mubr.bf16.mxu1 %v4377_v12  ;;  %v4584_v12 = vrot.slane %v595_v42, %v4009_v47 }
  0xcc   : > { %1120 = vmatmul.mubr.bf16.gmra.mxu0 %v4388_v21  ;;  %1313 = vmatmul.mubr.bf16.gmra.mxu1 %v4388_v21 }
 0x114   : > { %v971_v2 = vpop.f32.mrf.mxu0  ;;  %v1164_v50 = vpop.f32.mrf.mxu1 }
 0x115   : > { %v972_v54 = vadd.f32 %v971_v2, %v4579_v49  ;;  %v1165_v40 = vadd.f32 %v1164_v50, %v4581_v51 }
 0x116   : > { %v973_v52 = vpop.f32.mrf.mxu0  ;;  %v1166_v21 = vpop.f32.mrf.mxu1 }
 0x117   : > { %v974_v61 = vadd.f32 %v973_v52, %v4584_v12  ;;  %v1167_v3 = vadd.f32 %v1166_v21, %v4586_v53  ;;  %v1451_v4 = vmul.f32 0.70710677, %v972_v54  ;;  %v1453_v11 = vmul.f32 0.70710677, %v1165_v40 }
 0x118   : > { %v975_v56 = vpop.f32.mrf.mxu0  ;;  %v1168_v57 = vpop.f32.mrf.mxu1  ;;  %v1323_v7 = vmul.f32 0.5, %v972_v54  ;;  %v1325_v44 = vmul.f32 0.5, %v1165_v40 }
 0x119   : > { %v976_v8 = vadd.f32 %v975_v56, %v4579_v49  ;;  %v1452_v14 = vmul.f32 0.70710677, %v974_v61  ;;  %v1169_v55 = vadd.f32 %v1168_v57, %v4581_v51  ;;  %v1454_v22 = vmul.f32 0.70710677, %v1167_v3 }
 0x11a   : > { %v977_v0 = vpop.f32.mrf.mxu0  ;;  %v1170_v1 = vpop.f32.mrf.mxu1  ;;  %3392 = verf.f32 %v1451_v4  ;;  %v1324_v28 = vmul.f32 0.5, %v974_v61  ;;  %v4609_v42 = vmul.f32 0.5, %v1167_v3 }
 0x11b   : > { %v978_v26 = vadd.f32 %v977_v0, %v4584_v12  ;;  %v1455_v35 = vmul.f32 0.70710677, %v976_v8  ;;  %v1171_v29 = vadd.f32 %v1170_v1, %v4586_v53  ;;  %3394 = verf.f32 %v1453_v11 }
 0x11c   : > { %v981_v9 = vpop.f32.mrf.mxu0  ;;  %v1174_v10 = vpop.f32.mrf.mxu1  ;;  %3396 = verf.f32 %v1452_v14  ;;  %v1457_v36 = vmul.f32 0.70710677, %v1169_v55  ;;  %v4616_v52 = vmul.f32 0.5, %v976_v8  ;;  %v4618_v21 = vmul.f32 0.5, %v1169_v55 }
 0x11d   : > { %v982_v31 = vadd.f32 %v981_v9, %v4579_v49  ;;  %v1175_v39 = vadd.f32 %v1174_v10, %v4581_v51  ;;  %3398 = verf.f32 %v1454_v22  ;;  %v1456_v32 = vmul.f32 0.70710677, %v978_v26 }
 0x11e   : > { %v983_v16 = vpop.f32.mrf.mxu0  ;;  %v1176_v20 = vpop.f32.mrf.mxu1  ;;  %3400 = verf.f32 %v1455_v35  ;;  %v1458_v33 = vmul.f32 0.70710677, %v1171_v29  ;;  %v4621_v57 = vmul.f32 0.5, %v978_v26  ;;  %v4623_v40 = vmul.f32 0.5, %v1171_v29 }
 0x11f   : > { %v984_v18 = vadd.f32 %v983_v16, %v4584_v12  ;;  %v1459_v23 = vmul.f32 0.70710677, %v982_v31  ;;  %v1177_v37 = vadd.f32 %v1176_v20, %v4586_v53  ;;  %3402 = verf.f32 %v1457_v36 }
 0x120   : > { %v985_v27 = vpop.f32.mrf.mxu0  ;;  %v1178_v30 = vpop.f32.mrf.mxu1  ;;  %v1461_v41 = vmul.f32 0.70710677, %v1175_v39  ;;  %3404 = verf.f32 %v1456_v32  ;;  %v4625_v61 = vmul.f32 0.5, %v982_v31  ;;  %v4631_v8 = vmul.f32 0.5, %v1175_v39 }
 0x121   : > { %v1460_v63 = vmul.f32 0.70710677, %v984_v18  ;;  %v986_v5 = vadd.f32 %v985_v27, %v4579_v49  ;;  %3406 = verf.f32 %v1458_v33  ;;  %v1462_v38 = vmul.f32 0.70710677, %v1177_v37 }
 0x122   : > { %v987_v58 = vpop.f32.mrf.mxu0  ;;  %v1180_v48 = vpop.f32.mrf.mxu1  ;;  %3408 = verf.f32 %v1459_v23  ;;  %v1179_v46 = vadd.f32 %v1178_v30, %v4581_v51  ;;  %v4634_v14 = vmul.f32 0.5, %v984_v18  ;;  %v4636_v55 = vmul.f32 0.5, %v1177_v37 }
 0x123   : > { %3410 = verf.f32 %v1461_v41  ;;  %v1463_v15 = vmul.f32 0.70710677, %v986_v5  ;;  %v988_v43 = vadd.f32 %v987_v58, %v4584_v12  ;;  %v1181_v45 = vadd.f32 %v1180_v48, %v4586_v53 }
 0x124   : > { %v991_v34 = vpop.f32.mrf.mxu0  ;;  %v1184_v6 = vpop.f32.mrf.mxu1  ;;  %3412 = verf.f32 %v1460_v63  ;;  %v1465_v0 = vmul.f32 0.70710677, %v1179_v46  ;;  %v4638_v16 = vmul.f32 0.5, %v986_v5  ;;  %v4644_v27 = vmul.f32 0.5, %v1179_v46 }
 0x125   : > { %3414 = verf.f32 %v1462_v38  ;;  %v992_v54 = vadd.f32 %v991_v34, %v4579_v49  ;;  %v1464_v9 = vmul.f32 0.70710677, %v988_v43  ;;  %v1185_v10 = vadd.f32 %v1184_v6, %v4581_v51 }
 0x126   : > { %v993_v19 = vpop.f32.mrf.mxu0  ;;  %v1186_v17 = vpop.f32.mrf.mxu1  ;;  %3416 = verf.f32 %v1463_v15  ;;  %v1466_v20 = vmul.f32 0.70710677, %v1181_v45  ;;  %v4647_v58 = vmul.f32 0.5, %v988_v43  ;;  %v4654_v41 = vmul.f32 0.5, %v1181_v45 }
 0x127   : > { %v3393_v50 = vpop.eup %3392  ;;  %v1467_v30 = vmul.f32 0.70710677, %v992_v54  ;;  %v994_v31 = vadd.f32 %v993_v19, %v4584_v12  ;;  %3418 = verf.f32 %v1465_v0  ;;  %v1469_v34 = vmul.f32 0.70710677, %v1185_v10 }
 0x128   : > { %v995_v13 = vpop.f32.mrf.mxu0  ;;  %v4601_v25 = vpop.f32.mrf.mxu1  ;;  %v1707_v29 = vadd.f32 1.0, %v3393_v50  ;;  %3420 = verf.f32 %v1464_v9  ;;  %v1187_v6 = vadd.f32 %v1186_v17, %v4586_v53  ;;  %v4663_v15 = vmul.f32 0.5, %v992_v54 }
 0x129   : > { %v3395_v56 = vpop.eup %3394  ;;  %3422 = verf.f32 %v1466_v20  ;;  %v996_v19 = vadd.f32 %v995_v13, %v4579_v49  ;;  %v1468_v43 = vmul.f32 0.70710677, %v994_v31  ;;  %v4669_v0 = vmul.f32 0.5, %v1185_v10 }
 0x12a   : > { %v4604_v62 = vpop.f32.mrf.mxu0  ;;  %v4606_v24 = vpop.f32.mrf.mxu1  ;;  %v1709_v36 = vadd.f32 1.0, %v3395_v56  ;;  %v4661_v46 = vmul.f32 %v1707_v29, %v1323_v7  ;;  %3424 = verf.f32 %v1467_v30  ;;  %v1470_v54 = vmul.f32 0.70710677, %v1187_v6 }
 0x12b   : > { %v3397_v4 = vpop.eup %3396  ;;  %3426 = verf.f32 %v1469_v34  ;;  %v4683_v20 = vmul.f32 0.5, %v994_v31  ;;  %v1471_v10 = vmul.f32 0.70710677, %v996_v19 }
 0x12c   : > { %v4612_v60 = vpop.f32.mrf.mxu0  ;;  %v4614_v2 = vpop.f32.mrf.mxu1  ;;  %v1708_v39 = vadd.f32 1.0, %v3397_v4  ;;  %v4665_v17 = vmul.f32 %v1709_v36, %v1325_v44  ;;  %3428 = verf.f32 %v1468_v43  ;;  %v4691_v36 = vmul.f32 0.5, %v1187_v6 }
 0x12d   : > { %v3399_v11 = vpop.eup %3398  ;;  %3430 = verf.f32 %v1470_v54  ;;  %v4720_v54 = vadd.f32 %v4614_v2, %v4581_v51 }
 0x12e   : > { %v4627_v1 = vpop.f32.mrf.mxu0  ;;  %v4629_v3 = vpop.f32.mrf.mxu1  ;;  %v1710_v33 = vadd.f32 1.0, %v3399_v11  ;;  %v4667_v56 = vmul.f32 %v1708_v39, %v1324_v28  ;;  %v1189_v11 = vadd.f32 %v4601_v25, %v4581_v51  ;;  %v4695_v25 = vadd.f32 %v4606_v24, %v4586_v53 }
 0x12f   : > { %v3401_v35 = vpop.eup %3400  ;;  %3432 = verf.f32 %v1471_v10 }
 0x130   : > { %v4640_v22 = vpop.f32.mrf.mxu0  ;;  %v4642_v26 = vpop.f32.mrf.mxu1  ;;  %v1711_v37 = vadd.f32 1.0, %v3401_v35  ;;  %v4676_v7 = vmul.f32 %v1710_v33, %v4609_v42  ;;  %v998_v35 = vadd.f32 %v4604_v62, %v4584_v12  ;;  %v4700_v33 = vmul.f32 0.5, %v996_v19 }
 0x131   : > { %v3403_v18 = vpop.eup %3402  ;;  %v1473_v6 = vmul.f32 0.70710677, %v1189_v11 }
 0x132   : > { %v4649_v48 = vpop.f32.mrf.mxu0  ;;  %v4651_v32 = vpop.f32.mrf.mxu1  ;;  %v1713_v45 = vadd.f32 1.0, %v3403_v18  ;;  %v4681_v28 = vmul.f32 %v1711_v37, %v4616_v52  ;;  %v1472_v47 = vmul.f32 0.70710677, %v998_v35 }
 0x133   : > { %v3405_v23 = vpop.eup %3404  ;;  %3434 = verf.f32 %v1473_v6 }
 0x134   : > { %v4657_v63 = vpop.f32.mrf.mxu0  ;;  %v4659_v5 = vpop.f32.mrf.mxu1  ;;  %v1712_v42 = vadd.f32 1.0, %v3405_v23  ;;  %v4698_v31 = vmul.f32 %v1713_v45, %v4618_v21  ;;  %v1963_v24 = vpack.c.bf16 %v4681_v28, %v4661_v46  ;;  %v4710_v21 = vadd.f32 %v4612_v60, %v4579_v49 }
 0x135   : > { %v3407_v38 = vpop.eup %3406  ;;  %v4730_v28 = vadd.f32 %v4627_v1, %v4584_v12  ;;  %3436 = verf.f32 %v1472_v47 }
 0x136   : > { %v3409_v50 = vpop.eup %3408  ;;  %v4671_v13 = vpop.f32.mrf.mxu0  ;;  %v1714_v39 = vadd.f32 1.0, %v3407_v38  ;;  %v1965_v46 = vpack.c.bf16 %v4698_v31, %v4665_v17  ;;  %v1475_v1 = vmul.f32 0.70710677, %v4710_v21  ;;  %v4747_v31 = vadd.f32 %v4629_v3, %v4586_v53 }
 0x137   : > { %v4673_v4 = vpop.f32.mrf.mxu1  ;;  %v3411_v9 = vpop.eup %3410  ;;  %v1715_v18 = vadd.f32 1.0, %v3409_v50  ;;  %v1840_v50 = vmul.f32 %v1712_v42, %v4621_v57  ;;  %v1476_v6 = vmul.f32 0.70710677, %v4730_v28  ;;  %v1006_v3 = vadd.f32 %v4640_v22, %v4579_v49 }
 0x138   : > { %v3413_v44 = vpop.eup %3412  ;;  %v4687_v29 = vpop.f32.mrf.mxu0  ;;  %v1717_v23 = vadd.f32 1.0, %v3411_v9  ;;  %v1474_v9 = vmul.f32 0.70710677, %v4695_v25  ;;  %v1478_v22 = vmul.f32 0.70710677, %v4747_v31 }
 0x139   : > { %v4689_v30 = vpop.f32.mrf.mxu1  ;;  %v3415_v52 = vpop.eup %3414  ;;  %v1716_v37 = vadd.f32 1.0, %v3413_v44  ;;  %v1842_v44 = vmul.f32 %v1714_v39, %v4623_v40  ;;  %v4726_v60 = vmul.f32 %v1715_v18, %v4625_v61  ;;  %v4742_v61 = vmul.f32 0.5, %v1189_v11 }
 0x13a   : > { %v4702_v62 = vpop.f32.mrf.mxu0  ;;  %v3417_v43 = vpop.eup %3416  ;;  %v1718_v45 = vadd.f32 1.0, %v3415_v52  ;;  %v4737_v2 = vmul.f32 %v1717_v23, %v4631_v8  ;;  %3438 = verf.f32 %v1474_v9  ;;  %v1477_v23 = vmul.f32 0.70710677, %v4720_v54 }
 0x13b   : > { %v4704_v34 = vpop.f32.mrf.mxu1  ;;  %v3419_v42 = vpop.eup %3418  ;;  %v4740_v52 = vmul.f32 %v1716_v37, %v4634_v14  ;;  %v1719_v17 = vadd.f32 1.0, %v3417_v43  ;;  %v1964_v11 = vpack.c.bf16 %v1840_v50, %v4667_v56  ;;  %v1966_v43 = vpack.c.bf16 %v1842_v44, %v4676_v7 }
 0x13c   : > { %v4712_v19 = vpop.f32.mrf.mxu0  ;;  %v3421_v40 = vpop.eup %3420  ;;  %v4754_v14 = vmul.f32 %v1718_v45, %v4636_v55  ;;  %v1721_v37 = vadd.f32 1.0, %v3419_v42  ;;  %v4769_v9 = vmul.f32 0.5, %v998_v35  ;;  %v4773_v56 = vadd.f32 %v4642_v26, %v4581_v51 }
 0x13d   : > { %v4714_v38 = vpop.f32.mrf.mxu1  ;;  %v3423_v8 = vpop.eup %3422  ;;  %v4767_v55 = vmul.f32 %v1719_v17, %v4638_v16  ;;  %v1720_v45 = vadd.f32 1.0, %v3421_v40  ;;  %2455 = vmatprep.mubr.bf16.mxu0 %v1964_v11  ;;  %3440 = verf.f32 %v1475_v1  ;;  %v4778_v7 = vadd.f32 %v4649_v48, %v4584_v12  ;;  %2648 = vmatprep.mubr.bf16.mxu1 %v1966_v43 }
 0x13e   : > { %v4732_v57 = vpop.f32.mrf.mxu0  ;;  %v3425_v47 = vpop.eup %3424  ;;  %v1722_v42 = vadd.f32 1.0, %v3423_v8  ;;  %2456 = vmatmul.mubr.bf16.vlgmr.msra.gmra.mxu0 %v1963_v24  ;;  %v4785_v26 = vmul.f32 0.5, %v4695_v25  ;;  %3442 = verf.f32 %v1477_v23  ;;  %v4789_v17 = vadd.f32 %v4651_v32, %v4586_v53  ;;  %2649 = vmatmul.mubr.bf16.vlgmr.msra.gmra.mxu1 %v1965_v46 }
 0x13f   : > { %v4734_v10 = vpop.f32.mrf.mxu1  ;;  %v3427_v50 = vpop.eup %3426  ;;  %v1723_v44 = vadd.f32 1.0, %v3425_v47  ;;  %v4792_v48 = vmul.f32 %v1721_v37, %v4644_v27  ;;  %3444 = verf.f32 %v1476_v6  ;;  %v1479_v24 = vmul.f32 0.70710677, %v1006_v3 }
 0x140   : > { %v4749_v39 = vpop.f32.mrf.mxu0  ;;  %v3429_v40 = vpop.eup %3428  ;;  %v4796_v1 = vadd.f32 %v4657_v63, %v4579_v49  ;;  %v1848_v23 = vmul.f32 %v1720_v45, %v4647_v58  ;;  %v1725_v11 = vadd.f32 1.0, %v3427_v50  ;;  %v4804_v32 = vmul.f32 0.5, %v4710_v21 }
 0x141   : > { %v4751_v18 = vpop.f32.mrf.mxu1  ;;  %v1481_v46 = vmul.f32 0.70710677, %v4773_v56  ;;  %v3431_v27 = vpop.eup %3430  ;;  %v1850_v47 = vmul.f32 %v1722_v42, %v4654_v41  ;;  %v4809_v37 = vmul.f32 0.5, %v4720_v54  ;;  %3446 = verf.f32 %v1478_v22 }
 0x142   : > { %6008 = vst [vmem:[#allocation7_spill] sm:$0xff] %v4751_v18  ;;  %v4762_v59 = vpop.f32.mrf.mxu0  ;;  %v1480_v63 = vmul.f32 0.70710677, %v4778_v7  ;;  %v3433_v58 = vpop.eup %3432  ;;  %v4817_v45 = vmul.f32 %v1723_v44, %v4663_v15  ;;  %v1724_v21 = vadd.f32 1.0, %v3429_v40  ;;  %v1482_v50 = vmul.f32 0.70710677, %v4789_v17 }
 0x143   : > { %v4764_v18 = vpop.f32.mrf.mxu1  ;;  %v1205_v41 = vadd.f32 %v4659_v5, %v4581_v51  ;;  %v4823_v54 = vmul.f32 0.5, %v4730_v28  ;;  %3448 = verf.f32 %v1479_v24  ;;  %v1483_v42 = vmul.f32 0.70710677, %v4796_v1  ;;  %v3435_v28 = vpop.eup %3434 }
 0x144   : > { %v4780_v16 = vpop.f32.mrf.mxu0  ;;  %v1014_v22 = vadd.f32 %v4671_v13, %v4584_v12  ;;  %v4833_v15 = vmul.f32 %v1725_v11, %v4669_v0  ;;  %v1726_v44 = vadd.f32 1.0, %v3431_v27  ;;  %3450 = verf.f32 %v1481_v46  ;;  %v3437_v0 = vpop.eup %3436 }
 0x145   : > { %v4782_v35 = vpop.f32.mrf.mxu1  ;;  %v4837_v5 = vadd.f32 %v4673_v4, %v4586_v53  ;;  %v1727_v40 = vadd.f32 1.0, %v3433_v58  ;;  %v4840_v24 = vmul.f32 0.5, %v4747_v31  ;;  %3452 = verf.f32 %v1480_v63 }
 0x146   : > { %v4798_v8 = vpop.f32.mrf.mxu0  ;;  %v4849_v11 = vmul.f32 %v1724_v21, %v4683_v20  ;;  %3454 = verf.f32 %v1482_v50  ;;  %v1485_v46 = vmul.f32 0.70710677, %v1205_v41  ;;  %v1968_v4 = vpack.c.bf16 %v1848_v23, %v4740_v52 }
 0x147   : > { %v4800_v25 = vpop.f32.mrf.mxu1  ;;  %v3439_v27 = vpop.eup %3438  ;;  %3456 = verf.f32 %v1483_v42  ;;  %v1484_v58 = vmul.f32 0.70710677, %v1014_v22  ;;  %v1016_v31 = vadd.f32 %v4687_v29, %v4579_v49  ;;  %v4856_v63 = vmul.f32 %v1726_v44, %v4691_v36 }
 0x148   : > { %6009 = vst [vmem:[#allocation8_spill] sm:$0xff] %v4800_v25  ;;  %v4812_v6 = vpop.f32.mrf.mxu0  ;;  %v4842_v25 = vmul.f32 0.5, %v1006_v3  ;;  %v1970_v3 = vpack.c.bf16 %v1850_v47, %v4754_v14  ;;  %v1486_v20 = vmul.f32 0.70710677, %v4837_v5  ;;  %v1209_v21 = vadd.f32 %v4689_v30, %v4581_v51  ;;  %2465 = vmatprep.mubr.bf16.mxu0 %v1968_v4 }
 0x149   : > { %6010 = vst [vmem:[#allocation9_spill] sm:$0xff] %v4812_v6  ;;  %v4814_v43 = vpop.f32.mrf.mxu1  ;;  %v4865_v52 = vmul.f32 %v1727_v40, %v4700_v33  ;;  %v1729_v23 = vadd.f32 1.0, %v3435_v28  ;;  %v4868_v29 = vmul.f32 0.5, %v4778_v7  ;;  %v1018_v36 = vadd.f32 %v4702_v62, %v4584_v12 }
 0x14a   : > { %6011 = vst [vmem:[#allocation10_spill] sm:$0xff] %v4814_v43  ;;  %v4828_v43 = vpop.f32.mrf.mxu0  ;;  %2658 = vmatprep.mubr.bf16.mxu1 %v1970_v3  ;;  %v3441_v47 = vpop.eup %3440  ;;  %v1728_v50 = vadd.f32 1.0, %v3437_v0  ;;  %v1730_v42 = vadd.f32 1.0, %v3439_v27  ;;  %v4877_v30 = vmul.f32 0.5, %v4789_v17  ;;  %3458 = verf.f32 %v1485_v46 }
 0x14b   : > { %v4830_v6 = vpop.f32.mrf.mxu1  ;;  %v3443_v33 = vpop.eup %3442  ;;  %3460 = verf.f32 %v1484_v58  ;;  %v1487_v44 = vmul.f32 0.70710677, %v1016_v31  ;;  %v1211_v7 = vadd.f32 %v4704_v34, %v4586_v53  ;;  %v1967_v62 = vpack.c.bf16 %v4767_v55, %v4726_v60 }
 0x14c   : > { %6012 = vst [vmem:[#allocation11_spill] sm:$0xff] %v4830_v6  ;;  %v4844_v13 = vpop.f32.mrf.mxu0  ;;  %v3445_v28 = vpop.eup %3444  ;;  %3462 = verf.f32 %v1486_v20  ;;  %v1489_v40 = vmul.f32 0.70710677, %v1209_v21  ;;  %v1022_v0 = vadd.f32 %v4712_v19, %v4579_v49  ;;  %v1969_v17 = vpack.c.bf16 %v4792_v48, %v4737_v2 }
 0x14d   : > { %v4846_v6 = vpop.f32.mrf.mxu1  ;;  %v4888_v46 = vmul.f32 %v1729_v23, %v4742_v61  ;;  %v4891_v4 = vmul.f32 0.5, %v4796_v1  ;;  %v4893_v27 = vmul.f32 0.5, %v1205_v41  ;;  %v1488_v34 = vmul.f32 0.70710677, %v1018_v36  ;;  %2466 = vmatmul.mubr.bf16.gmra.mxu0 %v1967_v62 }
 0x14e   : > { %6013 = vst [vmem:[#allocation12_spill] sm:$0xff] %v4846_v6  ;;  %v4859_v6 = vmul.f32 0.5, %v4773_v56  ;;  %v4872_v14 = vpop.f32.mrf.mxu0  ;;  %v3447_v58 = vpop.eup %3446  ;;  %v1856_v19 = vmul.f32 %v1728_v50, %v4769_v9  ;;  %v1731_v3 = vadd.f32 1.0, %v3441_v47  ;;  %v1733_v20 = vadd.f32 1.0, %v3443_v33  ;;  %2659 = vmatmul.mubr.bf16.gmra.mxu1 %v1969_v17 }
 0x14f   : > { %v4874_v56 = vpop.f32.mrf.mxu1  ;;  %v4900_v2 = vmul.f32 0.5, %v1014_v22  ;;  %v1732_v61 = vadd.f32 1.0, %v3445_v28  ;;  %3464 = verf.f32 %v1487_v44  ;;  %v1490_v48 = vmul.f32 0.70710677, %v1211_v7 }
 0x150   : > { %v4895_v60 = vpop.f32.mrf.mxu0  ;;  %v1215_v1 = vadd.f32 %v4714_v38, %v4581_v51  ;;  %v3449_v41 = vpop.eup %3448  ;;  %v1858_v23 = vmul.f32 %v1730_v42, %v4785_v26  ;;  %v4906_v62 = vmul.f32 0.5, %v4837_v5  ;;  %3466 = verf.f32 %v1489_v40 }
 0x151   : > { %v4897_v55 = vpop.f32.mrf.mxu1  ;;  %v3451_v9 = vpop.eup %3450  ;;  %v1734_v47 = vadd.f32 1.0, %v3447_v58  ;;  %v4908_v50 = vmul.f32 0.5, %v1016_v31  ;;  %3468 = verf.f32 %v1488_v34  ;;  %v1024_v22 = vadd.f32 %v4732_v57, %v4584_v12 }
 0x152   : > { %6014 = vst [vmem:[#allocation13_spill] sm:$0xff] %v4897_v55  ;;  %v1491_v55 = vmul.f32 0.70710677, %v1022_v0  ;;  %v4912_v33 = vpop.f32.mrf.mxu0  ;;  %v3453_v38 = vpop.eup %3452  ;;  %v4917_v26 = vmul.f32 %v1731_v3, %v4804_v32  ;;  %v4920_v5 = vmul.f32 %v1733_v20, %v4809_v37  ;;  %v4922_v42 = vmul.f32 0.5, %v1209_v21 }
 0x153   : > { %v4914_v44 = vpop.f32.mrf.mxu1  ;;  %v1972_v31 = vpack.c.bf16 %v1856_v19, %v4849_v11  ;;  %v3455_v28 = vpop.eup %3454  ;;  %v4926_v40 = vmul.f32 %v1732_v61, %v4823_v54  ;;  %v4928_v57 = vmul.f32 0.5, %v1018_v36  ;;  %3470 = verf.f32 %v1490_v48 }
 0x154   : > { %6015 = vst [vmem:[#allocation14_spill] sm:$0xff] %v4914_v44  ;;  %v1493_v17 = vmul.f32 0.70710677, %v1215_v1  ;;  %v3457_v34 = vpop.eup %3456  ;;  %v1735_v58 = vadd.f32 1.0, %v3449_v41  ;;  %v4930_v44 = vmul.f32 0.5, %v1211_v7  ;;  %3472 = verf.f32 %v1491_v55  ;;  %v4939_v36 = vpop.f32.mrf.mxu0 }
 0x155   : > { %v1217_v32 = vadd.f32 %v4734_v10, %v4586_v53  ;;  %2475 = vmatprep.mubr.bf16.mxu0 %v1972_v31  ;;  %v4935_v37 = vmul.f32 %v1734_v47, %v4840_v24  ;;  %v1737_v11 = vadd.f32 1.0, %v3451_v9  ;;  %v1492_v21 = vmul.f32 0.70710677, %v1024_v22  ;;  %v4941_v19 = vpop.f32.mrf.mxu1  ;;  %v6016_v24 = vld [vmem:[#allocation7_spill] sm:$0xff] }
 0x156   : > { %v1026_v54 = vadd.f32 %v4749_v39, %v4579_v49  ;;  %v1736_v3 = vadd.f32 1.0, %v3453_v38  ;;  %v1738_v7 = vadd.f32 1.0, %v3455_v28  ;;  %v4943_v20 = vmul.f32 0.5, %v1022_v0 }
 0x157   : > { %v1974_v55 = vpack.c.bf16 %v1858_v23, %v4856_v63  ;;  %v3459_v10 = vpop.eup %3458  ;;  %v1739_v61 = vadd.f32 1.0, %v3457_v34  ;;  %3474 = verf.f32 %v1493_v17  ;;  %v1219_v48 = vadd.f32 %v6016_v24, %v4581_v51 }
 0x158   : > { %v1971_v41 = vpack.c.bf16 %v4865_v52, %v4817_v45  ;;  %v3461_v39 = vpop.eup %3460  ;;  %v4951_v9 = vmul.f32 %v1735_v58, %v4842_v25  ;;  %v1494_v47 = vmul.f32 0.70710677, %v1217_v32  ;;  %v1028_v0 = vadd.f32 %v4762_v59, %v4584_v12  ;;  %v4961_v52 = vpop.f32.mrf.mxu0 }
 0x159   : > { %2668 = vmatprep.mubr.bf16.mxu1 %v1974_v55  ;;  %v1973_v63 = vpack.c.bf16 %v4888_v46, %v4833_v15  ;;  %v3463_v23 = vpop.eup %3462  ;;  %v4957_v38 = vmul.f32 0.5, %v1215_v1  ;;  %3476 = verf.f32 %v1492_v21  ;;  %v1495_v31 = vmul.f32 0.70710677, %v1026_v54  ;;  %v4963_v25 = vpop.f32.mrf.mxu1 }
 0x15a   : > { %v1221_v45 = vadd.f32 %v4764_v18, %v4586_v53  ;;  %2476 = vmatmul.mubr.bf16.gmra.mxu0 %v1971_v41  ;;  %v4966_v28 = vmul.f32 %v1737_v11, %v4859_v6  ;;  %v1864_v59 = vmul.f32 %v1736_v3, %v4868_v29  ;;  %v1866_v15 = vmul.f32 %v1738_v7, %v4877_v30  ;;  %v4981_v3 = vpop.f32.mrf.mxu0 }
 0x15b   : > { %v1741_v46 = vadd.f32 1.0, %v3459_v10  ;;  %2669 = vmatmul.mubr.bf16.gmra.mxu1 %v1973_v63  ;;  %v4971_v1 = vmul.f32 %v1739_v61, %v4891_v4  ;;  %v1740_v17 = vadd.f32 1.0, %v3461_v39  ;;  %v4973_v34 = vmul.f32 0.5, %v1024_v22  ;;  %v4983_v22 = vpop.f32.mrf.mxu1 }
 0x15c   : > { %v1497_v18 = vmul.f32 0.70710677, %v1219_v48  ;;  %v3465_v58 = vpop.eup %3464  ;;  %v1742_v21 = vadd.f32 1.0, %v3463_v23  ;;  %3478 = verf.f32 %v1494_v47  ;;  %v1496_v55 = vmul.f32 0.70710677, %v1028_v0 }
 0x15d   : > { %v1032_v6 = vadd.f32 %v4780_v16, %v4579_v49  ;;  %v3467_v11 = vpop.eup %3466  ;;  %v4977_v29 = vmul.f32 0.5, %v1217_v32  ;;  %3480 = verf.f32 %v1495_v31  ;;  %v1498_v30 = vmul.f32 0.70710677, %v1221_v45  ;;  %v5003_v31 = vpop.f32.mrf.mxu0 }
 0x15e   : > { %v1225_v4 = vadd.f32 %v4782_v35, %v4581_v51  ;;  %v3469_v7 = vpop.eup %3468  ;;  %v4986_v10 = vmul.f32 %v1741_v46, %v4893_v27  ;;  %v4988_v61 = vmul.f32 0.5, %v1026_v54  ;;  %v1034_v16 = vadd.f32 %v4798_v8, %v4584_v12  ;;  %v6017_v35 = vld [vmem:[#allocation8_spill] sm:$0xff] }
 0x15f   : > { %v1976_v32 = vpack.c.bf16 %v1864_v59, %v4926_v40  ;;  %v4994_v24 = vmul.f32 %v1740_v17, %v4900_v2  ;;  %v1743_v41 = vadd.f32 1.0, %v3465_v58  ;;  %3482 = verf.f32 %v1497_v18  ;;  %v5005_v59 = vpop.f32.mrf.mxu1 }
 0x160   : > { %v1227_v39 = vadd.f32 %v6017_v35, %v4586_v53  ;;  %v3471_v47 = vpop.eup %3470  ;;  %v4999_v63 = vmul.f32 %v1742_v21, %v4906_v62  ;;  %v5001_v27 = vmul.f32 0.5, %v1219_v48  ;;  %3484 = verf.f32 %v1496_v55  ;;  %v6018_v21 = vld [vmem:[#allocation9_spill] sm:$0xff] }
 0x161   : > { %v1499_v54 = vmul.f32 0.70710677, %v1032_v6  ;;  %2485 = vmatprep.mubr.bf16.mxu0 %v1976_v32  ;;  %v3473_v8 = vpop.eup %3472  ;;  %v1745_v23 = vadd.f32 1.0, %v3467_v11  ;;  %v1744_v40 = vadd.f32 1.0, %v3469_v7  ;;  %3486 = verf.f32 %v1498_v30 }
 0x162   : > { %v1501_v2 = vmul.f32 0.70710677, %v1225_v4  ;;  %v5007_v46 = vmul.f32 0.5, %v1028_v0  ;;  %v5009_v17 = vmul.f32 0.5, %v1221_v45  ;;  %v1500_v62 = vmul.f32 0.70710677, %v1034_v16 }
 0x163   : > { %v1978_v48 = vpack.c.bf16 %v1866_v15, %v4935_v37  ;;  %v5013_v18 = vmul.f32 %v1743_v41, %v4908_v50  ;;  %v1502_v58 = vmul.f32 0.70710677, %v1227_v39  ;;  %v1036_v55 = vadd.f32 %v6018_v21, %v4579_v49  ;;  %v6019_v0 = vld [vmem:[#allocation10_spill] sm:$0xff]  ;;  %v5027_v41 = vpop.f32.mrf.mxu0 }
 0x164   : > { %v1975_v11 = vpack.c.bf16 %v4951_v9, %v4917_v26  ;;  %v3475_v30 = vpop.eup %3474  ;;  %v1746_v7 = vadd.f32 1.0, %v3471_v47  ;;  %v1747_v32 = vadd.f32 1.0, %v3473_v8  ;;  %3488 = verf.f32 %v1499_v54  ;;  %v5029_v26 = vpop.f32.mrf.mxu1  ;;  %v6020_v47 = vld [vmem:[#allocation11_spill] sm:$0xff] }
 0x165   : > { %v1229_v45 = vadd.f32 %v6019_v0, %v4581_v51  ;;  %2678 = vmatprep.mubr.bf16.mxu1 %v1978_v48  ;;  %v5022_v37 = vmul.f32 %v1745_v23, %v4922_v42  ;;  %v1872_v50 = vmul.f32 %v1744_v40, %v4928_v57  ;;  %3490 = verf.f32 %v1501_v2 }
 0x166   : > { %v1038_v15 = vadd.f32 %v4828_v43, %v4584_v12  ;;  %2486 = vmatmul.mubr.bf16.gmra.mxu0 %v1975_v11  ;;  %v3477_v9 = vpop.eup %3476  ;;  %v5031_v35 = vmul.f32 0.5, %v1032_v6  ;;  %3492 = verf.f32 %v1500_v62  ;;  %v1231_v54 = vadd.f32 %v6020_v47, %v4586_v53  ;;  %v5051_v11 = vpop.f32.mrf.mxu0 }
 0x167   : > { %v1977_v42 = vpack.c.bf16 %v4966_v28, %v4920_v5  ;;  %v1749_v57 = vadd.f32 1.0, %v3475_v30  ;;  %3494 = verf.f32 %v1502_v58  ;;  %v1503_v8 = vmul.f32 0.70710677, %v1036_v55  ;;  %v6021_v28 = vld [vmem:[#allocation12_spill] sm:$0xff] }
 0x168   : > { %v5039_v43 = vadd.f32 %v4844_v13, %v4579_v49  ;;  %v1874_v23 = vmul.f32 %v1746_v7, %v4930_v44  ;;  %v5043_v40 = vmul.f32 %v1747_v32, %v4943_v20  ;;  %v5045_v6 = vmul.f32 0.5, %v1225_v4  ;;  %v5053_v13 = vpop.f32.mrf.mxu1 }
 0x169   : > { %v1505_v2 = vmul.f32 0.70710677, %v1229_v45  ;;  %2679 = vmatmul.mubr.bf16.gmra.mxu1 %v1977_v42  ;;  %v3479_v62 = vpop.eup %3478  ;;  %v1748_v48 = vadd.f32 1.0, %v3477_v9  ;;  %v5047_v21 = vmul.f32 0.5, %v1034_v16  ;;  %v1504_v5 = vmul.f32 0.70710677, %v1038_v15 }
 0x16a   : > { %v1235_v58 = vadd.f32 %v6021_v28, %v4581_v51  ;;  %6022 = vst [vmem:[#allocation7_spill] sm:$0xff] %v5053_v13  ;;  %v3481_v44 = vpop.eup %3480  ;;  %v5055_v30 = vmul.f32 0.5, %v1227_v39  ;;  %v5057_v20 = vmul.f32 0.5, %v1036_v55  ;;  %v1506_v4 = vmul.f32 0.70710677, %v1231_v54  ;;  %v5079_v28 = vpop.f32.mrf.mxu1 }
 0x16b   : > { %v5061_v7 = vadd.f32 %v4872_v14, %v4584_v12  ;;  %v5064_v16 = vmul.f32 %v1749_v57, %v4957_v38  ;;  %3496 = verf.f32 %v1503_v8  ;;  %v1507_v32 = vmul.f32 0.70710677, %v5039_v43  ;;  %v5077_v8 = vpop.f32.mrf.mxu0  ;;  %6023 = vst [vmem:[#allocation8_spill] sm:$0xff] %v5079_v28 }
 0x16c   : > { %v5069_v0 = vadd.f32 %v4874_v56, %v4586_v53  ;;  %v3483_v9 = vpop.eup %3482  ;;  %v1750_v39 = vadd.f32 1.0, %v3479_v62  ;;  %v5071_v47 = vmul.f32 0.5, %v1229_v45  ;;  %3498 = verf.f32 %v1505_v2 }
 0x16d   : > { %v1980_v55 = vpack.c.bf16 %v1872_v50, %v4994_v24  ;;  %v3485_v42 = vpop.eup %3484  ;;  %v5075_v14 = vmul.f32 %v1748_v48, %v4973_v34  ;;  %v1751_v38 = vadd.f32 1.0, %v3481_v44  ;;  %3500 = verf.f32 %v1504_v5  ;;  %v6024_v50 = vld [vmem:[#allocation13_spill] sm:$0xff] }
 0x16e   : > { %v1509_v57 = vmul.f32 0.70710677, %v1235_v58  ;;  %v3487_v56 = vpop.eup %3486  ;;  %v5081_v13 = vmul.f32 0.5, %v1038_v15  ;;  %3502 = verf.f32 %v1506_v4  ;;  %v1508_v45 = vmul.f32 0.70710677, %v5061_v7 }
 0x16f   : > { %v1046_v24 = vadd.f32 %v4895_v60, %v4579_v49  ;;  %2495 = vmatprep.mubr.bf16.mxu0 %v1980_v55  ;;  %3504 = verf.f32 %v1507_v32  ;;  %v1510_v34 = vmul.f32 0.70710677, %v5069_v0  ;;  %v1239_v2 = vadd.f32 %v6024_v50, %v4581_v51  ;;  %v5099_v55 = vpop.f32.mrf.mxu0 }
 0x170   : > { %v1982_v62 = vpack.c.bf16 %v1874_v23, %v4999_v63  ;;  %v5091_v48 = vmul.f32 %v1750_v39, %v4977_v29  ;;  %v1753_v15 = vadd.f32 1.0, %v3483_v9  ;;  %v1752_v5 = vadd.f32 1.0, %v3485_v42  ;;  %v5101_v63 = vpop.f32.mrf.mxu1 }
 0x171   : > { %v1048_v44 = vadd.f32 %v4912_v33, %v4584_v12  ;;  %v3489_v4 = vpop.eup %3488  ;;  %v1754_v28 = vadd.f32 1.0, %v3487_v56  ;;  %3506 = verf.f32 %v1509_v57  ;;  %v1979_v60 = vpack.c.bf16 %v5013_v18, %v4971_v1  ;;  %v6025_v33 = vld [vmem:[#allocation14_spill] sm:$0xff] }
 0x172   : > { %2688 = vmatprep.mubr.bf16.mxu1 %v1982_v62  ;;  %v1981_v32 = vpack.c.bf16 %v5022_v37, %v4986_v10  ;;  %v3491_v29 = vpop.eup %3490  ;;  %v5103_v23 = vmul.f32 0.5, %v1231_v54  ;;  %3508 = verf.f32 %v1508_v45  ;;  %v1511_v9 = vmul.f32 0.70710677, %v1046_v24  ;;  %v5124_v62 = vpop.f32.mrf.mxu1 }
 0x173   : > { %v1241_v39 = vadd.f32 %v6025_v33, %v4586_v53  ;;  %v3493_v42 = vpop.eup %3492  ;;  %v5108_v57 = vmul.f32 %v1751_v38, %v4988_v61  ;;  %v5111_v1 = vmul.f32 0.5, %v5039_v43  ;;  %3510 = verf.f32 %v1510_v34  ;;  %2496 = vmatmul.mubr.bf16.gmra.mxu0 %v1979_v60  ;;  %v5122_v34 = vpop.f32.mrf.mxu0 }
 0x174   : > { %v1513_v10 = vmul.f32 0.70710677, %v1239_v2  ;;  %2689 = vmatmul.mubr.bf16.gmra.mxu1 %v1981_v32  ;;  %v3495_v18 = vpop.eup %3494  ;;  %v5114_v37 = vmul.f32 %v1753_v15, %v5001_v27  ;;  %v1755_v54 = vadd.f32 1.0, %v3489_v4  ;;  %v5116_v56 = vmul.f32 0.5, %v1235_v58 }
 0x175   : > { %v1512_v45 = vmul.f32 0.70710677, %v1048_v44  ;;  %v1880_v50 = vmul.f32 %v1752_v5, %v5007_v46  ;;  %v1882_v61 = vmul.f32 %v1754_v28, %v5009_v17  ;;  %v1757_v38 = vadd.f32 1.0, %v3491_v29 }
 0x176   : > { %v1052_v43 = vadd.f32 %v4939_v36, %v4579_v49  ;;  %v1756_v60 = vadd.f32 1.0, %v3493_v42  ;;  %3512 = verf.f32 %v1511_v9  ;;  %v1514_v27 = vmul.f32 0.70710677, %v1241_v39  ;;  %v5150_v9 = vpop.f32.mrf.mxu0 }
 0x177   : > { %v5128_v58 = vadd.f32 %v4941_v19, %v4581_v51  ;;  %v1758_v15 = vadd.f32 1.0, %v3495_v18  ;;  %v5131_v46 = vmul.f32 0.5, %v5061_v7  ;;  %v5134_v17 = vmul.f32 0.5, %v5069_v0 }
 0x178   : > { %3514 = verf.f32 %v1513_v10  ;;  %v3497_v36 = vpop.eup %3496  ;;  %v5137_v28 = vmul.f32 %v1755_v54, %v5031_v35  ;;  %v5139_v5 = vmul.f32 0.5, %v1046_v24  ;;  %v1054_v4 = vadd.f32 %v4961_v52, %v4584_v12  ;;  %v5152_v35 = vpop.f32.mrf.mxu1 }
 0x179   : > { %3516 = verf.f32 %v1512_v45  ;;  %v3499_v19 = vpop.eup %3498  ;;  %v5144_v32 = vmul.f32 %v1757_v38, %v5045_v6  ;;  %v5146_v7 = vmul.f32 0.5, %v1239_v2  ;;  %v1515_v29 = vmul.f32 0.70710677, %v1052_v43 }
 0x17a   : > { %v1247_v0 = vadd.f32 %v4963_v25, %v4586_v53  ;;  %v3501_v24 = vpop.eup %3500  ;;  %v5155_v33 = vmul.f32 %v1756_v60, %v5047_v21  ;;  %v5157_v42 = vmul.f32 0.5, %v1048_v44  ;;  %3518 = verf.f32 %v1514_v27 }
 0x17b   : > { %v1517_v52 = vmul.f32 0.70710677, %v5128_v58  ;;  %v3503_v6 = vpop.eup %3502  ;;  %v5161_v2 = vmul.f32 %v1758_v15, %v5055_v30  ;;  %v1759_v10 = vadd.f32 1.0, %v3497_v36  ;;  %v5163_v18 = vmul.f32 0.5, %v1241_v39  ;;  %v5173_v39 = vpop.f32.mrf.mxu0 }
 0x17c   : > { %v1056_v25 = vadd.f32 %v4981_v3, %v4579_v49  ;;  %v3505_v54 = vpop.eup %3504  ;;  %v1761_v45 = vadd.f32 1.0, %v3499_v19  ;;  %v1516_v38 = vmul.f32 0.70710677, %v1054_v4  ;;  %v1249_v21 = vadd.f32 %v4983_v22, %v4581_v51  ;;  %v5175_v15 = vpop.f32.mrf.mxu1 }
 0x17d   : > { %v1984_v44 = vpack.c.bf16 %v1880_v50, %v5075_v14  ;;  %3520 = verf.f32 %v1515_v29  ;;  %v1518_v60 = vmul.f32 0.70710677, %v1247_v0  ;;  %v1058_v30 = vadd.f32 %v5003_v31, %v4584_v12  ;;  %6026 = vst [vmem:[#allocation9_spill] sm:$0xff] %v5175_v15 }
 0x17e   : > { %v1986_v27 = vpack.c.bf16 %v1882_v61, %v5091_v48  ;;  %v3507_v3 = vpop.eup %3506  ;;  %v1760_v36 = vadd.f32 1.0, %v3501_v24  ;;  %v1762_v19 = vadd.f32 1.0, %v3503_v6  ;;  %3522 = verf.f32 %v1517_v52  ;;  %v5191_v6 = vpop.f32.mrf.mxu0 }
 0x17f   : > { %2505 = vmatprep.mubr.bf16.mxu0 %v1984_v44  ;;  %v1983_v22 = vpack.c.bf16 %v5108_v57, %v5043_v40  ;;  %v3509_v14 = vpop.eup %3508  ;;  %v5180_v50 = vmul.f32 %v1759_v10, %v5057_v20  ;;  %v1763_v29 = vadd.f32 1.0, %v3505_v54  ;;  %v1519_v31 = vmul.f32 0.70710677, %v1056_v25  ;;  %v5193_v10 = vpop.f32.mrf.mxu1 }
 0x180   : > { %2698 = vmatprep.mubr.bf16.mxu1 %v1986_v27  ;;  %v1985_v48 = vpack.c.bf16 %v5114_v37, %v5064_v16  ;;  %v3511_v61 = vpop.eup %3510  ;;  %v5185_v15 = vmul.f32 %v1761_v45, %v5071_v47  ;;  %v5187_v24 = vmul.f32 0.5, %v1052_v43  ;;  %3524 = verf.f32 %v1516_v38 }
 0x181   : > { %v1521_v52 = vmul.f32 0.70710677, %v1249_v21  ;;  %2506 = vmatmul.mubr.bf16.gmra.mxu0 %v1983_v22  ;;  %v1765_v40 = vadd.f32 1.0, %v3507_v3  ;;  %3526 = verf.f32 %v1518_v60  ;;  %v1520_v57 = vmul.f32 0.70710677, %v1058_v30  ;;  %v5216_v3 = vpop.f32.mrf.mxu0 }
 0x182   : > { %v1251_v20 = vadd.f32 %v5005_v59, %v4586_v53  ;;  %2699 = vmatmul.mubr.bf16.gmra.mxu1 %v1985_v48  ;;  %v1888_v16 = vmul.f32 %v1760_v36, %v5081_v13  ;;  %v1890_v47 = vmul.f32 %v1762_v19, %v5103_v23  ;;  %v1764_v37 = vadd.f32 1.0, %v3509_v14  ;;  %v5218_v36 = vpop.f32.mrf.mxu1 }
 0x183   : > { %v5198_v43 = vmul.f32 0.5, %v5128_v58  ;;  %v3513_v54 = vpop.eup %3512  ;;  %v5201_v45 = vmul.f32 %v1763_v29, %v5111_v1  ;;  %v1766_v38 = vadd.f32 1.0, %v3511_v61  ;;  %v5203_v44 = vmul.f32 0.5, %v1054_v4  ;;  %v6027_v61 = vld [vmem:[#allocation7_spill] sm:$0xff] }
 0x184   : > { %3528 = verf.f32 %v1519_v31  ;;  %v5205_v60 = vmul.f32 0.5, %v1247_v0  ;;  %v5207_v27 = vmul.f32 0.5, %v1056_v25  ;;  %v1062_v13 = vadd.f32 %v5027_v41, %v4579_v49 }
 0x185   : > { %v3515_v59 = vpop.eup %3514  ;;  %3530 = verf.f32 %v1521_v52  ;;  %v5212_v58 = vmul.f32 %v1765_v40, %v5116_v56  ;;  %v1522_v1 = vmul.f32 0.70710677, %v1251_v20  ;;  %v1255_v4 = vadd.f32 %v5029_v26, %v4581_v51  ;;  %v5240_v40 = vpop.f32.mrf.mxu0 }
 0x186   : > { %v3517_v23 = vpop.eup %3516  ;;  %3532 = verf.f32 %v1520_v57  ;;  %v5221_v0 = vmul.f32 %v1764_v37, %v5131_v46  ;;  %v1767_v25 = vadd.f32 1.0, %v3513_v54  ;;  %v5223_v19 = vmul.f32 0.5, %v1249_v21  ;;  %v6028_v37 = vld [vmem:[#allocation8_spill] sm:$0xff] }
 0x187   : > { %v1064_v41 = vadd.f32 %v5051_v11, %v4584_v12  ;;  %v3519_v56 = vpop.eup %3518  ;;  %v5228_v22 = vmul.f32 %v1766_v38, %v5134_v17  ;;  %v1769_v14 = vadd.f32 1.0, %v3515_v59  ;;  %v5230_v29 = vmul.f32 0.5, %v1058_v30  ;;  %v5242_v30 = vpop.f32.mrf.mxu1 }
 0x188   : > { %v1988_v26 = vpack.c.bf16 %v1888_v16, %v5155_v33  ;;  %v1768_v31 = vadd.f32 1.0, %v3517_v23  ;;  %v5233_v48 = vmul.f32 0.5, %v1251_v20  ;;  %v1523_v46 = vmul.f32 0.70710677, %v1062_v13 }
 0x189   : > { %v1257_v21 = vadd.f32 %v6027_v61, %v4586_v53  ;;  %3534 = verf.f32 %v1522_v1  ;;  %v1525_v52 = vmul.f32 0.70710677, %v1255_v4  ;;  %v1066_v11 = vadd.f32 %v5077_v8, %v4579_v49 }
 0x18a   : > { %2515 = vmatprep.mubr.bf16.mxu0 %v1988_v26  ;;  %v1990_v17 = vpack.c.bf16 %v1890_v47, %v5161_v2  ;;  %v3521_v33 = vpop.eup %3520  ;;  %v5245_v57 = vmul.f32 %v1767_v25, %v5139_v5  ;;  %v1770_v20 = vadd.f32 1.0, %v3519_v56  ;;  %v1524_v16 = vmul.f32 0.70710677, %v1064_v41 }
 0x18b   : > { %v1259_v54 = vadd.f32 %v6028_v37, %v4581_v51  ;;  %v3523_v38 = vpop.eup %3522  ;;  %v5250_v59 = vmul.f32 %v1769_v14, %v5146_v7  ;;  %v1068_v8 = vadd.f32 %v5099_v55, %v4584_v12  ;;  %v1987_v2 = vpack.c.bf16 %v5180_v50, %v5137_v28  ;;  %v5263_v14 = vpop.f32.mrf.mxu0 }
 0x18c   : > { %2708 = vmatprep.mubr.bf16.mxu1 %v1990_v17  ;;  %v1989_v5 = vpack.c.bf16 %v5185_v15, %v5144_v32  ;;  %v1896_v47 = vmul.f32 %v1768_v31, %v5157_v42  ;;  %3536 = verf.f32 %v1523_v46  ;;  %v1526_v23 = vmul.f32 0.70710677, %v1257_v21  ;;  %v5265_v28 = vpop.f32.mrf.mxu1 }
 0x18d   : > { %v1261_v1 = vadd.f32 %v5101_v63, %v4586_v53  ;;  %v3525_v25 = vpop.eup %3524  ;;  %v1771_v7 = vadd.f32 1.0, %v3521_v33  ;;  %v5261_v56 = vmul.f32 0.5, %v1062_v13  ;;  %3538 = verf.f32 %v1525_v52  ;;  %2516 = vmatmul.mubr.bf16.gmra.mxu0 %v1987_v2 }
 0x18e   : > { %v1527_v55 = vmul.f32 0.70710677, %v1066_v11  ;;  %2709 = vmatmul.mubr.bf16.gmra.mxu1 %v1989_v5  ;;  %v3527_v32 = vpop.eup %3526  ;;  %v1898_v42 = vmul.f32 %v1770_v20, %v5163_v18  ;;  %v1773_v15 = vadd.f32 1.0, %v3523_v38  ;;  %3540 = verf.f32 %v1524_v16 }
 0x18f   : > { %v1529_v50 = vmul.f32 0.70710677, %v1259_v54  ;;  %v5268_v26 = vmul.f32 0.5, %v1255_v4  ;;  %v5270_v63 = vmul.f32 0.5, %v1064_v41  ;;  %v1528_v13 = vmul.f32 0.70710677, %v1068_v8  ;;  %v5281_v4 = vpop.f32.mrf.mxu0  ;;  %v5283_v41 = vpop.f32.mrf.mxu1 }
 0x190   : > { %v1072_v31 = vadd.f32 %v5122_v34, %v4579_v49  ;;  %v1772_v61 = vadd.f32 1.0, %v3525_v25  ;;  %v5274_v52 = vmul.f32 0.5, %v1257_v21  ;;  %3542 = verf.f32 %v1526_v23 }
 0x191   : > { %v3529_v46 = vpop.eup %3528  ;;  %v1530_v17 = vmul.f32 0.70710677, %v1261_v1  ;;  %v5277_v18 = vmul.f32 %v1771_v7, %v5187_v24  ;;  %v1774_v20 = vadd.f32 1.0, %v3527_v32  ;;  %v5279_v16 = vmul.f32 0.5, %v1066_v11  ;;  %v5307_v32 = vpop.f32.mrf.mxu1 }
 0x192   : > { %v3531_v33 = vpop.eup %3530  ;;  %3544 = verf.f32 %v1527_v55  ;;  %v5286_v34 = vmul.f32 %v1773_v15, %v5198_v43  ;;  %v5288_v21 = vmul.f32 0.5, %v1259_v54  ;;  %v1265_v38 = vadd.f32 %v5124_v62, %v4581_v51  ;;  %v5305_v55 = vpop.f32.mrf.mxu0 }
 0x193   : > { %v3533_v37 = vpop.eup %3532  ;;  %3546 = verf.f32 %v1529_v50  ;;  %v1775_v24 = vadd.f32 1.0, %v3529_v46  ;;  %v1531_v2 = vmul.f32 0.70710677, %v1072_v31  ;;  %v1074_v11 = vadd.f32 %v5150_v9, %v4584_v12 }
 0x194   : > { %3548 = verf.f32 %v1528_v13  ;;  %v5295_v5 = vmul.f32 %v1772_v61, %v5203_v44  ;;  %v1267_v43 = vadd.f32 %v5152_v35, %v4586_v53  ;;  %v1992_v54 = vpack.c.bf16 %v1896_v47, %v5221_v0  ;;  %v6029_v47 = vld [vmem:[#allocation9_spill] sm:$0xff] }
 0x195   : > { %3550 = verf.f32 %v1530_v17  ;;  %v5301_v23 = vmul.f32 %v1774_v20, %v5205_v60  ;;  %v1777_v25 = vadd.f32 1.0, %v3531_v33  ;;  %v1776_v62 = vadd.f32 1.0, %v3533_v37  ;;  %v5337_v33 = vpop.f32.mrf.mxu1 }
 0x196   : > { %v5303_v7 = vmul.f32 0.5, %v1068_v8  ;;  %v3535_v9 = vpop.eup %3534  ;;  %v5309_v44 = vmul.f32 0.5, %v1261_v1  ;;  %v1533_v15 = vmul.f32 0.70710677, %v1265_v38  ;;  %v1076_v35 = vadd.f32 %v5173_v39, %v4579_v49  ;;  %2525 = vmatprep.mubr.bf16.mxu0 %v1992_v54 }
 0x197   : > { %v1994_v0 = vpack.c.bf16 %v1898_v42, %v5228_v22  ;;  %v5315_v60 = vmul.f32 %v1775_v24, %v5207_v27  ;;  %3552 = verf.f32 %v1531_v2  ;;  %v1532_v8 = vmul.f32 0.70710677, %v1074_v11 }
 0x198   : > { %v1269_v50 = vadd.f32 %v6029_v47, %v4581_v51  ;;  %v1534_v13 = vmul.f32 0.70710677, %v1267_v43  ;;  %v5321_v1 = vadd.f32 %v5191_v6, %v4584_v12  ;;  %v1991_v39 = vpack.c.bf16 %v5245_v57, %v5201_v45  ;;  %v5335_v6 = vpop.f32.mrf.mxu0 }
 0x199   : > { %2718 = vmatprep.mubr.bf16.mxu1 %v1994_v0  ;;  %v1993_v22 = vpack.c.bf16 %v5250_v59, %v5212_v58  ;;  %v3537_v42 = vpop.eup %3536  ;;  %v5328_v27 = vmul.f32 %v1777_v25, %v5223_v19  ;;  %v1904_v46 = vmul.f32 %v1776_v62, %v5230_v29  ;;  %v1778_v61 = vadd.f32 1.0, %v3535_v9 }
 0x19a   : > { %v5333_v17 = vadd.f32 %v5193_v10, %v4586_v53  ;;  %v3539_v20 = vpop.eup %3538  ;;  %v5339_v45 = vmul.f32 0.5, %v1072_v31  ;;  %3554 = verf.f32 %v1533_v15  ;;  %v1535_v58 = vmul.f32 0.70710677, %v1076_v35  ;;  %2526 = vmatmul.mubr.bf16.gmra.mxu0 %v1991_v39  ;;  %v5360_v62 = vpop.f32.mrf.mxu0 }
 0x19b   : > { %v5343_v19 = vadd.f32 %v5216_v3, %v4579_v49  ;;  %2719 = vmatmul.mubr.bf16.gmra.mxu1 %v1993_v22  ;;  %v3541_v29 = vpop.eup %3540  ;;  %v5345_v57 = vmul.f32 0.5, %v1265_v38  ;;  %3556 = verf.f32 %v1532_v8  ;;  %v1537_v10 = vmul.f32 0.70710677, %v1269_v50 }
 0x19c   : > { %v5349_v59 = vadd.f32 %v5218_v36, %v4581_v51  ;;  %v1779_v37 = vadd.f32 1.0, %v3537_v42  ;;  %3558 = verf.f32 %v1534_v13  ;;  %v1536_v31 = vmul.f32 0.70710677, %v5321_v1  ;;  %v5362_v36 = vpop.f32.mrf.mxu1 }
 0x19d   : > { %v5354_v24 = vadd.f32 %v5240_v40, %v4584_v12  ;;  %v3543_v3 = vpop.eup %3542  ;;  %v1906_v2 = vmul.f32 %v1778_v61, %v5233_v48  ;;  %v1781_v54 = vadd.f32 1.0, %v3539_v20  ;;  %v5357_v38 = vmul.f32 0.5, %v1074_v11 }
 0x19e   : > { %v1538_v25 = vmul.f32 0.70710677, %v5333_v17  ;;  %v1780_v15 = vadd.f32 1.0, %v3541_v29  ;;  %v5364_v0 = vmul.f32 0.5, %v1267_v43  ;;  %3560 = verf.f32 %v1535_v58  ;;  %v5386_v58 = vpop.f32.mrf.mxu1 }
 0x19f   : > { %v3545_v9 = vpop.eup %3544  ;;  %v1539_v40 = vmul.f32 0.70710677, %v5343_v19  ;;  %v5367_v47 = vmul.f32 0.5, %v1076_v35  ;;  %3562 = verf.f32 %v1537_v10  ;;  %v1541_v48 = vmul.f32 0.70710677, %v5349_v59 }
 0x1a0   : > { %v3547_v8 = vpop.eup %3546  ;;  %v1277_v11 = vadd.f32 %v5242_v30, %v4586_v53  ;;  %v5373_v39 = vmul.f32 %v1779_v37, %v5261_v56  ;;  %v5375_v22 = vmul.f32 0.5, %v1269_v50  ;;  %3564 = verf.f32 %v1536_v31  ;;  %v5384_v30 = vpop.f32.mrf.mxu0 }
 0x1a1   : > { %v3549_v13 = vpop.eup %3548  ;;  %v1540_v43 = vmul.f32 0.70710677, %v5354_v24  ;;  %v5379_v61 = vmul.f32 %v1781_v54, %v5268_v26  ;;  %3566 = verf.f32 %v1538_v25  ;;  %v1086_v35 = vadd.f32 %v5263_v14, %v4579_v49 }
 0x1a2   : > { %v3551_v42 = vpop.eup %3550  ;;  %v1996_v20 = vpack.c.bf16 %v1904_v46, %v5295_v5  ;;  %v5389_v56 = vmul.f32 %v1780_v15, %v5270_v63  ;;  %v1782_v50 = vadd.f32 1.0, %v3543_v3  ;;  %v1783_v29 = vadd.f32 1.0, %v3545_v9 }
 0x1a3   : > { %3568 = verf.f32 %v1539_v40  ;;  %v1785_v10 = vadd.f32 1.0, %v3547_v8  ;;  %v1542_v26 = vmul.f32 0.70710677, %v1277_v11  ;;  %v1998_v37 = vpack.c.bf16 %v1906_v2, %v5301_v23  ;;  %v5402_v23 = vpop.f32.mrf.mxu0  ;;  %v5404_v2 = vpop.f32.mrf.mxu1 }
 0x1a4   : > { %3570 = verf.f32 %v1541_v48  ;;  %2535 = vmatprep.mubr.bf16.mxu0 %v1996_v20  ;;  %v3553_v31 = vpop.eup %3552  ;;  %v1784_v14 = vadd.f32 1.0, %v3549_v13  ;;  %v1786_v54 = vadd.f32 1.0, %v3551_v42  ;;  %v1279_v5 = vadd.f32 %v5265_v28, %v4581_v51 }
 0x1a5   : > { %3572 = verf.f32 %v1540_v43  ;;  %v1543_v46 = vmul.f32 0.70710677, %v1086_v35  ;;  %v5396_v63 = vadd.f32 %v5281_v4, %v4584_v12  ;;  %2728 = vmatprep.mubr.bf16.mxu1 %v1998_v37  ;;  %v1995_v3 = vpack.c.bf16 %v5315_v60, %v5277_v18  ;;  %v5438_v48 = vpop.f32.mrf.mxu0  ;;  %v5440_v13 = vpop.f32.mrf.mxu1 }
 0x1a6   : > { %v1997_v25 = vpack.c.bf16 %v5328_v27, %v5286_v34  ;;  %v5407_v9 = vmul.f32 %v1782_v50, %v5274_v52  ;;  %v5410_v28 = vmul.f32 %v1783_v29, %v5279_v16  ;;  %v5413_v4 = vmul.f32 0.5, %v5321_v1 }
 0x1a7   : > { %v5417_v15 = vadd.f32 %v5283_v41, %v4586_v53  ;;  %v3555_v18 = vpop.eup %3554  ;;  %v5420_v34 = vmul.f32 %v1785_v10, %v5288_v21  ;;  %v5423_v60 = vmul.f32 0.5, %v5333_v17  ;;  %v5426_v52 = vmul.f32 0.5, %v5343_v19  ;;  %2536 = vmatmul.mubr.bf16.gmra.mxu0 %v1995_v3 }
 0x1a8   : > { %3574 = verf.f32 %v1542_v26  ;;  %2729 = vmatmul.mubr.bf16.gmra.mxu1 %v1997_v25  ;;  %v3557_v16 = vpop.eup %3556  ;;  %v1912_v1 = vmul.f32 %v1784_v14, %v5303_v7  ;;  %v1787_v27 = vadd.f32 1.0, %v3553_v31  ;;  %v5430_v41 = vmul.f32 0.5, %v5349_v59 }
 0x1a9   : > { %v1545_v40 = vmul.f32 0.70710677, %v1279_v5  ;;  %v3559_v8 = vpop.eup %3558  ;;  %v1914_v21 = vmul.f32 %v1786_v54, %v5309_v44  ;;  %3576 = verf.f32 %v1543_v46  ;;  %v1544_v17 = vmul.f32 0.70710677, %v5396_v63 }
 0x1aa   : > { %v5436_v19 = vadd.f32 %v5305_v55, %v4579_v49  ;;  %v1789_v7 = vadd.f32 1.0, %v3555_v18  ;;  %v5443_v43 = vmul.f32 0.5, %v5354_v24  ;;  %v1546_v59 = vmul.f32 0.70710677, %v5417_v15 }
 0x1ab   : > { %v5448_v44 = vadd.f32 %v5307_v32, %v4581_v51  ;;  %v3561_v42 = vpop.eup %3560  ;;  %v1788_v20 = vadd.f32 1.0, %v3557_v16  ;;  %v5450_v50 = vmul.f32 0.5, %v1277_v11  ;;  %v5452_v55 = vmul.f32 0.5, %v1086_v35  ;;  %v5472_v35 = vpop.f32.mrf.mxu0 }
 0x1ac   : > { %v5456_v29 = vadd.f32 %v5335_v6, %v4584_v12  ;;  %v3563_v10 = vpop.eup %3562  ;;  %v5459_v24 = vmul.f32 %v1787_v27, %v5339_v45  ;;  %v1790_v26 = vadd.f32 1.0, %v3559_v8  ;;  %3578 = verf.f32 %v1545_v40  ;;  %v5474_v45 = vpop.f32.mrf.mxu1 }
 0x1ad   : > { %v5463_v32 = vadd.f32 %v5360_v62, %v4579_v49  ;;  %v3565_v37 = vpop.eup %3564  ;;  %v5465_v31 = vmul.f32 0.5, %v1279_v5  ;;  %3580 = verf.f32 %v1544_v17  ;;  %v1547_v11 = vmul.f32 0.70710677, %v5436_v19 }
 0x1ae   : > { %v5470_v6 = vadd.f32 %v5362_v36, %v4581_v51  ;;  %v3567_v14 = vpop.eup %3566  ;;  %v5477_v54 = vmul.f32 %v1789_v7, %v5345_v57  ;;  %3582 = verf.f32 %v1546_v59  ;;  %v1549_v62 = vmul.f32 0.70710677, %v5448_v44  ;;  %v1107_v7 = vpop.f32.mrf.mxu0 }
 0x1af   : > { %v2000_v5 = vpack.c.bf16 %v1912_v1, %v5389_v56  ;;  %v5482_v3 = vmul.f32 %v1788_v20, %v5357_v38  ;;  %v1791_v25 = vadd.f32 1.0, %v3561_v42  ;;  %v1793_v36 = vadd.f32 1.0, %v3563_v10  ;;  %v1300_v59 = vpop.f32.mrf.mxu1 }
 0x1b0   : > { %v3569_v46 = vpop.eup %3568  ;;  %v1548_v18 = vmul.f32 0.70710677, %v5456_v29  ;;  %v5486_v27 = vmul.f32 %v1790_v26, %v5364_v0  ;;  %v1287_v57 = vadd.f32 %v5337_v33, %v4586_v53  ;;  %v1551_v40 = vmul.f32 0.70710677, %v5463_v32 }
 0x1b1   : > { %v3571_v16 = vpop.eup %3570  ;;  %2545 = vmatprep.mubr.bf16.mxu0 %v2000_v5  ;;  %v2002_v56 = vpack.c.bf16 %v1914_v21, %v5407_v9  ;;  %v1792_v8 = vadd.f32 1.0, %v3565_v37  ;;  %v5493_v38 = vmul.f32 0.5, %v5396_v63  ;;  %3584 = verf.f32 %v1547_v11 }
 0x1b2   : > { %v3573_v1 = vpop.eup %3572  ;;  %v1553_v17 = vmul.f32 0.70710677, %v5470_v6  ;;  %v1794_v0 = vadd.f32 1.0, %v3567_v14  ;;  %3586 = verf.f32 %v1549_v62  ;;  %v1999_v33 = vpack.c.bf16 %v5410_v28, %v5373_v39 }
 0x1b3   : > { %2738 = vmatprep.mubr.bf16.mxu1 %v2002_v56  ;;  %v2001_v42 = vpack.c.bf16 %v5420_v34, %v5379_v61  ;;  %v5501_v9 = vmul.f32 %v1791_v25, %v5367_v47  ;;  %v5504_v63 = vmul.f32 %v1793_v36, %v5375_v22  ;;  %v5507_v21 = vmul.f32 0.5, %v5417_v15  ;;  %v5514_v22 = vpop.f32.mrf.mxu0  ;;  %v5516_v15 = vpop.f32.mrf.mxu1 }
 0x1b4   : > { %3588 = verf.f32 %v1548_v18  ;;  %v1795_v10 = vadd.f32 1.0, %v3569_v46  ;;  %v1550_v26 = vmul.f32 0.70710677, %v1287_v57  ;;  %v1098_v39 = vadd.f32 %v5384_v30, %v4584_v12  ;;  %2546 = vmatmul.mubr.bf16.gmra.mxu0 %v1999_v33 }
 0x1b5   : > { %v3575_v20 = vpop.eup %3574  ;;  %3590 = verf.f32 %v1551_v40  ;;  %2739 = vmatmul.mubr.bf16.gmra.mxu1 %v2001_v42  ;;  %v1797_v61 = vadd.f32 1.0, %v3571_v16  ;;  %v1796_v28 = vadd.f32 1.0, %v3573_v1  ;;  %v5512_v47 = vmul.f32 0.5, %v5436_v19  ;;  %v1306_v16 = vpop.f32.mrf.mxu1 }
 0x1b6   : > { %3592 = verf.f32 %v1553_v17  ;;  %v3577_v34 = vpop.eup %3576  ;;  %v1920_v37 = vmul.f32 %v1792_v8, %v5413_v4  ;;  %v1922_v11 = vmul.f32 %v1794_v0, %v5423_v60  ;;  %v5521_v14 = vmul.f32 0.5, %v5448_v44 }
 0x1b7   : > { %v1291_v30 = vadd.f32 %v5386_v58, %v4586_v53  ;;  %v1798_v62 = vadd.f32 1.0, %v3575_v20  ;;  %v5526_v19 = vmul.f32 0.5, %v5456_v29  ;;  %v5528_v5 = vmul.f32 0.5, %v1287_v57 }
 0x1b8   : > { %v5532_v46 = vadd.f32 %v5402_v23, %v4579_v49  ;;  %v5535_v4 = vmul.f32 %v1795_v10, %v5426_v52  ;;  %3594 = verf.f32 %v1550_v26  ;;  %v5538_v60 = vmul.f32 0.5, %v5463_v32  ;;  %v1113_v23 = vpop.f32.mrf.mxu0 }
 0x1b9   : > { %v1552_v44 = vmul.f32 0.70710677, %v1098_v39  ;;  %v3579_v25 = vpop.eup %3578  ;;  %v5541_v58 = vmul.f32 %v1797_v61, %v5430_v41  ;;  %v5544_v29 = vmul.f32 %v1796_v28, %v5443_v43  ;;  %v1799_v36 = vadd.f32 1.0, %v3577_v34 }
 0x1ba   : > { %v5547_v18 = vmul.f32 0.5, %v5470_v6  ;;  %v3581_v52 = vpop.eup %3580  ;;  %v1554_v57 = vmul.f32 0.70710677, %v1291_v30  ;;  %v1104_v32 = vadd.f32 %v5438_v48, %v4584_v12  ;;  %v5552_v40 = vadd.f32 %v1107_v7, %v4584_v12  ;;  %v1115_v42 = vpop.f32.mrf.mxu0 }
 0x1bb   : > { %v5555_v41 = vadd.f32 %v1300_v59, %v4586_v53  ;;  %v3583_v56 = vpop.eup %3582  ;;  %v5558_v43 = vmul.f32 %v1798_v62, %v5450_v50  ;;  %v1555_v6 = vmul.f32 0.70710677, %v5532_v46  ;;  %v1297_v1 = vadd.f32 %v5440_v13, %v4586_v53  ;;  %v1308_v13 = vpop.f32.mrf.mxu1 }
 0x1bc   : > { %v2004_v8 = vpack.c.bf16 %v1920_v37, %v5482_v3  ;;  %v1801_v17 = vadd.f32 1.0, %v3579_v25  ;;  %3596 = verf.f32 %v1552_v44  ;;  %v5566_v48 = vadd.f32 %v5404_v2, %v4581_v51 }
 0x1bd   : > { %v1560_v7 = vmul.f32 0.70710677, %v5552_v40  ;;  %v1800_v59 = vadd.f32 1.0, %v3581_v52  ;;  %v5569_v0 = vmul.f32 0.5, %v1098_v39  ;;  %v1562_v50 = vmul.f32 0.70710677, %v5555_v41 }
 0x1be   : > { %2555 = vmatprep.mubr.bf16.mxu0 %v2004_v8  ;;  %v2006_v33 = vpack.c.bf16 %v1922_v11, %v5486_v27  ;;  %v3585_v20 = vpop.eup %3584  ;;  %v1802_v3 = vadd.f32 1.0, %v3583_v56  ;;  %3598 = verf.f32 %v1554_v57  ;;  %v1556_v10 = vmul.f32 0.70710677, %v1104_v32 }
 0x1bf   : > { %v1106_v2 = vadd.f32 %v5472_v35, %v4579_v49  ;;  %v3587_v26 = vpop.eup %3586  ;;  %3600 = verf.f32 %v1555_v6  ;;  %v1558_v61 = vmul.f32 0.70710677, %v1297_v1  ;;  %v1299_v39 = vadd.f32 %v5474_v45, %v4581_v51  ;;  %v1117_v45 = vpop.f32.mrf.mxu0 }
 0x1c0   : > { %2748 = vmatprep.mubr.bf16.mxu1 %v2006_v33  ;;  %v2003_v28 = vpack.c.bf16 %v5501_v9, %v5459_v24  ;;  %v5580_v34 = vmul.f32 %v1799_v36, %v5452_v55  ;;  %v5582_v37 = vmul.f32 0.5, %v1291_v30  ;;  %v1557_v11 = vmul.f32 0.70710677, %v5566_v48  ;;  %v1310_v55 = vpop.f32.mrf.mxu1 }
 0x1c1   : > { %v3589_v27 = vpop.eup %3588  ;;  %3602 = verf.f32 %v1560_v7  ;;  %v5586_v62 = vmul.f32 %v1801_v17, %v5465_v31  ;;  %v5589_v44 = vmul.f32 %v1800_v59, %v5493_v38  ;;  %v2005_v24 = vpack.c.bf16 %v5504_v63, %v5477_v54  ;;  %v5606_v7 = vpop.f32.mrf.mxu0 }
 0x1c2   : > { %v3591_v35 = vpop.eup %3590  ;;  %3604 = verf.f32 %v1562_v50  ;;  %2556 = vmatmul.mubr.bf16.gmra.mxu0 %v2003_v28  ;;  %v1803_v30 = vadd.f32 1.0, %v3585_v20  ;;  %v1559_v25 = vmul.f32 0.70710677, %v1106_v2  ;;  %v5594_v36 = vadd.f32 %v1113_v23, %v4584_v12 }
 0x1c3   : > { %v3593_v9 = vpop.eup %3592  ;;  %3606 = verf.f32 %v1556_v10  ;;  %v1930_v31 = vmul.f32 %v1802_v3, %v5507_v21  ;;  %v1561_v52 = vmul.f32 0.70710677, %v1299_v39  ;;  %2749 = vmatmul.mubr.bf16.gmra.mxu1 %v2005_v24  ;;  %v5598_v38 = vadd.f32 %v1306_v16, %v4586_v53  ;;  %v5608_v21 = vpop.f32.mrf.mxu1 }
 0x1c4   : > { %3608 = verf.f32 %v1558_v61  ;;  %v1805_v57 = vadd.f32 1.0, %v3587_v26  ;;  %v5600_v54 = vmul.f32 0.5, %v1104_v32  ;;  %v5602_v63 = vmul.f32 0.5, %v1297_v1 }
 0x1c5   : > { %3610 = verf.f32 %v1557_v11  ;;  %v3595_v56 = vpop.eup %3594  ;;  %v1804_v6 = vadd.f32 1.0, %v3589_v27  ;;  %v1807_v8 = vadd.f32 1.0, %v3591_v35  ;;  %v1809_v17 = vadd.f32 1.0, %v3593_v9  ;;  %v1316_v28 = vpop.f32.mrf.mxu1 }
 0x1c6   : > { %v5604_v23 = vmul.f32 0.5, %v1106_v2  ;;  %v5611_v59 = vmul.f32 %v1803_v30, %v5512_v47  ;;  %3612 = verf.f32 %v1559_v25  ;;  %v5613_v16 = vmul.f32 0.5, %v1299_v39  ;;  %v1123_v39 = vpop.f32.mrf.mxu0 }
 0x1c7   : > { %v1564_v32 = vmul.f32 0.70710677, %v5594_v36  ;;  %3614 = verf.f32 %v1561_v52  ;;  %v5618_v1 = vadd.f32 %v5514_v22, %v4579_v49  ;;  %v1566_v50 = vmul.f32 0.70710677, %v5598_v38 }
 0x1c8   : > { %v5622_v33 = vadd.f32 %v1117_v45, %v4584_v12  ;;  %v5625_v20 = vmul.f32 %v1805_v57, %v5521_v14  ;;  %v1806_v47 = vadd.f32 1.0, %v3595_v56  ;;  %v5628_v3 = vadd.f32 %v1115_v42, %v4579_v49 }
 0x1c9   : > { %v5631_v10 = vadd.f32 %v1310_v55, %v4586_v53  ;;  %v3597_v2 = vpop.eup %3596  ;;  %v5634_v26 = vmul.f32 %v1804_v6, %v5526_v19  ;;  %v5637_v22 = vmul.f32 %v1807_v8, %v5538_v60  ;;  %v5640_v61 = vmul.f32 %v1809_v17, %v5547_v18 }
 0x1ca   : > { %v5643_v14 = vadd.f32 %v1308_v13, %v4581_v51  ;;  %v5647_v42 = vadd.f32 %v5516_v15, %v4581_v51  ;;  %3616 = verf.f32 %v1564_v32  ;;  %v1568_v27 = vmul.f32 0.70710677, %v5622_v33 }
 0x1cb   : > { %v1570_v19 = vmul.f32 0.70710677, %v5631_v10  ;;  %v3599_v11 = vpop.eup %3598  ;;  %v1563_v60 = vmul.f32 0.70710677, %v5618_v1  ;;  %3618 = verf.f32 %v1566_v50  ;;  %v2008_v18 = vpack.c.bf16 %v5589_v44, %v5544_v29  ;;  %v1125_v29 = vpop.f32.mrf.mxu0 }
 0x1cc   : > { %v2010_v13 = vpack.c.bf16 %v1930_v31, %v5558_v43  ;;  %v3601_v35 = vpop.eup %3600  ;;  %v5656_v24 = vmul.f32 %v1806_v47, %v5528_v5  ;;  %v1808_v15 = vadd.f32 1.0, %v3597_v2  ;;  %v1567_v45 = vmul.f32 0.70710677, %v5628_v3  ;;  %v1318_v43 = vpop.f32.mrf.mxu1 }
 0x1cd   : > { %3620 = verf.f32 %v1568_v27  ;;  %v1432_v9 = vmul.f32 0.5, %v5552_v40  ;;  %v1434_v30 = vmul.f32 0.5, %v5555_v41  ;;  %v1569_v25 = vmul.f32 0.70710677, %v5643_v14  ;;  %2565 = vmatprep.mubr.bf16.mxu0 %v2008_v18 }
 0x1ce   : > { %v3603_v55 = vpop.eup %3602  ;;  %3622 = verf.f32 %v1570_v19  ;;  %2758 = vmatprep.mubr.bf16.mxu1 %v2010_v13  ;;  %v2011_v5 = vpack.c.bf16 %v5637_v22, %v5611_v59  ;;  %v2013_v31 = vpack.c.bf16 %v5640_v61, %v5625_v20  ;;  %v1810_v52 = vadd.f32 1.0, %v3599_v11 }
 0x1cf   : > { %v3605_v44 = vpop.eup %3604  ;;  %v1565_v57 = vmul.f32 0.70710677, %v5647_v42  ;;  %3624 = verf.f32 %v1563_v60  ;;  %v2007_v41 = vpack.c.bf16 %v5580_v34, %v5535_v4  ;;  %v2009_v56 = vpack.c.bf16 %v5586_v62, %v5541_v58  ;;  %v1127_v58 = vpop.f32.mrf.mxu0 }
 0x1d0   : > { %v3607_v40 = vpop.eup %3606  ;;  %v5672_v6 = vadd.f32 %v1123_v39, %v4584_v12  ;;  %v1936_v17 = vmul.f32 %v1808_v15, %v5569_v0  ;;  %3626 = verf.f32 %v1567_v45  ;;  %v5676_v32 = vadd.f32 %v1316_v28, %v4586_v53  ;;  %v1320_v34 = vpop.f32.mrf.mxu1 }
 0x1d1   : > { %v3609_v8 = vpop.eup %3608  ;;  %v5679_v50 = vadd.f32 %v1125_v29, %v4579_v49  ;;  %v1816_v2 = vadd.f32 1.0, %v3603_v55  ;;  %v1818_v27 = vadd.f32 1.0, %v3605_v44  ;;  %3628 = verf.f32 %v1569_v25  ;;  %2566 = vmatmul.mubr.bf16.gmra.mxu0 %v2007_v41  ;;  %2759 = vmatmul.mubr.bf16.gmra.mxu1 %v2009_v56 }
 0x1d2   : > { %v3611_v47 = vpop.eup %3610  ;;  %v1572_v4 = vmul.f32 0.70710677, %v5672_v6  ;;  %v1938_v62 = vmul.f32 %v1810_v52, %v5582_v37  ;;  %v1812_v0 = vadd.f32 1.0, %v3607_v40  ;;  %3630 = verf.f32 %v1565_v57 }
 0x1d3   : > { %v1574_v39 = vmul.f32 0.70710677, %v5676_v32  ;;  %v3613_v28 = vpop.eup %3612  ;;  %v1814_v19 = vadd.f32 1.0, %v3609_v8  ;;  %v5686_v11 = vadd.f32 %v5606_v7, %v4579_v49  ;;  %v1575_v60 = vmul.f32 0.70710677, %v5679_v50 }
 0x1d4   : > { %v5690_v18 = vadd.f32 %v1318_v43, %v4581_v51  ;;  %v3615_v13 = vpop.eup %3614  ;;  %v5694_v15 = vadd.f32 %v5608_v21, %v4581_v51  ;;  %3632 = verf.f32 %v1572_v4  ;;  %v5697_v37 = vadd.f32 %v1127_v58, %v4584_v12 }
 0x1d5   : > { %v5700_v45 = vadd.f32 %v1320_v34, %v4586_v53  ;;  %v1811_v55 = vadd.f32 1.0, %v3601_v35  ;;  %v1944_v49 = vmul.f32 %v1816_v2, %v1432_v9  ;;  %v1946_v7 = vmul.f32 %v1818_v27, %v1434_v30 }
 0x1d6   : > { %v1577_v25 = vmul.f32 0.70710677, %v5690_v18  ;;  %v1940_v29 = vmul.f32 %v1812_v0, %v5600_v54  ;;  %v1815_v43 = vadd.f32 1.0, %v3613_v28  ;;  %3634 = verf.f32 %v1574_v39 }
 0x1d7   : > { %v1576_v44 = vmul.f32 0.70710677, %v5697_v37  ;;  %v3617_v51 = vpop.eup %3616  ;;  %v1942_v21 = vmul.f32 %v1814_v19, %v5602_v63  ;;  %v1817_v52 = vadd.f32 1.0, %v3615_v13  ;;  %v1571_v12 = vmul.f32 0.70710677, %v5686_v11 }
 0x1d8   : > { %3636 = verf.f32 %v1575_v60  ;;  %v3619_v53 = vpop.eup %3618  ;;  %v1573_v35 = vmul.f32 0.70710677, %v5694_v15  ;;  %v1578_v9 = vmul.f32 0.70710677, %v5700_v45  ;;  %v2012_v30 = vpack.c.bf16 %v1936_v17, %v5634_v26 }
 0x1d9   : > { %3638 = verf.f32 %v1576_v44  ;;  %v2014_v57 = vpack.c.bf16 %v1938_v62, %v5656_v24  ;;  %v2016_v40 = vpack.c.bf16 %v1944_v49, %v1940_v29  ;;  %v2018_v41 = vpack.c.bf16 %v1946_v7, %v1942_v21 }
 0x1da   : > { %v3621_v54 = vpop.eup %3620  ;;  %3640 = verf.f32 %v1577_v25  ;;  %v1820_v63 = vadd.f32 1.0, %v3617_v51  ;;  %v1440_v8 = vmul.f32 0.5, %v5622_v33  ;;  %2575 = vmatprep.mubr.bf16.mxu0 %v2012_v30  ;;  %v1822_v27 = vadd.f32 1.0, %v3619_v53 }
 0x1db   : > { %v3623_v56 = vpop.eup %3622  ;;  %v1824_v2 = vadd.f32 1.0, %v3621_v54  ;;  %3642 = verf.f32 %v1578_v9  ;;  %v1442_v4 = vmul.f32 0.5, %v5631_v10  ;;  %2768 = vmatprep.mubr.bf16.mxu1 %v2014_v57  ;;  %2576 = vmatmul.mubr.bf16.gmra.mxu0 %v2011_v5  ;;  %v1813_v24 = vadd.f32 1.0, %v3611_v47 }
 0x1dc   : > { %v1826_v58 = vadd.f32 1.0, %v3623_v56  ;;  %3644 = verf.f32 %v1571_v12  ;;  %v3625_v26 = vpop.eup %3624  ;;  %v1436_v17 = vmul.f32 0.5, %v5594_v36  ;;  %2769 = vmatmul.mubr.bf16.gmra.mxu1 %v2013_v31  ;;  %2585 = vmatprep.mubr.bf16.mxu0 %v2016_v40  ;;  %v1427_v10 = vmul.f32 0.5, %v5532_v46 }
 0x1dd   : > { %v1952_v34 = vmul.f32 %v1824_v2, %v1440_v8  ;;  %3646 = verf.f32 %v1573_v35  ;;  %v3627_v33 = vpop.eup %3626  ;;  %v1943_v62 = vmul.f32 %v1815_v43, %v5604_v23  ;;  %v1438_v0 = vmul.f32 0.5, %v5598_v38  ;;  %2778 = vmatprep.mubr.bf16.mxu1 %v2018_v41 }
 0x1de   : > { %v1954_v59 = vmul.f32 %v1826_v58, %v1442_v4  ;;  %v3629_v22 = vpop.eup %3628  ;;  %v1429_v5 = vmul.f32 0.5, %v5566_v48  ;;  %v1945_v36 = vmul.f32 %v1817_v52, %v5613_v16  ;;  %v1948_v47 = vmul.f32 %v1820_v63, %v1436_v17 }
 0x1df   : > { %v3631_v39 = vpop.eup %3630  ;;  %v1939_v28 = vmul.f32 %v1811_v55, %v1427_v10  ;;  %v1950_v20 = vmul.f32 %v1822_v27, %v1438_v0  ;;  %v1823_v46 = vadd.f32 1.0, %v3627_v33  ;;  %v1825_v13 = vadd.f32 1.0, %v3629_v22 }
 0x1e0   : > { %v1941_v61 = vmul.f32 %v1813_v24, %v1429_v5  ;;  %v2020_v31 = vpack.c.bf16 %v1952_v34, %v1948_v47  ;;  %v1819_v7 = vadd.f32 1.0, %v3625_v26  ;;  %v1821_v25 = vadd.f32 1.0, %v3631_v39  ;;  %v6030_v5 = vld [vmem:[#allocation6_spill] sm:$0xff] }
 0x1e1   : > { %v3633_v19 = vpop.eup %3632  ;;  %v2015_v60 = vpack.c.bf16 %v1943_v62, %v1939_v28  ;;  %v2022_v23 = vpack.c.bf16 %v1954_v59, %v1950_v20  ;;  %v1439_v29 = vmul.f32 0.5, %v5628_v3  ;;  %v1441_v48 = vmul.f32 0.5, %v5643_v14 }
 0x1e2   : > { %v2017_v49 = vpack.c.bf16 %v1945_v36, %v1941_v61  ;;  %v1828_v43 = vadd.f32 1.0, %v3633_v19  ;;  %v1435_v44 = vmul.f32 0.5, %v5618_v1  ;;  %v1437_v51 = vmul.f32 0.5, %v5647_v42 }
 0x1e3   : > { %v3635_v38 = vpop.eup %3634  ;;  %2586 = vmatmul.mubr.bf16.gmra.mxu0 %v2015_v60  ;;  %v1951_v21 = vmul.f32 %v1823_v46, %v1439_v29  ;;  %v1953_v52 = vmul.f32 %v1825_v13, %v1441_v48  ;;  %v1444_v53 = vmul.f32 0.5, %v5672_v6  ;;  %v1448_v3 = vmul.f32 0.5, %v5697_v37  ;;  %v3648_v46 = vld [vmem:[%s4003_s23] sm:$0xff] }
 0x1e4   : > { %2779 = vmatmul.mubr.bf16.gmra.mxu1 %v2017_v49  ;;  %2595 = vmatprep.mubr.bf16.mxu0 %v2020_v31  ;;  %v1830_v35 = vadd.f32 1.0, %v3635_v38  ;;  %v1947_v30 = vmul.f32 %v1819_v7, %v1435_v44  ;;  %v1949_v54 = vmul.f32 %v1821_v25, %v1437_v51  ;;  %v1446_v57 = vmul.f32 0.5, %v5676_v32  ;;  %v3649_v25 = vld [vmem:[%s4003_s23 + $0x8] sm:$0xff] }
 0x1e5   : > { %v3637_v16 = vpop.eup %3636  ;;  %2788 = vmatprep.mubr.bf16.mxu1 %v2022_v23  ;;  %v1956_v41 = vmul.f32 %v1828_v43, %v1444_v53  ;;  %v1450_v42 = vmul.f32 0.5, %v5700_v45  ;;  %v1447_v24 = vmul.f32 0.5, %v5679_v50  ;;  %v1449_v32 = vmul.f32 0.5, %v5690_v18  ;;  %v2091_v18 = vld [vmem:[%s5998_s4] sm:$0x3] }
 0x1e6   : > { %v3639_v55 = vpop.eup %3638  ;;  %v2019_v8 = vpack.c.bf16 %v1951_v21, %v1947_v30  ;;  %v2021_v2 = vpack.c.bf16 %v1953_v52, %v1949_v54  ;;  %v1831_v27 = vadd.f32 1.0, %v3637_v16  ;;  %v1958_v6 = vmul.f32 %v1830_v35, %v1446_v57  ;;  %v3651_v21 = vld [vmem:[%s4003_s23 + $0x18] sm:$0xff]  ;;  %v3652_v57 = vld [vmem:[%s4003_s23 + $0x20] sm:$0xff] }
 0x1e7   : > { %v3641_v12 = vpop.eup %3640  ;;  %v1832_v14 = vadd.f32 1.0, %v3639_v55  ;;  %v1443_v34 = vmul.f32 0.5, %v5686_v11  ;;  %v1445_v10 = vmul.f32 0.5, %v5694_v15  ;;  %v5741_v36 = vrot.slane %v2091_v18, %v6030_v5  ;;  %v6031_v11 = vld [vmem:[#allocation5_spill] sm:$0xff]  ;;  %v3650_v55 = vld [vmem:[%s4003_s23 + $0x10] sm:$0xff] }
 0x1e8   : > { %v3643_v9 = vpop.eup %3642  ;;  %v1833_v4 = vadd.f32 1.0, %v3641_v12  ;;  %v1959_v33 = vmul.f32 %v1831_v27, %v1447_v24  ;;  %v5745_v47 = vrot.slane %v2091_v18, %v6031_v11 }
 0x1e9   : > { %v3645_v40 = vpop.eup %3644  ;;  %v1960_v1 = vmul.f32 %v1832_v14, %v1448_v3  ;;  %v1834_v56 = vadd.f32 1.0, %v3643_v9 }
 0x1ea   : > { %v3647_v63 = vpop.eup %3646  ;;  %v1827_v26 = vadd.f32 1.0, %v3645_v40  ;;  %v1961_v62 = vmul.f32 %v1833_v4, %v1449_v32  ;;  %v3654_v4 = vld [vmem:[%s4003_s23 + $0x30] sm:$0xff] }
 0x1eb   : > { %v1962_v58 = vmul.f32 %v1834_v56, %v1450_v42  ;;  %v2024_v37 = vpack.c.bf16 %v1960_v1, %v1956_v41  ;;  %2596 = vmatmul.mubr.bf16.gmra.mxu0 %v2019_v8  ;;  %v1829_v17 = vadd.f32 1.0, %v3647_v63  ;;  %v3653_v63 = vld [vmem:[%s4003_s23 + $0x28] sm:$0xff] }
 0x1ec   : > { %2789 = vmatmul.mubr.bf16.gmra.mxu1 %v2021_v2  ;;  %v1955_v0 = vmul.f32 %v1827_v26, %v1443_v34  ;;  %v3655_v26 = vld [vmem:[%s4003_s23 + $0x38] sm:$0xff] }
 0x1ed   : > { %2605 = vmatprep.mubr.bf16.mxu0 %v2024_v37  ;;  %v2026_v45 = vpack.c.bf16 %v1962_v58, %v1958_v6  ;;  %v1957_v59 = vmul.f32 %v1829_v17, %v1445_v10 }
 0x1ee   : > { %v2023_v22 = vpack.c.bf16 %v1959_v33, %v1955_v0 }
 0x1ef   : > { %2798 = vmatprep.mubr.bf16.mxu1 %v2026_v45  ;;  %v2025_v50 = vpack.c.bf16 %v1961_v62, %v1957_v59  ;;  %v3656_v59 = vld [vmem:[%s4003_s23 + $0x40] sm:$0xff] }
 0x1f3   : > { %2606 = vmatmul.mubr.bf16.gmra.mxu0 %v2023_v22 }
 0x1f4   : > { %2799 = vmatmul.mubr.bf16.gmra.mxu1 %v2025_v50 }
 0x1fe   : > { %v2457_v15 = vpop.f32.mrf.mxu0  ;;  %v2650_v28 = vpop.f32.mrf.mxu1 }
 0x1ff   : > { %v2458_v39 = vadd.f32 %v2457_v15, %v5741_v36  ;;  %v3657_v15 = vld [vmem:[%s4003_s23 + $0x48] sm:$0xff] }
 0x200   : > { %v2459_v20 = vpop.f32.mrf.mxu0  ;;  %v2652_v19 = vpop.f32.mrf.mxu1 }
 0x201   : > { %v2651_v61 = vadd.f32 %v2650_v28, %v2458_v39  ;;  %v2460_v31 = vadd.f32 %v2459_v20, %v5745_v47 }
 0x202   : > { %v2461_v60 = vpop.f32.mrf.mxu0  ;;  %v2654_v38 = vpop.f32.mrf.mxu1 }
 0x203   : > { %v2809_v13 = vadd.f32 %v3648_v46, %v2651_v61  ;;  %v2653_v23 = vadd.f32 %v2652_v19, %v2460_v31  ;;  %v2462_v49 = vadd.f32 %v2461_v60, %v5741_v36  ;;  %v3658_v31 = vld [vmem:[%s4003_s23 + $0x50] sm:$0xff]  ;;  %v3659_v46 = vld [vmem:[%s4003_s23 + $0x58] sm:$0xff] }
 0x204   : > { %v2463_v7 = vpop.f32.mrf.mxu0  ;;  %v2656_v43 = vpop.f32.mrf.mxu1 }
 0x205   : > { %2873 = vst [vmem:[%s5753_s19] sm:$0xff] %v2809_v13  ;;  %v2810_v29 = vadd.f32 %v3649_v25, %v2653_v23  ;;  %v2655_v48 = vadd.f32 %v2654_v38, %v2462_v49  ;;  %v2464_v16 = vadd.f32 %v2463_v7, %v5745_v47 }
 0x207   : > { %2874 = vst [vmem:[%s5753_s19 + $0x8] sm:$0xff] %v2810_v29  ;;  %v2811_v44 = vadd.f32 %v3650_v55, %v2655_v48  ;;  %v2657_v51 = vadd.f32 %v2656_v43, %v2464_v16  ;;  %v3660_v55 = vld [vmem:[%s4003_s23 + $0x60] sm:$0xff] }
 0x209   : > { %2875 = vst [vmem:[%s5753_s19 + $0x10] sm:$0xff] %v2811_v44  ;;  %v2812_v52 = vadd.f32 %v3651_v21, %v2657_v51 }
 0x20b   : > { %2876 = vst [vmem:[%s5753_s19 + $0x18] sm:$0xff] %v2812_v52 }
 0x20d   : > { %v2467_v12 = vpop.f32.mrf.mxu0 }
 0x20e   : > { %v2468_v53 = vadd.f32 %v2467_v12, %v5741_v36  ;;  %v2660_v35 = vpop.f32.mrf.mxu1 }
 0x20f   : > { %v2469_v3 = vpop.f32.mrf.mxu0 }
 0x210   : > { %v2661_v14 = vadd.f32 %v2660_v35, %v2468_v53  ;;  %v2470_v9 = vadd.f32 %v2469_v3, %v5745_v47  ;;  %v2662_v30 = vpop.f32.mrf.mxu1  ;;  %v3661_v53 = vld [vmem:[%s4003_s23 + $0x68] sm:$0xff] }
 0x211   : > { %v2471_v54 = vpop.f32.mrf.mxu0 }
 0x212   : > { %v2813_v40 = vadd.f32 %v3652_v57, %v2661_v14  ;;  %v2663_v41 = vadd.f32 %v2662_v30, %v2470_v9  ;;  %v2472_v1 = vadd.f32 %v2471_v54, %v5741_v36  ;;  %v2664_v42 = vpop.f32.mrf.mxu1  ;;  %v3662_v9 = vld [vmem:[%s4003_s23 + $0x70] sm:$0xff]  ;;  %v3663_v57 = vld [vmem:[%s4003_s23 + $0x78] sm:$0xff] }
 0x213   : > { %v2473_v56 = vpop.f32.mrf.mxu0 }
 0x214   : > { %2877 = vst [vmem:[%s5753_s19 + $0x20] sm:$0xff] %v2813_v40  ;;  %v2814_v8 = vadd.f32 %v3653_v63, %v2663_v41  ;;  %v2665_v2 = vadd.f32 %v2664_v42, %v2472_v1  ;;  %v2474_v27 = vadd.f32 %v2473_v56, %v5745_v47  ;;  %v2666_v6 = vpop.f32.mrf.mxu1 }
 0x216   : > { %2878 = vst [vmem:[%s5753_s19 + $0x28] sm:$0xff] %v2814_v8  ;;  %v2815_v58 = vadd.f32 %v3654_v4, %v2665_v2  ;;  %v2667_v37 = vadd.f32 %v2666_v6, %v2474_v27  ;;  %v3664_v4 = vld [vmem:[%s4003_s23 + $0x80] sm:$0xff] }
 0x218   : > { %2879 = vst [vmem:[%s5753_s19 + $0x30] sm:$0xff] %v2815_v58  ;;  %v2816_v24 = vadd.f32 %v3655_v26, %v2667_v37 }
 0x21a   : > { %v2477_v17 = vpop.f32.mrf.mxu0  ;;  %2880 = vst [vmem:[%s5753_s19 + $0x38] sm:$0xff] %v2816_v24 }
 0x21b   : > { %v2478_v32 = vadd.f32 %v2477_v17, %v5741_v36  ;;  %v2670_v45 = vpop.f32.mrf.mxu1  ;;  %v3665_v17 = vld [vmem:[%s4003_s23 + $0x88] sm:$0xff] }
 0x21c   : > { %v2479_v34 = vpop.f32.mrf.mxu0 }
 0x21d   : > { %v2671_v33 = vadd.f32 %v2670_v45, %v2478_v32  ;;  %v2480_v10 = vadd.f32 %v2479_v34, %v5745_v47  ;;  %v2672_v62 = vpop.f32.mrf.mxu1 }
 0x21e   : > { %v2481_v0 = vpop.f32.mrf.mxu0 }
 0x21f   : > { %v2817_v22 = vadd.f32 %v3656_v59, %v2671_v33  ;;  %v2673_v50 = vadd.f32 %v2672_v62, %v2480_v10  ;;  %v2482_v18 = vadd.f32 %v2481_v0, %v5741_v36  ;;  %v2674_v5 = vpop.f32.mrf.mxu1  ;;  %v3666_v10 = vld [vmem:[%s4003_s23 + $0x90] sm:$0xff]  ;;  %v3667_v59 = vld [vmem:[%s4003_s23 + $0x98] sm:$0xff] }
 0x220   : > { %v2483_v11 = vpop.f32.mrf.mxu0 }
 0x221   : > { %2881 = vst [vmem:[%s5753_s19 + $0x40] sm:$0xff] %v2817_v22  ;;  %v2818_v39 = vadd.f32 %v3657_v15, %v2673_v50  ;;  %v2675_v28 = vadd.f32 %v2674_v5, %v2482_v18  ;;  %v2484_v20 = vadd.f32 %v2483_v11, %v5745_v47  ;;  %v2676_v61 = vpop.f32.mrf.mxu1 }
 0x223   : > { %2882 = vst [vmem:[%s5753_s19 + $0x48] sm:$0xff] %v2818_v39  ;;  %v2819_v19 = vadd.f32 %v3658_v31, %v2675_v28  ;;  %v2677_v60 = vadd.f32 %v2676_v61, %v2484_v20  ;;  %v3668_v61 = vld [vmem:[%s4003_s23 + $0xa0] sm:$0xff] }
 0x225   : > { %2883 = vst [vmem:[%s5753_s19 + $0x50] sm:$0xff] %v2819_v19  ;;  %v2820_v13 = vadd.f32 %v3659_v46, %v2677_v60 }
 0x226   : > { %v2487_v23 = vpop.f32.mrf.mxu0 }
 0x227   : > { %2884 = vst [vmem:[%s5753_s19 + $0x58] sm:$0xff] %v2820_v13  ;;  %v2488_v49 = vadd.f32 %v2487_v23, %v5741_v36  ;;  %v3669_v23 = vld [vmem:[%s4003_s23 + $0xa8] sm:$0xff] }
 0x228   : > { %v2489_v38 = vpop.f32.mrf.mxu0 }
 0x229   : > { %v2680_v7 = vpop.f32.mrf.mxu1  ;;  %v2490_v25 = vadd.f32 %v2489_v38, %v5745_v47 }
 0x22a   : > { %v2681_v29 = vadd.f32 %v2680_v7, %v2488_v49  ;;  %v2491_v48 = vpop.f32.mrf.mxu0 }
 0x22b   : > { %v2682_v16 = vpop.f32.mrf.mxu1  ;;  %v2492_v43 = vadd.f32 %v2491_v48, %v5741_v36 }
 0x22c   : > { %v2821_v44 = vadd.f32 %v3660_v55, %v2681_v29  ;;  %v2683_v51 = vadd.f32 %v2682_v16, %v2490_v25  ;;  %v2493_v21 = vpop.f32.mrf.mxu0  ;;  %v3670_v29 = vld [vmem:[%s4003_s23 + $0xb0] sm:$0xff] }
 0x22d   : > { %v2684_v52 = vpop.f32.mrf.mxu1  ;;  %v2494_v12 = vadd.f32 %v2493_v21, %v5745_v47 }
 0x22e   : > { %2885 = vst [vmem:[%s5753_s19 + $0x60] sm:$0xff] %v2821_v44  ;;  %v2822_v35 = vadd.f32 %v3661_v53, %v2683_v51  ;;  %v2685_v3 = vadd.f32 %v2684_v52, %v2492_v43  ;;  %v3671_v43 = vld [vmem:[%s4003_s23 + $0xb8] sm:$0xff] }
 0x22f   : > { %v2686_v14 = vpop.f32.mrf.mxu1 }
 0x230   : > { %2886 = vst [vmem:[%s5753_s19 + $0x68] sm:$0xff] %v2822_v35  ;;  %v2823_v30 = vadd.f32 %v3662_v9, %v2685_v3  ;;  %v2687_v54 = vadd.f32 %v2686_v14, %v2494_v12  ;;  %v3672_v9 = vld [vmem:[%s4003_s23 + $0xc0] sm:$0xff] }
 0x232   : > { %2887 = vst [vmem:[%s5753_s19 + $0x70] sm:$0xff] %v2823_v30  ;;  %v2824_v40 = vadd.f32 %v3663_v57, %v2687_v54 }
 0x233   : > { %v2497_v41 = vpop.f32.mrf.mxu0 }
 0x234   : > { %2888 = vst [vmem:[%s5753_s19 + $0x78] sm:$0xff] %v2824_v40  ;;  %v2690_v1 = vpop.f32.mrf.mxu1  ;;  %v2498_v42 = vadd.f32 %v2497_v41, %v5741_v36  ;;  %v3673_v41 = vld [vmem:[%s4003_s23 + $0xc8] sm:$0xff] }
 0x235   : > { %v2499_v56 = vpop.f32.mrf.mxu0 }
 0x236   : > { %v2692_v63 = vpop.f32.mrf.mxu1  ;;  %v2691_v8 = vadd.f32 %v2690_v1, %v2498_v42  ;;  %v2500_v2 = vadd.f32 %v2499_v56, %v5745_v47 }
 0x237   : > { %v2501_v27 = vpop.f32.mrf.mxu0 }
 0x238   : > { %v2694_v6 = vpop.f32.mrf.mxu1  ;;  %v2825_v58 = vadd.f32 %v3664_v4, %v2691_v8  ;;  %v2693_v37 = vadd.f32 %v2692_v63, %v2500_v2  ;;  %v2502_v26 = vadd.f32 %v2501_v27, %v5741_v36  ;;  %v3674_v8 = vld [vmem:[%s4003_s23 + $0xd0] sm:$0xff] }
 0x239   : > { %v2503_v24 = vpop.f32.mrf.mxu0 }
 0x23a   : > { %2889 = vst [vmem:[%s5753_s19 + $0x80] sm:$0xff] %v2825_v58  ;;  %v2826_v32 = vadd.f32 %v3665_v17, %v2693_v37  ;;  %v2695_v45 = vadd.f32 %v2694_v6, %v2502_v26  ;;  %v2504_v34 = vadd.f32 %v2503_v24, %v5745_v47  ;;  %v2696_v33 = vpop.f32.mrf.mxu1  ;;  %v3675_v6 = vld [vmem:[%s4003_s23 + $0xd8] sm:$0xff] }
 0x23c   : > { %2890 = vst [vmem:[%s5753_s19 + $0x88] sm:$0xff] %v2826_v32  ;;  %v2827_v62 = vadd.f32 %v3666_v10, %v2695_v45  ;;  %v2697_v0 = vadd.f32 %v2696_v33, %v2504_v34  ;;  %v3676_v10 = vld [vmem:[%s4003_s23 + $0xe0] sm:$0xff] }
 0x23e   : > { %2891 = vst [vmem:[%s5753_s19 + $0x90] sm:$0xff] %v2827_v62  ;;  %v2828_v22 = vadd.f32 %v3667_v59, %v2697_v0 }
 0x240   : > { %2892 = vst [vmem:[%s5753_s19 + $0x98] sm:$0xff] %v2828_v22 }
 0x241   : > { %v2507_v50 = vpop.f32.mrf.mxu0 }
 0x242   : > { %v2508_v18 = vadd.f32 %v2507_v50, %v5741_v36  ;;  %v2700_v5 = vpop.f32.mrf.mxu1  ;;  %v3677_v50 = vld [vmem:[%s4003_s23 + $0xe8] sm:$0xff] }
 0x243   : > { %v2509_v11 = vpop.f32.mrf.mxu0 }
 0x244   : > { %v2701_v15 = vadd.f32 %v2700_v5, %v2508_v18  ;;  %v2510_v39 = vadd.f32 %v2509_v11, %v5745_v47  ;;  %v2702_v28 = vpop.f32.mrf.mxu1 }
 0x245   : > { %v2511_v20 = vpop.f32.mrf.mxu0 }
 0x246   : > { %v2829_v31 = vadd.f32 %v3668_v61, %v2701_v15  ;;  %v2703_v19 = vadd.f32 %v2702_v28, %v2510_v39  ;;  %v2512_v60 = vadd.f32 %v2511_v20, %v5741_v36  ;;  %v2704_v46 = vpop.f32.mrf.mxu1  ;;  %v3678_v39 = vld [vmem:[%s4003_s23 + $0xf0] sm:$0xff]  ;;  %v3679_v61 = vld [vmem:[%s4003_s23 + $0xf8] sm:$0xff] }
 0x247   : > { %v2513_v13 = vpop.f32.mrf.mxu0 }
 0x248   : > { %2893 = vst [vmem:[%s5753_s19 + $0xa0] sm:$0xff] %v2829_v31  ;;  %v2830_v49 = vadd.f32 %v3669_v23, %v2703_v19  ;;  %v2705_v38 = vadd.f32 %v2704_v46, %v2512_v60  ;;  %v2514_v7 = vadd.f32 %v2513_v13, %v5745_v47  ;;  %v2706_v25 = vpop.f32.mrf.mxu1 }
 0x24a   : > { %2894 = vst [vmem:[%s5753_s19 + $0xa8] sm:$0xff] %v2830_v49  ;;  %v2831_v48 = vadd.f32 %v3670_v29, %v2705_v38  ;;  %v2707_v16 = vadd.f32 %v2706_v25, %v2514_v7  ;;  %v3680_v29 = vld [vmem:[%s4003_s23 + $0x100] sm:$0xff] }
 0x24c   : > { %2895 = vst [vmem:[%s5753_s19 + $0xb0] sm:$0xff] %v2831_v48  ;;  %v2832_v55 = vadd.f32 %v3671_v43, %v2707_v16 }
 0x24d   : > { %v2517_v44 = vpop.f32.mrf.mxu0 }
 0x24e   : > { %2896 = vst [vmem:[%s5753_s19 + $0xb8] sm:$0xff] %v2832_v55  ;;  %v2710_v51 = vpop.f32.mrf.mxu1  ;;  %v2518_v21 = vadd.f32 %v2517_v44, %v5741_v36  ;;  %v3681_v44 = vld [vmem:[%s4003_s23 + $0x108] sm:$0xff] }
 0x24f   : > { %v2519_v52 = vpop.f32.mrf.mxu0 }
 0x250   : > { %v2712_v12 = vpop.f32.mrf.mxu1  ;;  %v2711_v53 = vadd.f32 %v2710_v51, %v2518_v21  ;;  %v2520_v35 = vadd.f32 %v2519_v52, %v5745_v47 }
 0x251   : > { %v2521_v3 = vpop.f32.mrf.mxu0 }
 0x252   : > { %v2714_v14 = vpop.f32.mrf.mxu1  ;;  %v2833_v30 = vadd.f32 %v3672_v9, %v2711_v53  ;;  %v2713_v54 = vadd.f32 %v2712_v12, %v2520_v35  ;;  %v2522_v57 = vadd.f32 %v2521_v3, %v5741_v36  ;;  %v3682_v53 = vld [vmem:[%s4003_s23 + $0x110] sm:$0xff] }
 0x253   : > { %v2523_v40 = vpop.f32.mrf.mxu0 }
 0x254   : > { %2897 = vst [vmem:[%s5753_s19 + $0xc0] sm:$0xff] %v2833_v30  ;;  %v2834_v1 = vadd.f32 %v3673_v41, %v2713_v54  ;;  %v2715_v42 = vadd.f32 %v2714_v14, %v2522_v57  ;;  %v2524_v56 = vadd.f32 %v2523_v40, %v5745_v47  ;;  %v2716_v63 = vpop.f32.mrf.mxu1  ;;  %v3683_v14 = vld [vmem:[%s4003_s23 + $0x118] sm:$0xff] }
 0x256   : > { %2898 = vst [vmem:[%s5753_s19 + $0xc8] sm:$0xff] %v2834_v1  ;;  %v2835_v2 = vadd.f32 %v3674_v8, %v2715_v42  ;;  %v2717_v27 = vadd.f32 %v2716_v63, %v2524_v56  ;;  %v3684_v8 = vld [vmem:[%s4003_s23 + $0x120] sm:$0xff] }
 0x258   : > { %2899 = vst [vmem:[%s5753_s19 + $0xd0] sm:$0xff] %v2835_v2  ;;  %v2836_v4 = vadd.f32 %v3675_v6, %v2717_v27 }
 0x25a   : > { %2900 = vst [vmem:[%s5753_s19 + $0xd8] sm:$0xff] %v2836_v4  ;;  %v2527_v58 = vpop.f32.mrf.mxu0 }
 0x25b   : > { %v2720_v37 = vpop.f32.mrf.mxu1  ;;  %v2528_v26 = vadd.f32 %v2527_v58, %v5741_v36  ;;  %v3685_v58 = vld [vmem:[%s4003_s23 + $0x128] sm:$0xff] }
 0x25c   : > { %v2529_v24 = vpop.f32.mrf.mxu0 }
 0x25d   : > { %v2722_v17 = vpop.f32.mrf.mxu1  ;;  %v2721_v32 = vadd.f32 %v2720_v37, %v2528_v26  ;;  %v2530_v45 = vadd.f32 %v2529_v24, %v5745_v47 }
 0x25e   : > { %v2531_v34 = vpop.f32.mrf.mxu0 }
 0x25f   : > { %v2724_v33 = vpop.f32.mrf.mxu1  ;;  %v2837_v62 = vadd.f32 %v3676_v10, %v2721_v32  ;;  %v2723_v0 = vadd.f32 %v2722_v17, %v2530_v45  ;;  %v2532_v59 = vadd.f32 %v2531_v34, %v5741_v36  ;;  %v3686_v32 = vld [vmem:[%s4003_s23 + $0x130] sm:$0xff] }
 0x260   : > { %v2533_v22 = vpop.f32.mrf.mxu0 }
 0x261   : > { %2901 = vst [vmem:[%s5753_s19 + $0xe0] sm:$0xff] %v2837_v62  ;;  %v2838_v18 = vadd.f32 %v3677_v50, %v2723_v0  ;;  %v2725_v5 = vadd.f32 %v2724_v33, %v2532_v59  ;;  %v2534_v11 = vadd.f32 %v2533_v22, %v5745_v47  ;;  %v2726_v15 = vpop.f32.mrf.mxu1  ;;  %v3687_v33 = vld [vmem:[%s4003_s23 + $0x138] sm:$0xff] }
 0x263   : > { %2902 = vst [vmem:[%s5753_s19 + $0xe8] sm:$0xff] %v2838_v18  ;;  %v2839_v28 = vadd.f32 %v3678_v39, %v2725_v5  ;;  %v2727_v20 = vadd.f32 %v2726_v15, %v2534_v11  ;;  %v3688_v15 = vld [vmem:[%s4003_s23 + $0x140] sm:$0xff] }
 0x265   : > { %2903 = vst [vmem:[%s5753_s19 + $0xf0] sm:$0xff] %v2839_v28  ;;  %v2840_v31 = vadd.f32 %v3679_v61, %v2727_v20 }
 0x267   : > { %2904 = vst [vmem:[%s5753_s19 + $0xf8] sm:$0xff] %v2840_v31  ;;  %v2537_v19 = vpop.f32.mrf.mxu0 }
 0x268   : > { %v2730_v60 = vpop.f32.mrf.mxu1  ;;  %v2538_v46 = vadd.f32 %v2537_v19, %v5741_v36  ;;  %v3689_v19 = vld [vmem:[%s4003_s23 + $0x148] sm:$0xff] }
 0x269   : > { %v2539_v13 = vpop.f32.mrf.mxu0 }
 0x26a   : > { %v2732_v23 = vpop.f32.mrf.mxu1  ;;  %v2731_v49 = vadd.f32 %v2730_v60, %v2538_v46  ;;  %v2540_v38 = vadd.f32 %v2539_v13, %v5745_v47 }
 0x26b   : > { %v2541_v7 = vpop.f32.mrf.mxu0 }
 0x26c   : > { %v2734_v25 = vpop.f32.mrf.mxu1  ;;  %v2841_v48 = vadd.f32 %v3680_v29, %v2731_v49  ;;  %v2733_v16 = vadd.f32 %v2732_v23, %v2540_v38  ;;  %v2542_v43 = vadd.f32 %v2541_v7, %v5741_v36  ;;  %v3690_v49 = vld [vmem:[%s4003_s23 + $0x150] sm:$0xff] }
 0x26d   : > { %v2543_v55 = vpop.f32.mrf.mxu0 }
 0x26e   : > { %2905 = vst [vmem:[%s5753_s19 + $0x100] sm:$0xff] %v2841_v48  ;;  %v2842_v51 = vadd.f32 %v3681_v44, %v2733_v16  ;;  %v2735_v21 = vadd.f32 %v2734_v25, %v2542_v43  ;;  %v2544_v52 = vadd.f32 %v2543_v55, %v5745_v47  ;;  %v2736_v12 = vpop.f32.mrf.mxu1  ;;  %v3691_v25 = vld [vmem:[%s4003_s23 + $0x158] sm:$0xff] }
 0x270   : > { %2906 = vst [vmem:[%s5753_s19 + $0x108] sm:$0xff] %v2842_v51  ;;  %v2843_v35 = vadd.f32 %v3682_v53, %v2735_v21  ;;  %v2737_v3 = vadd.f32 %v2736_v12, %v2544_v52  ;;  %v3692_v53 = vld [vmem:[%s4003_s23 + $0x160] sm:$0xff] }
 0x272   : > { %2907 = vst [vmem:[%s5753_s19 + $0x110] sm:$0xff] %v2843_v35  ;;  %v2844_v9 = vadd.f32 %v3683_v14, %v2737_v3 }
 0x274   : > { %2908 = vst [vmem:[%s5753_s19 + $0x118] sm:$0xff] %v2844_v9  ;;  %v2547_v30 = vpop.f32.mrf.mxu0 }
 0x275   : > { %v2740_v54 = vpop.f32.mrf.mxu1  ;;  %v2548_v57 = vadd.f32 %v2547_v30, %v5741_v36  ;;  %v3693_v30 = vld [vmem:[%s4003_s23 + $0x168] sm:$0xff] }
 0x276   : > { %v2549_v40 = vpop.f32.mrf.mxu0 }
 0x277   : > { %v2742_v41 = vpop.f32.mrf.mxu1  ;;  %v2741_v1 = vadd.f32 %v2740_v54, %v2548_v57  ;;  %v2550_v42 = vadd.f32 %v2549_v40, %v5745_v47 }
 0x278   : > { %v2551_v56 = vpop.f32.mrf.mxu0 }
 0x279   : > { %v2744_v63 = vpop.f32.mrf.mxu1  ;;  %v2845_v2 = vadd.f32 %v3684_v8, %v2741_v1  ;;  %v2743_v27 = vadd.f32 %v2742_v41, %v2550_v42  ;;  %v2552_v6 = vadd.f32 %v2551_v56, %v5741_v36  ;;  %v3694_v1 = vld [vmem:[%s4003_s23 + $0x170] sm:$0xff]  ;;  %v3695_v8 = vld [vmem:[%s4003_s23 + $0x178] sm:$0xff] }
 0x27a   : > { %v2553_v4 = vpop.f32.mrf.mxu0 }
 0x27b   : > { %2909 = vst [vmem:[%s5753_s19 + $0x120] sm:$0xff] %v2845_v2  ;;  %v2846_v37 = vadd.f32 %v3685_v58, %v2743_v27  ;;  %v2745_v26 = vadd.f32 %v2744_v63, %v2552_v6  ;;  %v2554_v24 = vadd.f32 %v2553_v4, %v5745_v47  ;;  %v2746_v17 = vpop.f32.mrf.mxu1 }
 0x27d   : > { %2910 = vst [vmem:[%s5753_s19 + $0x128] sm:$0xff] %v2846_v37  ;;  %v2847_v45 = vadd.f32 %v3686_v32, %v2745_v26  ;;  %v2747_v34 = vadd.f32 %v2746_v17, %v2554_v24  ;;  %v3696_v17 = vld [vmem:[%s4003_s23 + $0x180] sm:$0xff] }
 0x27f   : > { %2911 = vst [vmem:[%s5753_s19 + $0x130] sm:$0xff] %v2847_v45  ;;  %v2848_v10 = vadd.f32 %v3687_v33, %v2747_v34 }
 0x281   : > { %2912 = vst [vmem:[%s5753_s19 + $0x138] sm:$0xff] %v2848_v10 }
 0x282   : > { %v2557_v62 = vpop.f32.mrf.mxu0 }
 0x283   : > { %v2558_v0 = vadd.f32 %v2557_v62, %v5741_v36  ;;  %v2750_v59 = vpop.f32.mrf.mxu1  ;;  %v3697_v62 = vld [vmem:[%s4003_s23 + $0x188] sm:$0xff] }
 0x284   : > { %v2559_v22 = vpop.f32.mrf.mxu0 }
 0x285   : > { %v2751_v50 = vadd.f32 %v2750_v59, %v2558_v0  ;;  %v2560_v18 = vadd.f32 %v2559_v22, %v5745_v47  ;;  %v2752_v5 = vpop.f32.mrf.mxu1 }
 0x286   : > { %v2561_v11 = vpop.f32.mrf.mxu0 }
 0x287   : > { %v2849_v39 = vadd.f32 %v3688_v15, %v2751_v50  ;;  %v2753_v28 = vadd.f32 %v2752_v5, %v2560_v18  ;;  %v2562_v20 = vadd.f32 %v2561_v11, %v5741_v36  ;;  %v2754_v61 = vpop.f32.mrf.mxu1  ;;  %v3698_v5 = vld [vmem:[%s4003_s23 + $0x190] sm:$0xff] }
 0x288   : > { %v2563_v31 = vpop.f32.mrf.mxu0 }
 0x289   : > { %2913 = vst [vmem:[%s5753_s19 + $0x140] sm:$0xff] %v2849_v39  ;;  %v2850_v60 = vadd.f32 %v3689_v19, %v2753_v28  ;;  %v2755_v46 = vadd.f32 %v2754_v61, %v2562_v20  ;;  %v2564_v13 = vadd.f32 %v2563_v31, %v5745_v47  ;;  %v2756_v23 = vpop.f32.mrf.mxu1  ;;  %v3699_v61 = vld [vmem:[%s4003_s23 + $0x198] sm:$0xff] }
 0x28b   : > { %2914 = vst [vmem:[%s5753_s19 + $0x148] sm:$0xff] %v2850_v60  ;;  %v2851_v38 = vadd.f32 %v3690_v49, %v2755_v46  ;;  %v2757_v7 = vadd.f32 %v2756_v23, %v2564_v13  ;;  %v3700_v23 = vld [vmem:[%s4003_s23 + $0x1a0] sm:$0xff] }
 0x28d   : > { %2915 = vst [vmem:[%s5753_s19 + $0x150] sm:$0xff] %v2851_v38  ;;  %v2852_v29 = vadd.f32 %v3691_v25, %v2757_v7 }
 0x28f   : > { %2916 = vst [vmem:[%s5753_s19 + $0x158] sm:$0xff] %v2852_v29 }
 0x291   : > { %v2567_v48 = vpop.f32.mrf.mxu0  ;;  %v2760_v16 = vpop.f32.mrf.mxu1 }
 0x292   : > { %v2568_v43 = vadd.f32 %v2567_v48, %v5741_v36  ;;  %v3701_v48 = vld [vmem:[%s4003_s23 + $0x1a8] sm:$0xff] }
 0x293   : > { %v2569_v55 = vpop.f32.mrf.mxu0  ;;  %v2762_v44 = vpop.f32.mrf.mxu1 }
 0x294   : > { %v2761_v51 = vadd.f32 %v2760_v16, %v2568_v43  ;;  %v2570_v21 = vadd.f32 %v2569_v55, %v5745_v47 }
 0x295   : > { %v2571_v52 = vpop.f32.mrf.mxu0  ;;  %v2764_v12 = vpop.f32.mrf.mxu1 }
 0x296   : > { %v2853_v35 = vadd.f32 %v3692_v53, %v2761_v51  ;;  %v2763_v3 = vadd.f32 %v2762_v44, %v2570_v21  ;;  %v2572_v14 = vadd.f32 %v2571_v52, %v5741_v36  ;;  %v3702_v21 = vld [vmem:[%s4003_s23 + $0x1b0] sm:$0xff] }
 0x297   : > { %v2573_v9 = vpop.f32.mrf.mxu0  ;;  %v2766_v41 = vpop.f32.mrf.mxu1 }
 0x298   : > { %2917 = vst [vmem:[%s5753_s19 + $0x160] sm:$0xff] %v2853_v35  ;;  %v2854_v54 = vadd.f32 %v3693_v30, %v2763_v3  ;;  %v2765_v57 = vadd.f32 %v2764_v12, %v2572_v14  ;;  %v2574_v40 = vadd.f32 %v2573_v9, %v5745_v47  ;;  %v3703_v14 = vld [vmem:[%s4003_s23 + $0x1b8] sm:$0xff] }
 0x29a   : > { %2918 = vst [vmem:[%s5753_s19 + $0x168] sm:$0xff] %v2854_v54  ;;  %v2855_v42 = vadd.f32 %v3694_v1, %v2765_v57  ;;  %v2767_v56 = vadd.f32 %v2766_v41, %v2574_v40  ;;  %v3704_v41 = vld [vmem:[%s4003_s23 + $0x1c0] sm:$0xff] }
 0x29b   : > { %v2577_v63 = vpop.f32.mrf.mxu0 }
 0x29c   : > { %2919 = vst [vmem:[%s5753_s19 + $0x170] sm:$0xff] %v2855_v42  ;;  %v2856_v2 = vadd.f32 %v3695_v8, %v2767_v56  ;;  %v2578_v27 = vadd.f32 %v2577_v63, %v5741_v36  ;;  %v2770_v6 = vpop.f32.mrf.mxu1 }
 0x29d   : > { %v2579_v4 = vpop.f32.mrf.mxu0 }
 0x29e   : > { %2920 = vst [vmem:[%s5753_s19 + $0x178] sm:$0xff] %v2856_v2  ;;  %v2771_v58 = vadd.f32 %v2770_v6, %v2578_v27  ;;  %v2580_v37 = vadd.f32 %v2579_v4, %v5745_v47  ;;  %v2772_v26 = vpop.f32.mrf.mxu1  ;;  %v3705_v2 = vld [vmem:[%s4003_s23 + $0x1c8] sm:$0xff] }
 0x29f   : > { %v2581_v24 = vpop.f32.mrf.mxu0 }
 0x2a0   : > { %v2857_v32 = vadd.f32 %v3696_v17, %v2771_v58  ;;  %v2773_v45 = vadd.f32 %v2772_v26, %v2580_v37  ;;  %v2582_v34 = vadd.f32 %v2581_v24, %v5741_v36  ;;  %v2774_v33 = vpop.f32.mrf.mxu1  ;;  %v3706_v26 = vld [vmem:[%s4003_s23 + $0x1d0] sm:$0xff] }
 0x2a1   : > { %v2583_v10 = vpop.f32.mrf.mxu0 }
 0x2a2   : > { %2921 = vst [vmem:[%s5753_s19 + $0x180] sm:$0xff] %v2857_v32  ;;  %v2858_v0 = vadd.f32 %v3697_v62, %v2773_v45  ;;  %v2775_v59 = vadd.f32 %v2774_v33, %v2582_v34  ;;  %v2584_v22 = vadd.f32 %v2583_v10, %v5745_v47  ;;  %v2776_v50 = vpop.f32.mrf.mxu1  ;;  %v3707_v33 = vld [vmem:[%s4003_s23 + $0x1d8] sm:$0xff] }
 0x2a3   : > { %v2587_v18 = vpop.f32.mrf.mxu0 }
 0x2a4   : > { %2922 = vst [vmem:[%s5753_s19 + $0x188] sm:$0xff] %v2858_v0  ;;  %v2859_v11 = vadd.f32 %v3698_v5, %v2775_v59  ;;  %v2777_v15 = vadd.f32 %v2776_v50, %v2584_v22  ;;  %v2588_v39 = vadd.f32 %v2587_v18, %v5741_v36  ;;  %v2780_v28 = vpop.f32.mrf.mxu1  ;;  %v3708_v50 = vld [vmem:[%s4003_s23 + $0x1e0] sm:$0xff] }
 0x2a5   : > { %v2589_v20 = vpop.f32.mrf.mxu0 }
 0x2a6   : > { %2923 = vst [vmem:[%s5753_s19 + $0x190] sm:$0xff] %v2859_v11  ;;  %v2860_v31 = vadd.f32 %v3699_v61, %v2777_v15  ;;  %v2781_v19 = vadd.f32 %v2780_v28, %v2588_v39  ;;  %v2590_v60 = vadd.f32 %v2589_v20, %v5745_v47  ;;  %v2782_v46 = vpop.f32.mrf.mxu1  ;;  %v3709_v28 = vld [vmem:[%s4003_s23 + $0x1e8] sm:$0xff] }
 0x2a7   : > { %v2591_v13 = vpop.f32.mrf.mxu0 }
 0x2a8   : > { %2924 = vst [vmem:[%s5753_s19 + $0x198] sm:$0xff] %v2860_v31  ;;  %v2861_v49 = vadd.f32 %v3700_v23, %v2781_v19  ;;  %v2783_v38 = vadd.f32 %v2782_v46, %v2590_v60  ;;  %v2592_v7 = vadd.f32 %v2591_v13, %v5741_v36  ;;  %v2784_v25 = vpop.f32.mrf.mxu1  ;;  %v3710_v60 = vld [vmem:[%s4003_s23 + $0x1f0] sm:$0xff] }
 0x2a9   : > { %v2593_v29 = vpop.f32.mrf.mxu0 }
 0x2aa   : > { %2925 = vst [vmem:[%s5753_s19 + $0x1a0] sm:$0xff] %v2861_v49  ;;  %v2862_v16 = vadd.f32 %v3701_v48, %v2783_v38  ;;  %v2785_v43 = vadd.f32 %v2784_v25, %v2592_v7  ;;  %v2594_v55 = vadd.f32 %v2593_v29, %v5745_v47  ;;  %v2786_v44 = vpop.f32.mrf.mxu1 }
 0x2ab   : > { %v2597_v51 = vpop.f32.mrf.mxu0 }
 0x2ac   : > { %2926 = vst [vmem:[%s5753_s19 + $0x1a8] sm:$0xff] %v2862_v16  ;;  %v2863_v52 = vadd.f32 %v3702_v21, %v2785_v43  ;;  %v2787_v12 = vadd.f32 %v2786_v44, %v2594_v55  ;;  %v2598_v53 = vadd.f32 %v2597_v51, %v5741_v36  ;;  %v2790_v35 = vpop.f32.mrf.mxu1 }
 0x2ad   : > { %v2599_v3 = vpop.f32.mrf.mxu0 }
 0x2ae   : > { %2927 = vst [vmem:[%s5753_s19 + $0x1b0] sm:$0xff] %v2863_v52  ;;  %v2864_v9 = vadd.f32 %v3703_v14, %v2787_v12  ;;  %v2791_v30 = vadd.f32 %v2790_v35, %v2598_v53  ;;  %v2600_v54 = vadd.f32 %v2599_v3, %v5745_v47  ;;  %v2792_v57 = vpop.f32.mrf.mxu1 }
 0x2af   : > { %v2601_v40 = vpop.f32.mrf.mxu0 }
 0x2b0   : > { %2928 = vst [vmem:[%s5753_s19 + $0x1b8] sm:$0xff] %v2864_v9  ;;  %v2865_v1 = vadd.f32 %v3704_v41, %v2791_v30  ;;  %v2793_v42 = vadd.f32 %v2792_v57, %v2600_v54  ;;  %v2602_v56 = vadd.f32 %v2601_v40, %v5741_v36  ;;  %v2794_v63 = vpop.f32.mrf.mxu1 }
 0x2b1   : > { %v2603_v8 = vpop.f32.mrf.mxu0 }
 0x2b2   : > { %2929 = vst [vmem:[%s5753_s19 + $0x1c0] sm:$0xff] %v2865_v1  ;;  %v2866_v27 = vadd.f32 %v3705_v2, %v2793_v42  ;;  %v2795_v6 = vadd.f32 %v2794_v63, %v2602_v56  ;;  %v2604_v4 = vadd.f32 %v2603_v8, %v5745_v47  ;;  %v2796_v58 = vpop.f32.mrf.mxu1 }
 0x2b3   : > { %v2607_v37 = vpop.f32.mrf.mxu0 }
 0x2b4   : > { %2930 = vst [vmem:[%s5753_s19 + $0x1c8] sm:$0xff] %v2866_v27  ;;  %v2867_v24 = vadd.f32 %v3706_v26, %v2795_v6  ;;  %v2797_v17 = vadd.f32 %v2796_v58, %v2604_v4  ;;  %v2608_v32 = vadd.f32 %v2607_v37, %v5741_v36  ;;  %v2800_v45 = vpop.f32.mrf.mxu1 }
 0x2b5   : > { %v2609_v34 = vpop.f32.mrf.mxu0 }
 0x2b6   : > { %2931 = vst [vmem:[%s5753_s19 + $0x1d0] sm:$0xff] %v2867_v24  ;;  %v2868_v10 = vadd.f32 %v3707_v33, %v2797_v17  ;;  %v2801_v62 = vadd.f32 %v2800_v45, %v2608_v32  ;;  %v2610_v0 = vadd.f32 %v2609_v34, %v5745_v47  ;;  %v2802_v59 = vpop.f32.mrf.mxu1 }
 0x2b7   : > { %v2611_v22 = vpop.f32.mrf.mxu0 }
 0x2b8   : > { %2932 = vst [vmem:[%s5753_s19 + $0x1d8] sm:$0xff] %v2868_v10  ;;  %v2869_v18 = vadd.f32 %v3708_v50, %v2801_v62  ;;  %v2803_v5 = vadd.f32 %v2802_v59, %v2610_v0  ;;  %v2612_v11 = vadd.f32 %v2611_v22, %v5741_v36  ;;  %v2804_v15 = vpop.f32.mrf.mxu1 }
 0x2b9   : > { %v2613_v39 = vpop.f32.mrf.mxu0 }
 0x2ba   : > { %2933 = vst [vmem:[%s5753_s19 + $0x1e0] sm:$0xff] %v2869_v18  ;;  %v2870_v20 = vadd.f32 %v3709_v28, %v2803_v5  ;;  %v2805_v61 = vadd.f32 %v2804_v15, %v2612_v11  ;;  %v2614_v31 = vadd.f32 %v2613_v39, %v5745_v47  ;;  %v2806_v19 = vpop.f32.mrf.mxu1  ;;  %v3711_v47 = vld [vmem:[%s4003_s23 + $0x1f8] sm:$0xff] }
 0x2bc   : > { %2934 = vst [vmem:[%s5753_s19 + $0x1e8] sm:$0xff] %v2870_v20  ;;  %v2871_v46 = vadd.f32 %v3710_v60, %v2805_v61  ;;  %v2807_v36 = vadd.f32 %v2806_v19, %v2614_v31 }
 0x2be   : > { %2935 = vst [vmem:[%s5753_s19 + $0x1f0] sm:$0xff] %v2871_v46  ;;  %v2872_v13 = vadd.f32 %v3711_v47, %v2807_v36 }
 0x2c0   : > { %2936 = vst [vmem:[%s5753_s19 + $0x1f8] sm:$0xff] %v2872_v13 }
 0x2c1   : > { %3725 = shalt.err (!%p3722_p3)
}
 0x2c2   : > { %s3726_s23 = scalar_lea.hbm %s5945_s29, 8192  ;;  %s3730_s18 = scalar_lea.hbm %s6001_s7, 16384 }
 0x2c3   : > { %p3727_p4 = scmp.ne.s32.totalorder %s5945_s29, %s3726_s23  ;;  %p3731_p9 = scmp.lt.s32.totalorder %s5945_s29, %s6001_s7 }
 0x2c4   : > { %p3732_p10 = scmp.lt.s32.totalorder %s3730_s18, %s3726_s23 }
 0x2c5   : > { %p3728_p7 = pnand %p3727_p4, %p3855_p5 }
 0x2c6   : > { %p3733_p11 = por %p3732_p10, %p3731_p9 }
 0x2c7   : > { %p3729_p8 = pneg %p3728_p7 }
 0x2c9   : > { %p3734_p12 = pnand %p3733_p11, %p3729_p8 }
 0x2cb   : > { %3737 = shalt.err (!%p3734_p12)
}
 0x2cc   : > { %s3775_s22 = smov 256   ;;  %s3776_s17 = smov 16  }
 0x2cd   : > { %3159 = dma.vmem_to_hbm [thread:$0]  (%p3855_p5), %s5947_s21, 8192, %s5945_s29, %s5954_s28, %s3775_s22, %s3775_s22, %s3776_s17  }
 0x2ce PF: > { %p3165_p13 = scmp.ge.s32.totalorder %s3772_s27, 2  ;;  %s2967_s8 = sand.u32 1, %s3760_s24  }
 0x2cf   : > { %s2968_s9 = scalar_lea.sflag [#allocation3], %s2967_s8 }
 0x2d0   : > { %p3162_p0 = pnand %p3165_p13, %p3859_p6 }
 0x2d2   : > { %p3163_p1 = pneg %p3162_p0 }
 0x2d4   : > { %3755 = dma.done.wait (%p3163_p1), %s2968_s9, 8192  }
 0x2d5   : > { %3757 = vsyncadd (%p3163_p1), %s2968_s9, 4294959104  ;;  %p17_p2 = scmp.ge.s32.totalorder %s3842_s30, 4   ;;  %s6032_s24 = smov %s3764_s25 }
 0x2d6   : > { %s6033_s25 = smov %s3768_s26  ;;  %s6034_s26 = smov %s3853_s10 }
 0x2d7   : > { %s6035_s27 = smov %s3842_s30  ;;  %19 = sbr.rel (!%p17_p2) target bundleno = 3 (0x3), region = 83 }
 0x2dc   :  { %2973 = vsyncpa [#allocation3], 1 }
 0x2dd   :  { %2975 = vsyncpa [#allocation3 + $0x1], 1 }

</bundles_post_ra>
